<compile_context>
chip_gen: v5e
topology: v5e:2x2
jax: 0.10.0
libtpu: 0.0.40
codegen_flags: <defaults>
</compile_context>

<pallas_src>
import functools

import jax
import jax.numpy as jnp
import numpy as np
from jax import lax
from jax.experimental import pallas as pl
from jax.experimental.pallas import tpu as pltpu

BN_EPS = 1e-5
_TAPS = [(dy, dx) for dy in range(3) for dx in range(3)]


# ---------------------------------------------------------------------------
# Fused Pallas kernel (whole batch, single invocation)
# ---------------------------------------------------------------------------
def _fused_cnn_kernel(x1_ref, w1_ref, s1_ref, t1_ref,
                      w2_ref, s2_ref, t2_ref,
                      w3_ref, s3_ref, t3_ref,
                      p1_ref, p2_ref, g_ref,
                      fcw_ref, fcb_ref,
                      o_ref,
                      *, ws1, wp2, wp3, m2, m3):
    """Whole MFCCBinaryCNN forward, batch merged into the M (row) dimension.

    x1_ref : (N*H*W, 9)        bf16 im2col patches of the zero-padded input (row stride ws1=W)
    w1_ref : (9, 32)           bf16 conv1 weights, row k = dy*3+dx
    wK_ref : (9, CinK, CoutK)  bf16 conv2/conv3 weights split into one (Cin,Cout) block per tap
    sK/tK  : (1, CoutK)        f32 folded BatchNorm scale / shift
    p1_ref : (N*Lp2, |vb1|)    bf16 0/1 pool-gather + pad-scatter (conv1 -> padded conv2 input)
    p2_ref : (N*Lp3, |vb2|)    bf16 0/1 pool-gather + pad-scatter (conv2 -> padded conv3 input)
    g_ref  : (N, m3)           bf16 global-average-pool weights (1/16 on valid rows, else 0)
    fcw_ref: (128, 2) bf16 ; fcb_ref: (1, 2) f32 ; o_ref: (N, 2) f32
    """
    f32, bf16 = jnp.float32, jnp.bfloat16

    # ---- conv1 + BN + ReLU : one im2col matmul (K = 9), bf16 operands, f32 accumulate ----
    a1 = jnp.dot(x1_ref[...], w1_ref[...], preferred_element_type=f32)
    a1 = jnp.maximum(a1 * s1_ref[...] + t1_ref[...], 0.0)                 # (N*H*W, 32) f32
    r1 = a1.shape[0]

    # ---- fused 2x2/stride-2 max-pool (flat, row stride ws1) + scatter into padded layout --
    hb = jnp.maximum(a1[:r1 - 1], a1[1:])
    vb = jnp.maximum(hb[:r1 - 1 - ws1], hb[ws1:])
    x2p = jnp.dot(p1_ref[...], vb.astype(bf16), preferred_element_type=f32)  # (N*Lp2, 32)

    # ---- conv2 + BN + ReLU : 9 accumulated matmuls (no im2col scratch) --------------------
    a2 = jnp.dot(x2p[0:m2, :].astype(bf16), w2_ref[0], preferred_element_type=f32)
    for k in range(1, 9):
        dy, dx = _TAPS[k]
        off = dy * wp2 + dx
        a2 = a2 + jnp.dot(x2p[off:off + m2, :].astype(bf16), w2_ref[k],
                          preferred_element_type=f32)
    a2 = jnp.maximum(a2 * s2_ref[...] + t2_ref[...], 0.0)                 # (m2, 64) f32

    hb = jnp.maximum(a2[:m2 - 1], a2[1:])
    vb = jnp.maximum(hb[:m2 - 1 - wp2], hb[wp2:])
    x3p = jnp.dot(p2_ref[...], vb.astype(bf16), preferred_element_type=f32)  # (N*Lp3, 64)

    # ---- conv3 + BN + ReLU : 9 accumulated matmuls ----------------------------------------
    a3 = jnp.dot(x3p[0:m3, :].astype(bf16), w3_ref[0], preferred_element_type=f32)
    for k in range(1, 9):
        dy, dx = _TAPS[k]
        off = dy * wp3 + dx
        a3 = a3 + jnp.dot(x3p[off:off + m3, :].astype(bf16), w3_ref[k],
                          preferred_element_type=f32)
    a3 = jnp.maximum(a3 * s3_ref[...] + t3_ref[...], 0.0)                 # (m3, 128) f32

    # ---- global average pool (g zeroes pad / garbage rows) + Linear head ------------------
    pooled = jnp.dot(g_ref[...], a3.astype(bf16), preferred_element_type=f32)   # (N, 128)
    o_ref[...] = (jnp.dot(pooled.astype(bf16), fcw_ref[...], preferred_element_type=f32)
                  + fcb_ref[...])


# ---------------------------------------------------------------------------
# Wrapper glue: im2col, BN folding, constant pool/GAP matrices, pallas_call
# ---------------------------------------------------------------------------
def _im2col_3x3(x):
    """x: (N, H, W) -> (N*H*W, 9) patches of the zero-padded input, column k = dy*3+dx."""
    n, h, w = x.shape
    xp = jnp.pad(x, ((0, 0), (1, 1), (1, 1)))
    cols = [xp[:, dy:dy + h, dx:dx + w] for dy, dx in _TAPS]
    return jnp.stack(cols, axis=-1).reshape(n * h * w, 9)


def fold_bn(layer):
    scale = layer["gamma"] / jnp.sqrt(layer["var"] + BN_EPS)
    shift = layer["beta"] + (layer["b"] - layer["mean"]) * scale
    return scale.reshape(1, -1), shift.reshape(1, -1)


def mfcc_binary_cnn_forward(x_nchw, params):
    n, _, h, w = x_nchw.shape
    assert h % 4 == 0 and w % 4 == 0, "needs two 2x2 max-pools"
    bf16 = jnp.bfloat16

    h2, wd2, h3, wd3 = h // 2, w // 2, h // 4, w // 4
    wp2, wp3 = wd2 + 2, wd3 + 2
    lp2, lp3 = (h2 + 3) * wp2, (h3 + 3) * wp3      # per-sample zero-padded flat lengths
    l1 = h * w
    m2 = (n - 1) * lp2 + (h2 - 1) * wp2 + wd2      # conv2 output rows actually needed
    m3 = (n - 1) * lp3 + (h3 - 1) * wp3 + wd3      # conv3 output rows actually needed
    assert m2 + 2 * wp2 + 2 <= n * lp2 and m3 + 2 * wp3 + 2 <= n * lp3

    # im2col patches of the padded input, batch merged into rows
    x1 = _im2col_3x3(x_nchw[:, 0].astype(jnp.float32)).astype(bf16)       # (n*l1, 9)

    c1, c2, c3 = params["convs"]
    s1, t1 = fold_bn(c1)
    s2, t2 = fold_bn(c2)
    s3, t3 = fold_bn(c3)
    co1 = c1["w"].shape[3]
    ci2, co2 = c2["w"].shape[2], c2["w"].shape[3]
    ci3, co3 = c3["w"].shape[2], c3["w"].shape[3]
    w1 = c1["w"].reshape(9, co1).astype(bf16)
    w2 = c2["w"].reshape(9, ci2, co2).astype(bf16)     # per-tap (Cin, Cout) blocks
    w3 = c3["w"].reshape(9, ci3, co3).astype(bf16)
    fcw = params["fc_w"].T.astype(bf16)                # (128, 2)
    fcb = params["fc_b"].reshape(1, -1)                # (1, 2) f32

    # Constant 0/1 pool-gather + pad-scatter matrices, block-diagonal over the merged batch.
    # TODO(synk): these scale O(L_out*L_in); for MFCC maps much larger than ~32x32 replace
    # with strided sublane selection (or raise vmem_limit_bytes) before VMEM gets tight (v7x
    # hits its 64 MiB ceiling first).  Values (0/1, 1/16) are exact in bf16.
    p1 = np.zeros((n * lp2, n * l1 - w - 1), np.float32)
    for b in range(n):
        for i in range(h2):
            for j in range(wd2):
                p1[b * lp2 + (i + 1) * wp2 + (j + 1), b * l1 + 2 * i * w + 2 * j] = 1.0

    p2 = np.zeros((n * lp3, m2 - 1 - wp2), np.float32)
    for b in range(n):
        for i in range(h3):
            for j in range(wd3):
                p2[b * lp3 + (i + 1) * wp3 + (j + 1), b * lp2 + 2 * i * wp2 + 2 * j] = 1.0

    g = np.zeros((n, m3), np.float32)
    for b in range(n):
        for i in range(h3):
            for j in range(wd3):
                g[b, b * lp3 + i * wp3 + j] = 1.0 / (h3 * wd3)

    p1 = jnp.asarray(p1, bf16)
    p2 = jnp.asarray(p2, bf16)
    g = jnp.asarray(g, bf16)

    kernel = functools.partial(_fused_cnn_kernel, ws1=w, wp2=wp2, wp3=wp3, m2=m2, m3=m3)

    def full(shape):
        return pl.BlockSpec(shape, lambda i, _nd=len(shape): (0,) * _nd)

    # Single grid step: whole batch, every operand and intermediate resident in VMEM.
    out = pl.pallas_call(
        kernel,
        out_shape=jax.ShapeDtypeStruct((n, fcw.shape[1]), jnp.float32),
        grid=(1,),
        in_specs=[
            full((n * l1, 9)),
            full((9, co1)), full((1, co1)), full((1, co1)),
            full((9, ci2, co2)), full((1, co2)), full((1, co2)),
            full((9, ci3, co3)), full((1, co3)), full((1, co3)),
            full(tuple(p1.shape)), full(tuple(p2.shape)), full(tuple(g.shape)),
            full(tuple(fcw.shape)), full(tuple(fcb.shape)),
        ],
        out_specs=full((n, fcw.shape[1])),
        compiler_params=pltpu.CompilerParams(dimension_semantics=("arbitrary",)),
    )(x1, w1, s1, t1, w2, s2, t2, w3, s3, t3, p1, p2, g, fcw, fcb)
    return out


# ---------------------------------------------------------------------------
# Deterministic parameter init (shapes match MFCCBinaryCNN.__init__)
# ---------------------------------------------------------------------------
def init_params(key):
    def conv_block(k, cin, cout):
        ks = jax.random.split(k, 6)
        bound = 1.0 / np.sqrt(cin * 9)
        return dict(
            w=jax.random.uniform(ks[0], (3, 3, cin, cout), jnp.float32, -bound, bound),  # HWIO
            b=jax.random.uniform(ks[1], (cout,), jnp.float32, -bound, bound),
            gamma=jax.random.uniform(ks[2], (cout,), jnp.float32, 0.5, 1.5),
            beta=0.1 * jax.random.normal(ks[3], (cout,), jnp.float32),
            mean=0.1 * jax.random.normal(ks[4], (cout,), jnp.float32),
            var=jax.random.uniform(ks[5], (cout,), jnp.float32, 0.5, 1.5),
        )

    k1, k2, k3, k4, k5 = jax.random.split(key, 5)
    bound = 1.0 / np.sqrt(128)
    return dict(
        convs=[conv_block(k1, 1, 32), conv_block(k2, 32, 64), conv_block(k3, 64, 128)],
        fc_w=jax.random.uniform(k4, (2, 128), jnp.float32, -bound, bound),   # PyTorch (out, in)
        fc_b=jax.random.uniform(k5, (2,), jnp.float32, -bound, bound),
    )


# ---------------------------------------------------------------------------
# Pure-JAX reference (same math, f32 XLA conv) for validation
# ---------------------------------------------------------------------------
def reference_forward(x_nchw, params):
    x = jnp.transpose(x_nchw, (0, 2, 3, 1)).astype(jnp.float32)
    for i, layer in enumerate(params["convs"]):
        x = lax.conv_general_dilated(
            x, layer["w"], (1, 1), "SAME",
            dimension_numbers=("NHWC", "HWIO", "NHWC"),
        ) + layer["b"]
        x = (x - layer["mean"]) / jnp.sqrt(layer["var"] + BN_EPS) * layer["gamma"] + layer["beta"]
        x = jnp.maximum(x, 0.0)
        if i < 2:
            x = lax.reduce_window(x, -jnp.inf, lax.max, (1, 2, 2, 1), (1, 2, 2, 1), "VALID")
    x = jnp.mean(x, axis=(1, 2))
    return x @ params["fc_w"].T + params["fc_b"]


if __name__ == "__main__":
    key = jax.random.PRNGKey(0)
    kp, kx = jax.random.split(key)
    params = init_params(kp)
    # PyTorch input convention: (N, C=1, H, W) MFCC map
    x = jax.random.normal(kx, (2, 1, 16, 16), jnp.float32)

    out = jax.jit(mfcc_binary_cnn_forward)(x, params)
    out = jax.block_until_ready(out)

    ref = reference_forward(x, params)
    assert out.shape == (2, 2)
    # bf16 MXU operands (per perf review) -> compare against the f32 XLA reference loosely.
    np.testing.assert_allclose(np.asarray(out), np.asarray(ref), rtol=5e-2, atol=5e-2)
    print("KERNEL_OK")
</pallas_src>

<mosaic_0001>
module attributes {stable_mosaic.version = 11 : i64} {
  func.func @_fused_cnn_kernel(%arg0: i32, %arg1: memref<512x9xbf16, #tpu.memory_space<vmem>>, %arg2: memref<9x32xbf16, #tpu.memory_space<vmem>>, %arg3: memref<1x32xf32, #tpu.memory_space<vmem>>, %arg4: memref<1x32xf32, #tpu.memory_space<vmem>>, %arg5: memref<9x32x64xbf16, #tpu.memory_space<vmem>>, %arg6: memref<1x64xf32, #tpu.memory_space<vmem>>, %arg7: memref<1x64xf32, #tpu.memory_space<vmem>>, %arg8: memref<9x64x128xbf16, #tpu.memory_space<vmem>>, %arg9: memref<1x128xf32, #tpu.memory_space<vmem>>, %arg10: memref<1x128xf32, #tpu.memory_space<vmem>>, %arg11: memref<220x495xbf16, #tpu.memory_space<vmem>>, %arg12: memref<84x177xbf16, #tpu.memory_space<vmem>>, %arg13: memref<2x64xbf16, #tpu.memory_space<vmem>>, %arg14: memref<128x2xbf16, #tpu.memory_space<vmem>>, %arg15: memref<1x2xf32, #tpu.memory_space<vmem>>, %arg16: memref<2x2xf32, #tpu.memory_space<vmem>>) attributes {dimension_semantics = [#tpu.dimension_semantics<arbitrary>], iteration_bounds = array<i64: 1>, scalar_prefetch = 0 : i64, scratch_operands = 0 : i64, tpu.core_type = #tpu.core_type<tc>, window_params = [{pipeline_mode = #tpu.pipeline_mode<synchronous>, transform_indices = @transform_0, window_bounds = array<i64: 512, 9>}, {pipeline_mode = #tpu.pipeline_mode<synchronous>, transform_indices = @transform_1, window_bounds = array<i64: 9, 32>}, {pipeline_mode = #tpu.pipeline_mode<synchronous>, transform_indices = @transform_2, window_bounds = array<i64: 1, 32>}, {pipeline_mode = #tpu.pipeline_mode<synchronous>, transform_indices = @transform_3, window_bounds = array<i64: 1, 32>}, {pipeline_mode = #tpu.pipeline_mode<synchronous>, transform_indices = @transform_4, window_bounds = array<i64: 9, 32, 64>}, {pipeline_mode = #tpu.pipeline_mode<synchronous>, transform_indices = @transform_5, window_bounds = array<i64: 1, 64>}, {pipeline_mode = #tpu.pipeline_mode<synchronous>, transform_indices = @transform_6, window_bounds = array<i64: 1, 64>}, {pipeline_mode = #tpu.pipeline_mode<synchronous>, transform_indices = @transform_7, window_bounds = array<i64: 9, 64, 128>}, {pipeline_mode = #tpu.pipeline_mode<synchronous>, transform_indices = @transform_8, window_bounds = array<i64: 1, 128>}, {pipeline_mode = #tpu.pipeline_mode<synchronous>, transform_indices = @transform_9, window_bounds = array<i64: 1, 128>}, {pipeline_mode = #tpu.pipeline_mode<synchronous>, transform_indices = @transform_10, window_bounds = array<i64: 220, 495>}, {pipeline_mode = #tpu.pipeline_mode<synchronous>, transform_indices = @transform_11, window_bounds = array<i64: 84, 177>}, {pipeline_mode = #tpu.pipeline_mode<synchronous>, transform_indices = @transform_12, window_bounds = array<i64: 2, 64>}, {pipeline_mode = #tpu.pipeline_mode<synchronous>, transform_indices = @transform_13, window_bounds = array<i64: 128, 2>}, {pipeline_mode = #tpu.pipeline_mode<synchronous>, transform_indices = @transform_14, window_bounds = array<i64: 1, 2>}, {pipeline_mode = #tpu.pipeline_mode<synchronous>, transform_indices = @transform_15, window_bounds = array<i64: 2, 2>}]} {
    %c0 = arith.constant 0 : index
    %c0_0 = arith.constant 0 : index
    %0 = vector.load %arg1[%c0, %c0_0] : memref<512x9xbf16, #tpu.memory_space<vmem>>, vector<512x9xbf16>
    %c0_1 = arith.constant 0 : index
    %c0_2 = arith.constant 0 : index
    %1 = vector.load %arg2[%c0_1, %c0_2] : memref<9x32xbf16, #tpu.memory_space<vmem>>, vector<9x32xbf16>
    %cst = arith.constant dense<0.000000e+00> : vector<512x32xf32>
    %2 = tpu.matmul %0, %1, %cst {dimension_numbers = #tpu.dot_dimension_numbers<[1], [0], [0], [1], [0, 0, 1, 1], [], []>} : vector<512x9xbf16>, vector<9x32xbf16>, vector<512x32xf32> -> vector<512x32xf32>
    %c0_3 = arith.constant 0 : index
    %c0_4 = arith.constant 0 : index
    %3 = vector.load %arg3[%c0_3, %c0_4] : memref<1x32xf32, #tpu.memory_space<vmem>>, vector<1x32xf32>
    %4 = vector.broadcast %3 : vector<1x32xf32> to vector<512x32xf32>
    %5 = arith.mulf %2, %4 : vector<512x32xf32>
    %c0_5 = arith.constant 0 : index
    %c0_6 = arith.constant 0 : index
    %6 = vector.load %arg4[%c0_5, %c0_6] : memref<1x32xf32, #tpu.memory_space<vmem>>, vector<1x32xf32>
    %7 = vector.broadcast %6 : vector<1x32xf32> to vector<512x32xf32>
    %8 = arith.addf %5, %7 : vector<512x32xf32>
    %cst_7 = arith.constant 0.000000e+00 : f32
    %9 = vector.broadcast %cst_7 : f32 to vector<512x32xf32>
    %10 = arith.maximumf %8, %9 : vector<512x32xf32>
    %11 = vector.extract_strided_slice %10 {offsets = [0, 0], sizes = [511, 32], strides = [1, 1]} : vector<512x32xf32> to vector<511x32xf32>
    %12 = vector.extract_strided_slice %10 {offsets = [1, 0], sizes = [511, 32], strides = [1, 1]} : vector<512x32xf32> to vector<511x32xf32>
    %13 = arith.maximumf %11, %12 : vector<511x32xf32>
    %14 = vector.extract_strided_slice %13 {offsets = [0, 0], sizes = [495, 32], strides = [1, 1]} : vector<511x32xf32> to vector<495x32xf32>
    %15 = vector.extract_strided_slice %13 {offsets = [16, 0], sizes = [495, 32], strides = [1, 1]} : vector<511x32xf32> to vector<495x32xf32>
    %16 = arith.maximumf %14, %15 : vector<495x32xf32>
    %c0_8 = arith.constant 0 : index
    %c0_9 = arith.constant 0 : index
    %17 = vector.load %arg11[%c0_8, %c0_9] : memref<220x495xbf16, #tpu.memory_space<vmem>>, vector<220x495xbf16>
    %18 = arith.truncf %16 : vector<495x32xf32> to vector<495x32xbf16>
    %cst_10 = arith.constant dense<0.000000e+00> : vector<220x32xf32>
    %19 = tpu.matmul %17, %18, %cst_10 {dimension_numbers = #tpu.dot_dimension_numbers<[1], [0], [0], [1], [0, 0, 1, 1], [], []>} : vector<220x495xbf16>, vector<495x32xbf16>, vector<220x32xf32> -> vector<220x32xf32>
    %20 = vector.extract_strided_slice %19 {offsets = [0, 0], sizes = [188, 32], strides = [1, 1]} : vector<220x32xf32> to vector<188x32xf32>
    %21 = arith.truncf %20 : vector<188x32xf32> to vector<188x32xbf16>
    %c0_11 = arith.constant 0 : index
    %c0_12 = arith.constant 0 : index
    %c0_13 = arith.constant 0 : index
    %22 = vector.load %arg5[%c0_11, %c0_12, %c0_13] : memref<9x32x64xbf16, #tpu.memory_space<vmem>>, vector<1x32x64xbf16>
    %23 = vector.shape_cast %22 : vector<1x32x64xbf16> to vector<32x64xbf16>
    %cst_14 = arith.constant dense<0.000000e+00> : vector<188x64xf32>
    %24 = tpu.matmul %21, %23, %cst_14 {dimension_numbers = #tpu.dot_dimension_numbers<[1], [0], [0], [1], [0, 0, 1, 1], [], []>} : vector<188x32xbf16>, vector<32x64xbf16>, vector<188x64xf32> -> vector<188x64xf32>
    %25 = vector.extract_strided_slice %19 {offsets = [1, 0], sizes = [188, 32], strides = [1, 1]} : vector<220x32xf32> to vector<188x32xf32>
    %26 = arith.truncf %25 : vector<188x32xf32> to vector<188x32xbf16>
    %c1 = arith.constant 1 : index
    %c0_15 = arith.constant 0 : index
    %c0_16 = arith.constant 0 : index
    %27 = vector.load %arg5[%c1, %c0_15, %c0_16] : memref<9x32x64xbf16, #tpu.memory_space<vmem>>, vector<1x32x64xbf16>
    %28 = vector.shape_cast %27 : vector<1x32x64xbf16> to vector<32x64xbf16>
    %cst_17 = arith.constant dense<0.000000e+00> : vector<188x64xf32>
    %29 = tpu.matmul %26, %28, %cst_17 {dimension_numbers = #tpu.dot_dimension_numbers<[1], [0], [0], [1], [0, 0, 1, 1], [], []>} : vector<188x32xbf16>, vector<32x64xbf16>, vector<188x64xf32> -> vector<188x64xf32>
    %30 = arith.addf %24, %29 : vector<188x64xf32>
    %31 = vector.extract_strided_slice %19 {offsets = [2, 0], sizes = [188, 32], strides = [1, 1]} : vector<220x32xf32> to vector<188x32xf32>
    %32 = arith.truncf %31 : vector<188x32xf32> to vector<188x32xbf16>
    %c2 = arith.constant 2 : index
    %c0_18 = arith.constant 0 : index
    %c0_19 = arith.constant 0 : index
    %33 = vector.load %arg5[%c2, %c0_18, %c0_19] : memref<9x32x64xbf16, #tpu.memory_space<vmem>>, vector<1x32x64xbf16>
    %34 = vector.shape_cast %33 : vector<1x32x64xbf16> to vector<32x64xbf16>
    %cst_20 = arith.constant dense<0.000000e+00> : vector<188x64xf32>
    %35 = tpu.matmul %32, %34, %cst_20 {dimension_numbers = #tpu.dot_dimension_numbers<[1], [0], [0], [1], [0, 0, 1, 1], [], []>} : vector<188x32xbf16>, vector<32x64xbf16>, vector<188x64xf32> -> vector<188x64xf32>
    %36 = arith.addf %30, %35 : vector<188x64xf32>
    %37 = vector.extract_strided_slice %19 {offsets = [10, 0], sizes = [188, 32], strides = [1, 1]} : vector<220x32xf32> to vector<188x32xf32>
    %38 = arith.truncf %37 : vector<188x32xf32> to vector<188x32xbf16>
    %c3 = arith.constant 3 : index
    %c0_21 = arith.constant 0 : index
    %c0_22 = arith.constant 0 : index
    %39 = vector.load %arg5[%c3, %c0_21, %c0_22] : memref<9x32x64xbf16, #tpu.memory_space<vmem>>, vector<1x32x64xbf16>
    %40 = vector.shape_cast %39 : vector<1x32x64xbf16> to vector<32x64xbf16>
    %cst_23 = arith.constant dense<0.000000e+00> : vector<188x64xf32>
    %41 = tpu.matmul %38, %40, %cst_23 {dimension_numbers = #tpu.dot_dimension_numbers<[1], [0], [0], [1], [0, 0, 1, 1], [], []>} : vector<188x32xbf16>, vector<32x64xbf16>, vector<188x64xf32> -> vector<188x64xf32>
    %42 = arith.addf %36, %41 : vector<188x64xf32>
    %43 = vector.extract_strided_slice %19 {offsets = [11, 0], sizes = [188, 32], strides = [1, 1]} : vector<220x32xf32> to vector<188x32xf32>
    %44 = arith.truncf %43 : vector<188x32xf32> to vector<188x32xbf16>
    %c4 = arith.constant 4 : index
    %c0_24 = arith.constant 0 : index
    %c0_25 = arith.constant 0 : index
    %45 = vector.load %arg5[%c4, %c0_24, %c0_25] : memref<9x32x64xbf16, #tpu.memory_space<vmem>>, vector<1x32x64xbf16>
    %46 = vector.shape_cast %45 : vector<1x32x64xbf16> to vector<32x64xbf16>
    %cst_26 = arith.constant dense<0.000000e+00> : vector<188x64xf32>
    %47 = tpu.matmul %44, %46, %cst_26 {dimension_numbers = #tpu.dot_dimension_numbers<[1], [0], [0], [1], [0, 0, 1, 1], [], []>} : vector<188x32xbf16>, vector<32x64xbf16>, vector<188x64xf32> -> vector<188x64xf32>
    %48 = arith.addf %42, %47 : vector<188x64xf32>
    %49 = vector.extract_strided_slice %19 {offsets = [12, 0], sizes = [188, 32], strides = [1, 1]} : vector<220x32xf32> to vector<188x32xf32>
    %50 = arith.truncf %49 : vector<188x32xf32> to vector<188x32xbf16>
    %c5 = arith.constant 5 : index
    %c0_27 = arith.constant 0 : index
    %c0_28 = arith.constant 0 : index
    %51 = vector.load %arg5[%c5, %c0_27, %c0_28] : memref<9x32x64xbf16, #tpu.memory_space<vmem>>, vector<1x32x64xbf16>
    %52 = vector.shape_cast %51 : vector<1x32x64xbf16> to vector<32x64xbf16>
    %cst_29 = arith.constant dense<0.000000e+00> : vector<188x64xf32>
    %53 = tpu.matmul %50, %52, %cst_29 {dimension_numbers = #tpu.dot_dimension_numbers<[1], [0], [0], [1], [0, 0, 1, 1], [], []>} : vector<188x32xbf16>, vector<32x64xbf16>, vector<188x64xf32> -> vector<188x64xf32>
    %54 = arith.addf %48, %53 : vector<188x64xf32>
    %55 = vector.extract_strided_slice %19 {offsets = [20, 0], sizes = [188, 32], strides = [1, 1]} : vector<220x32xf32> to vector<188x32xf32>
    %56 = arith.truncf %55 : vector<188x32xf32> to vector<188x32xbf16>
    %c6 = arith.constant 6 : index
    %c0_30 = arith.constant 0 : index
    %c0_31 = arith.constant 0 : index
    %57 = vector.load %arg5[%c6, %c0_30, %c0_31] : memref<9x32x64xbf16, #tpu.memory_space<vmem>>, vector<1x32x64xbf16>
    %58 = vector.shape_cast %57 : vector<1x32x64xbf16> to vector<32x64xbf16>
    %cst_32 = arith.constant dense<0.000000e+00> : vector<188x64xf32>
    %59 = tpu.matmul %56, %58, %cst_32 {dimension_numbers = #tpu.dot_dimension_numbers<[1], [0], [0], [1], [0, 0, 1, 1], [], []>} : vector<188x32xbf16>, vector<32x64xbf16>, vector<188x64xf32> -> vector<188x64xf32>
    %60 = arith.addf %54, %59 : vector<188x64xf32>
    %61 = vector.extract_strided_slice %19 {offsets = [21, 0], sizes = [188, 32], strides = [1, 1]} : vector<220x32xf32> to vector<188x32xf32>
    %62 = arith.truncf %61 : vector<188x32xf32> to vector<188x32xbf16>
    %c7 = arith.constant 7 : index
    %c0_33 = arith.constant 0 : index
    %c0_34 = arith.constant 0 : index
    %63 = vector.load %arg5[%c7, %c0_33, %c0_34] : memref<9x32x64xbf16, #tpu.memory_space<vmem>>, vector<1x32x64xbf16>
    %64 = vector.shape_cast %63 : vector<1x32x64xbf16> to vector<32x64xbf16>
    %cst_35 = arith.constant dense<0.000000e+00> : vector<188x64xf32>
    %65 = tpu.matmul %62, %64, %cst_35 {dimension_numbers = #tpu.dot_dimension_numbers<[1], [0], [0], [1], [0, 0, 1, 1], [], []>} : vector<188x32xbf16>, vector<32x64xbf16>, vector<188x64xf32> -> vector<188x64xf32>
    %66 = arith.addf %60, %65 : vector<188x64xf32>
    %67 = vector.extract_strided_slice %19 {offsets = [22, 0], sizes = [188, 32], strides = [1, 1]} : vector<220x32xf32> to vector<188x32xf32>
    %68 = arith.truncf %67 : vector<188x32xf32> to vector<188x32xbf16>
    %c8 = arith.constant 8 : index
    %c0_36 = arith.constant 0 : index
    %c0_37 = arith.constant 0 : index
    %69 = vector.load %arg5[%c8, %c0_36, %c0_37] : memref<9x32x64xbf16, #tpu.memory_space<vmem>>, vector<1x32x64xbf16>
    %70 = vector.shape_cast %69 : vector<1x32x64xbf16> to vector<32x64xbf16>
    %cst_38 = arith.constant dense<0.000000e+00> : vector<188x64xf32>
    %71 = tpu.matmul %68, %70, %cst_38 {dimension_numbers = #tpu.dot_dimension_numbers<[1], [0], [0], [1], [0, 0, 1, 1], [], []>} : vector<188x32xbf16>, vector<32x64xbf16>, vector<188x64xf32> -> vector<188x64xf32>
    %72 = arith.addf %66, %71 : vector<188x64xf32>
    %c0_39 = arith.constant 0 : index
    %c0_40 = arith.constant 0 : index
    %73 = vector.load %arg6[%c0_39, %c0_40] : memref<1x64xf32, #tpu.memory_space<vmem>>, vector<1x64xf32>
    %74 = vector.broadcast %73 : vector<1x64xf32> to vector<188x64xf32>
    %75 = arith.mulf %72, %74 : vector<188x64xf32>
    %c0_41 = arith.constant 0 : index
    %c0_42 = arith.constant 0 : index
    %76 = vector.load %arg7[%c0_41, %c0_42] : memref<1x64xf32, #tpu.memory_space<vmem>>, vector<1x64xf32>
    %77 = vector.broadcast %76 : vector<1x64xf32> to vector<188x64xf32>
    %78 = arith.addf %75, %77 : vector<188x64xf32>
    %cst_43 = arith.constant 0.000000e+00 : f32
    %79 = vector.broadcast %cst_43 : f32 to vector<188x64xf32>
    %80 = arith.maximumf %78, %79 : vector<188x64xf32>
    %81 = vector.extract_strided_slice %80 {offsets = [0, 0], sizes = [187, 64], strides = [1, 1]} : vector<188x64xf32> to vector<187x64xf32>
    %82 = vector.extract_strided_slice %80 {offsets = [1, 0], sizes = [187, 64], strides = [1, 1]} : vector<188x64xf32> to vector<187x64xf32>
    %83 = arith.maximumf %81, %82 : vector<187x64xf32>
    %84 = vector.extract_strided_slice %83 {offsets = [0, 0], sizes = [177, 64], strides = [1, 1]} : vector<187x64xf32> to vector<177x64xf32>
    %85 = vector.extract_strided_slice %83 {offsets = [10, 0], sizes = [177, 64], strides = [1, 1]} : vector<187x64xf32> to vector<177x64xf32>
    %86 = arith.maximumf %84, %85 : vector<177x64xf32>
    %c0_44 = arith.constant 0 : index
    %c0_45 = arith.constant 0 : index
    %87 = vector.load %arg12[%c0_44, %c0_45] : memref<84x177xbf16, #tpu.memory_space<vmem>>, vector<84x177xbf16>
    %88 = arith.truncf %86 : vector<177x64xf32> to vector<177x64xbf16>
    %cst_46 = arith.constant dense<0.000000e+00> : vector<84x64xf32>
    %89 = tpu.matmul %87, %88, %cst_46 {dimension_numbers = #tpu.dot_dimension_numbers<[1], [0], [0], [1], [0, 0, 1, 1], [], []>} : vector<84x177xbf16>, vector<177x64xbf16>, vector<84x64xf32> -> vector<84x64xf32>
    %90 = vector.extract_strided_slice %89 {offsets = [0, 0], sizes = [64, 64], strides = [1, 1]} : vector<84x64xf32> to vector<64x64xf32>
    %91 = arith.truncf %90 : vector<64x64xf32> to vector<64x64xbf16>
    %c0_47 = arith.constant 0 : index
    %c0_48 = arith.constant 0 : index
    %c0_49 = arith.constant 0 : index
    %92 = vector.load %arg8[%c0_47, %c0_48, %c0_49] : memref<9x64x128xbf16, #tpu.memory_space<vmem>>, vector<1x64x128xbf16>
    %93 = vector.shape_cast %92 : vector<1x64x128xbf16> to vector<64x128xbf16>
    %cst_50 = arith.constant dense<0.000000e+00> : vector<64x128xf32>
    %94 = tpu.matmul %91, %93, %cst_50 {dimension_numbers = #tpu.dot_dimension_numbers<[1], [0], [0], [1], [0, 0, 1, 1], [], []>} : vector<64x64xbf16>, vector<64x128xbf16>, vector<64x128xf32> -> vector<64x128xf32>
    %95 = vector.extract_strided_slice %89 {offsets = [1, 0], sizes = [64, 64], strides = [1, 1]} : vector<84x64xf32> to vector<64x64xf32>
    %96 = arith.truncf %95 : vector<64x64xf32> to vector<64x64xbf16>
    %c1_51 = arith.constant 1 : index
    %c0_52 = arith.constant 0 : index
    %c0_53 = arith.constant 0 : index
    %97 = vector.load %arg8[%c1_51, %c0_52, %c0_53] : memref<9x64x128xbf16, #tpu.memory_space<vmem>>, vector<1x64x128xbf16>
    %98 = vector.shape_cast %97 : vector<1x64x128xbf16> to vector<64x128xbf16>
    %cst_54 = arith.constant dense<0.000000e+00> : vector<64x128xf32>
    %99 = tpu.matmul %96, %98, %cst_54 {dimension_numbers = #tpu.dot_dimension_numbers<[1], [0], [0], [1], [0, 0, 1, 1], [], []>} : vector<64x64xbf16>, vector<64x128xbf16>, vector<64x128xf32> -> vector<64x128xf32>
    %100 = arith.addf %94, %99 : vector<64x128xf32>
    %101 = vector.extract_strided_slice %89 {offsets = [2, 0], sizes = [64, 64], strides = [1, 1]} : vector<84x64xf32> to vector<64x64xf32>
    %102 = arith.truncf %101 : vector<64x64xf32> to vector<64x64xbf16>
    %c2_55 = arith.constant 2 : index
    %c0_56 = arith.constant 0 : index
    %c0_57 = arith.constant 0 : index
    %103 = vector.load %arg8[%c2_55, %c0_56, %c0_57] : memref<9x64x128xbf16, #tpu.memory_space<vmem>>, vector<1x64x128xbf16>
    %104 = vector.shape_cast %103 : vector<1x64x128xbf16> to vector<64x128xbf16>
    %cst_58 = arith.constant dense<0.000000e+00> : vector<64x128xf32>
    %105 = tpu.matmul %102, %104, %cst_58 {dimension_numbers = #tpu.dot_dimension_numbers<[1], [0], [0], [1], [0, 0, 1, 1], [], []>} : vector<64x64xbf16>, vector<64x128xbf16>, vector<64x128xf32> -> vector<64x128xf32>
    %106 = arith.addf %100, %105 : vector<64x128xf32>
    %107 = vector.extract_strided_slice %89 {offsets = [6, 0], sizes = [64, 64], strides = [1, 1]} : vector<84x64xf32> to vector<64x64xf32>
    %108 = arith.truncf %107 : vector<64x64xf32> to vector<64x64xbf16>
    %c3_59 = arith.constant 3 : index
    %c0_60 = arith.constant 0 : index
    %c0_61 = arith.constant 0 : index
    %109 = vector.load %arg8[%c3_59, %c0_60, %c0_61] : memref<9x64x128xbf16, #tpu.memory_space<vmem>>, vector<1x64x128xbf16>
    %110 = vector.shape_cast %109 : vector<1x64x128xbf16> to vector<64x128xbf16>
    %cst_62 = arith.constant dense<0.000000e+00> : vector<64x128xf32>
    %111 = tpu.matmul %108, %110, %cst_62 {dimension_numbers = #tpu.dot_dimension_numbers<[1], [0], [0], [1], [0, 0, 1, 1], [], []>} : vector<64x64xbf16>, vector<64x128xbf16>, vector<64x128xf32> -> vector<64x128xf32>
    %112 = arith.addf %106, %111 : vector<64x128xf32>
    %113 = vector.extract_strided_slice %89 {offsets = [7, 0], sizes = [64, 64], strides = [1, 1]} : vector<84x64xf32> to vector<64x64xf32>
    %114 = arith.truncf %113 : vector<64x64xf32> to vector<64x64xbf16>
    %c4_63 = arith.constant 4 : index
    %c0_64 = arith.constant 0 : index
    %c0_65 = arith.constant 0 : index
    %115 = vector.load %arg8[%c4_63, %c0_64, %c0_65] : memref<9x64x128xbf16, #tpu.memory_space<vmem>>, vector<1x64x128xbf16>
    %116 = vector.shape_cast %115 : vector<1x64x128xbf16> to vector<64x128xbf16>
    %cst_66 = arith.constant dense<0.000000e+00> : vector<64x128xf32>
    %117 = tpu.matmul %114, %116, %cst_66 {dimension_numbers = #tpu.dot_dimension_numbers<[1], [0], [0], [1], [0, 0, 1, 1], [], []>} : vector<64x64xbf16>, vector<64x128xbf16>, vector<64x128xf32> -> vector<64x128xf32>
    %118 = arith.addf %112, %117 : vector<64x128xf32>
    %119 = vector.extract_strided_slice %89 {offsets = [8, 0], sizes = [64, 64], strides = [1, 1]} : vector<84x64xf32> to vector<64x64xf32>
    %120 = arith.truncf %119 : vector<64x64xf32> to vector<64x64xbf16>
    %c5_67 = arith.constant 5 : index
    %c0_68 = arith.constant 0 : index
    %c0_69 = arith.constant 0 : index
    %121 = vector.load %arg8[%c5_67, %c0_68, %c0_69] : memref<9x64x128xbf16, #tpu.memory_space<vmem>>, vector<1x64x128xbf16>
    %122 = vector.shape_cast %121 : vector<1x64x128xbf16> to vector<64x128xbf16>
    %cst_70 = arith.constant dense<0.000000e+00> : vector<64x128xf32>
    %123 = tpu.matmul %120, %122, %cst_70 {dimension_numbers = #tpu.dot_dimension_numbers<[1], [0], [0], [1], [0, 0, 1, 1], [], []>} : vector<64x64xbf16>, vector<64x128xbf16>, vector<64x128xf32> -> vector<64x128xf32>
    %124 = arith.addf %118, %123 : vector<64x128xf32>
    %125 = vector.extract_strided_slice %89 {offsets = [12, 0], sizes = [64, 64], strides = [1, 1]} : vector<84x64xf32> to vector<64x64xf32>
    %126 = arith.truncf %125 : vector<64x64xf32> to vector<64x64xbf16>
    %c6_71 = arith.constant 6 : index
    %c0_72 = arith.constant 0 : index
    %c0_73 = arith.constant 0 : index
    %127 = vector.load %arg8[%c6_71, %c0_72, %c0_73] : memref<9x64x128xbf16, #tpu.memory_space<vmem>>, vector<1x64x128xbf16>
    %128 = vector.shape_cast %127 : vector<1x64x128xbf16> to vector<64x128xbf16>
    %cst_74 = arith.constant dense<0.000000e+00> : vector<64x128xf32>
    %129 = tpu.matmul %126, %128, %cst_74 {dimension_numbers = #tpu.dot_dimension_numbers<[1], [0], [0], [1], [0, 0, 1, 1], [], []>} : vector<64x64xbf16>, vector<64x128xbf16>, vector<64x128xf32> -> vector<64x128xf32>
    %130 = arith.addf %124, %129 : vector<64x128xf32>
    %131 = vector.extract_strided_slice %89 {offsets = [13, 0], sizes = [64, 64], strides = [1, 1]} : vector<84x64xf32> to vector<64x64xf32>
    %132 = arith.truncf %131 : vector<64x64xf32> to vector<64x64xbf16>
    %c7_75 = arith.constant 7 : index
    %c0_76 = arith.constant 0 : index
    %c0_77 = arith.constant 0 : index
    %133 = vector.load %arg8[%c7_75, %c0_76, %c0_77] : memref<9x64x128xbf16, #tpu.memory_space<vmem>>, vector<1x64x128xbf16>
    %134 = vector.shape_cast %133 : vector<1x64x128xbf16> to vector<64x128xbf16>
    %cst_78 = arith.constant dense<0.000000e+00> : vector<64x128xf32>
    %135 = tpu.matmul %132, %134, %cst_78 {dimension_numbers = #tpu.dot_dimension_numbers<[1], [0], [0], [1], [0, 0, 1, 1], [], []>} : vector<64x64xbf16>, vector<64x128xbf16>, vector<64x128xf32> -> vector<64x128xf32>
    %136 = arith.addf %130, %135 : vector<64x128xf32>
    %137 = vector.extract_strided_slice %89 {offsets = [14, 0], sizes = [64, 64], strides = [1, 1]} : vector<84x64xf32> to vector<64x64xf32>
    %138 = arith.truncf %137 : vector<64x64xf32> to vector<64x64xbf16>
    %c8_79 = arith.constant 8 : index
    %c0_80 = arith.constant 0 : index
    %c0_81 = arith.constant 0 : index
    %139 = vector.load %arg8[%c8_79, %c0_80, %c0_81] : memref<9x64x128xbf16, #tpu.memory_space<vmem>>, vector<1x64x128xbf16>
    %140 = vector.shape_cast %139 : vector<1x64x128xbf16> to vector<64x128xbf16>
    %cst_82 = arith.constant dense<0.000000e+00> : vector<64x128xf32>
    %141 = tpu.matmul %138, %140, %cst_82 {dimension_numbers = #tpu.dot_dimension_numbers<[1], [0], [0], [1], [0, 0, 1, 1], [], []>} : vector<64x64xbf16>, vector<64x128xbf16>, vector<64x128xf32> -> vector<64x128xf32>
    %142 = arith.addf %136, %141 : vector<64x128xf32>
    %c0_83 = arith.constant 0 : index
    %c0_84 = arith.constant 0 : index
    %143 = vector.load %arg9[%c0_83, %c0_84] : memref<1x128xf32, #tpu.memory_space<vmem>>, vector<1x128xf32>
    %144 = vector.broadcast %143 : vector<1x128xf32> to vector<64x128xf32>
    %145 = arith.mulf %142, %144 : vector<64x128xf32>
    %c0_85 = arith.constant 0 : index
    %c0_86 = arith.constant 0 : index
    %146 = vector.load %arg10[%c0_85, %c0_86] : memref<1x128xf32, #tpu.memory_space<vmem>>, vector<1x128xf32>
    %147 = vector.broadcast %146 : vector<1x128xf32> to vector<64x128xf32>
    %148 = arith.addf %145, %147 : vector<64x128xf32>
    %cst_87 = arith.constant 0.000000e+00 : f32
    %149 = vector.broadcast %cst_87 : f32 to vector<64x128xf32>
    %150 = arith.maximumf %148, %149 : vector<64x128xf32>
    %c0_88 = arith.constant 0 : index
    %c0_89 = arith.constant 0 : index
    %151 = vector.load %arg13[%c0_88, %c0_89] : memref<2x64xbf16, #tpu.memory_space<vmem>>, vector<2x64xbf16>
    %152 = arith.truncf %150 : vector<64x128xf32> to vector<64x128xbf16>
    %cst_90 = arith.constant dense<0.000000e+00> : vector<2x128xf32>
    %153 = tpu.matmul %151, %152, %cst_90 {dimension_numbers = #tpu.dot_dimension_numbers<[1], [0], [0], [1], [0, 0, 1, 1], [], []>} : vector<2x64xbf16>, vector<64x128xbf16>, vector<2x128xf32> -> vector<2x128xf32>
    %154 = arith.truncf %153 : vector<2x128xf32> to vector<2x128xbf16>
    %c0_91 = arith.constant 0 : index
    %c0_92 = arith.constant 0 : index
    %155 = vector.load %arg14[%c0_91, %c0_92] : memref<128x2xbf16, #tpu.memory_space<vmem>>, vector<128x2xbf16>
    %cst_93 = arith.constant dense<0.000000e+00> : vector<2x2xf32>
    %156 = tpu.matmul %154, %155, %cst_93 {dimension_numbers = #tpu.dot_dimension_numbers<[1], [0], [0], [1], [0, 0, 1, 1], [], []>} : vector<2x128xbf16>, vector<128x2xbf16>, vector<2x2xf32> -> vector<2x2xf32>
    %c0_94 = arith.constant 0 : index
    %c0_95 = arith.constant 0 : index
    %157 = vector.load %arg15[%c0_94, %c0_95] : memref<1x2xf32, #tpu.memory_space<vmem>>, vector<1x2xf32>
    %158 = vector.broadcast %157 : vector<1x2xf32> to vector<2x2xf32>
    %159 = arith.addf %156, %158 : vector<2x2xf32>
    %c0_96 = arith.constant 0 : index
    %c0_97 = arith.constant 0 : index
    %160 = vector.load %arg16[%c0_96, %c0_97] : memref<2x2xf32, #tpu.memory_space<vmem>>, vector<2x2xf32>
    tpu.vector_store %arg16[%c0_96, %c0_97], %159 {strides = array<i32>} : memref<2x2xf32, #tpu.memory_space<vmem>>, vector<2x2xf32>,
    return
  }
  func.func @transform_0(%arg0: i32) -> (i32, i32) {
    %c0_i32 = arith.constant 0 : i32
    %c0_i32_0 = arith.constant 0 : i32
    %c0_i32_1 = arith.constant 0 : i32
    return %c0_i32, %c0_i32_0 : i32, i32
  }
  func.func @transform_1(%arg0: i32) -> (i32, i32) {
    %c0_i32 = arith.constant 0 : i32
    %c0_i32_0 = arith.constant 0 : i32
    %c0_i32_1 = arith.constant 0 : i32
    return %c0_i32, %c0_i32_0 : i32, i32
  }
  func.func @transform_2(%arg0: i32) -> (i32, i32) {
    %c0_i32 = arith.constant 0 : i32
    %c0_i32_0 = arith.constant 0 : i32
    %c0_i32_1 = arith.constant 0 : i32
    return %c0_i32, %c0_i32_0 : i32, i32
  }
  func.func @transform_3(%arg0: i32) -> (i32, i32) {
    %c0_i32 = arith.constant 0 : i32
    %c0_i32_0 = arith.constant 0 : i32
    %c0_i32_1 = arith.constant 0 : i32
    return %c0_i32, %c0_i32_0 : i32, i32
  }
  func.func @transform_4(%arg0: i32) -> (i32, i32, i32) {
    %c0_i32 = arith.constant 0 : i32
    %c0_i32_0 = arith.constant 0 : i32
    %c0_i32_1 = arith.constant 0 : i32
    %c0_i32_2 = arith.constant 0 : i32
    return %c0_i32, %c0_i32_0, %c0_i32_1 : i32, i32, i32
  }
  func.func @transform_5(%arg0: i32) -> (i32, i32) {
    %c0_i32 = arith.constant 0 : i32
    %c0_i32_0 = arith.constant 0 : i32
    %c0_i32_1 = arith.constant 0 : i32
    return %c0_i32, %c0_i32_0 : i32, i32
  }
  func.func @transform_6(%arg0: i32) -> (i32, i32) {
    %c0_i32 = arith.constant 0 : i32
    %c0_i32_0 = arith.constant 0 : i32
    %c0_i32_1 = arith.constant 0 : i32
    return %c0_i32, %c0_i32_0 : i32, i32
  }
  func.func @transform_7(%arg0: i32) -> (i32, i32, i32) {
    %c0_i32 = arith.constant 0 : i32
    %c0_i32_0 = arith.constant 0 : i32
    %c0_i32_1 = arith.constant 0 : i32
    %c0_i32_2 = arith.constant 0 : i32
    return %c0_i32, %c0_i32_0, %c0_i32_1 : i32, i32, i32
  }
  func.func @transform_8(%arg0: i32) -> (i32, i32) {
    %c0_i32 = arith.constant 0 : i32
    %c0_i32_0 = arith.constant 0 : i32
    %c0_i32_1 = arith.constant 0 : i32
    return %c0_i32, %c0_i32_0 : i32, i32
  }
  func.func @transform_9(%arg0: i32) -> (i32, i32) {
    %c0_i32 = arith.constant 0 : i32
    %c0_i32_0 = arith.constant 0 : i32
    %c0_i32_1 = arith.constant 0 : i32
    return %c0_i32, %c0_i32_0 : i32, i32
  }
  func.func @transform_10(%arg0: i32) -> (i32, i32) {
    %c0_i32 = arith.constant 0 : i32
    %c0_i32_0 = arith.constant 0 : i32
    %c0_i32_1 = arith.constant 0 : i32
    return %c0_i32, %c0_i32_0 : i32, i32
  }
  func.func @transform_11(%arg0: i32) -> (i32, i32) {
    %c0_i32 = arith.constant 0 : i32
    %c0_i32_0 = arith.constant 0 : i32
    %c0_i32_1 = arith.constant 0 : i32
    return %c0_i32, %c0_i32_0 : i32, i32
  }
  func.func @transform_12(%arg0: i32) -> (i32, i32) {
    %c0_i32 = arith.constant 0 : i32
    %c0_i32_0 = arith.constant 0 : i32
    %c0_i32_1 = arith.constant 0 : i32
    return %c0_i32, %c0_i32_0 : i32, i32
  }
  func.func @transform_13(%arg0: i32) -> (i32, i32) {
    %c0_i32 = arith.constant 0 : i32
    %c0_i32_0 = arith.constant 0 : i32
    %c0_i32_1 = arith.constant 0 : i32
    return %c0_i32, %c0_i32_0 : i32, i32
  }
  func.func @transform_14(%arg0: i32) -> (i32, i32) {
    %c0_i32 = arith.constant 0 : i32
    %c0_i32_0 = arith.constant 0 : i32
    %c0_i32_1 = arith.constant 0 : i32
    return %c0_i32, %c0_i32_0 : i32, i32
  }
  func.func @transform_15(%arg0: i32) -> (i32, i32) {
    %c0_i32 = arith.constant 0 : i32
    %c0_i32_0 = arith.constant 0 : i32
    %c0_i32_1 = arith.constant 0 : i32
    return %c0_i32, %c0_i32_0 : i32, i32
  }
}

</mosaic_0001>

<bundles_post_ra>
// kernel: mfcc_binary_cnn_forward.1
= control target key start
LH: loop header
LB: loop body
LE: loop exit
PB: predicated region body
PF: predicated region fallthrough
CT: control target
= control target key end

     0   :  { %vm380_vm0 = vcmask 1043456   ;;  %vm381_vm1 = vcmask 1044480   ;;  %v6188_v3 = vmov 65535   ;;  %s8716_s0 = inlined_call_operand.vmem [shape: bf16[512,9], index: 0, kind: input, shape index: {}]   ;;  %s8717_s1 = inlined_call_operand.vmem [shape: bf16[9,32], index: 1, kind: input, shape index: {}]   ;;  %s8718_s2 = inlined_call_operand.vmem [shape: f32[1,32], index: 2, kind: input, shape index: {}]   ;;  %s8719_s3 = inlined_call_operand.vmem [shape: f32[1,32], index: 3, kind: input, shape index: {}]   ;;  %s8720_s4 = inlined_call_operand.vmem [shape: bf16[9,32,64], index: 4, kind: input, shape index: {}]   ;;  %s8721_s5 = inlined_call_operand.vmem [shape: f32[1,64], index: 5, kind: input, shape index: {}]   ;;  %s8722_s6 = inlined_call_operand.vmem [shape: f32[1,64], index: 6, kind: input, shape index: {}]   ;;  %s8723_s7 = inlined_call_operand.vmem [shape: bf16[9,64,128], index: 7, kind: input, shape index: {}]   ;;  %s8724_s8 = inlined_call_operand.vmem [shape: f32[1,128], index: 8, kind: input, shape index: {}]   ;;  %s8725_s9 = inlined_call_operand.vmem [shape: f32[1,128], index: 9, kind: input, shape index: {}]   ;;  %s8726_s10 = inlined_call_operand.vmem [shape: bf16[220,495], index: 10, kind: input, shape index: {}]   ;;  %s8727_s11 = inlined_call_operand.vmem [shape: bf16[84,177], index: 11, kind: input, shape index: {}]   ;;  %s8728_s12 = inlined_call_operand.vmem [shape: bf16[2,64], index: 12, kind: input, shape index: {}]   ;;  %s8729_s13 = inlined_call_operand.vmem [shape: bf16[128,2], index: 13, kind: input, shape index: {}]   ;;  %s8730_s14 = inlined_call_operand.vmem [shape: f32[1,2], index: 14, kind: input, shape index: {}]   ;;  %s8731_s15 = inlined_call_operand.hbm [shape: f32[2,2], index: 15, kind: output, shape index: {}]  }
   0x1   :  { %v5182_v0 = vld [vmem:[%s8717_s1] sm:$0xf]  ;;  %v6021_v1 = vld [vmem:[%s8717_s1] sm:$0x10]  ;;  %v382_v4 = vsel %vm380_vm0, 4294967295, %v6188_v3 }
   0x2   :  { %v5183_v2 = vor.u32 %v6021_v1, %v5182_v0  ;;  %v383_v5 = vsel %vm381_vm1, %v382_v4, 0  ;;  %v5989_v7 = vld [vmem:[%s8716_s0] sm:$0xff] }
   0x4   :  { %v385_v6 = vand.u32 %v5183_v2, %v383_v5 }
   0x5   :  { %20 = vsyncpa [#allocation3], 0  ;;  %vm283_vm2 = vcmask 72704   ;;  %v5990_v8 = vld [vmem:[%s8716_s0 + $0x8] sm:$0xff]  ;;  %v5991_v9 = vld [vmem:[%s8716_s0 + $0x10] sm:$0xff]  ;;  %vm820_vm3 = vcmask 1046528  }
   0x6   :  { %394 = vmatpush.bf16.msra.mxu0 %v385_v6  ;;  %v5992_v10 = vld [vmem:[%s8716_s0 + $0x18] sm:$0xff]  ;;  %v5993_v11 = vld [vmem:[%s8716_s0 + $0x20] sm:$0xff]  ;;  %v5994_v12 = vld [vmem:[%s8716_s0 + $0x28] sm:$0xff]  ;;  %vm1534_vm4 = vcmask 1047552   ;;  %vm1491_vm5 = vcmask 908288   ;;  %vm1981_vm6 = vcmask 261120  }
   0x7   :  { %v5995_v13 = vld [vmem:[%s8716_s0 + $0x30] sm:$0xff]  ;;  %v5996_v14 = vld [vmem:[%s8716_s0 + $0x38] sm:$0xff]  ;;  %v6314_v15 = vld [vmem:[%s8718_s2] ss:$0 sm:$0xff]  ;;  %vm1873_vm7 = vsmask.f32 7424 }
   0x8   :  { %v5997_v16 = vld [vmem:[%s8716_s0 + $0x40] sm:$0xff]  ;;  %v5998_v28 = vld [vmem:[%s8716_s0 + $0x48] sm:$0xff]  ;;  %v5999_v43 = vld [vmem:[%s8716_s0 + $0x50] sm:$0xff]  ;;  %vm2826_vm8 = vcmask 1045504   ;;  %vm2572_vm9 = vsmask.f32 6400 }
   0x9   :  { %5184 = vmatmul.msk.bf16.vlgmr.msra.gmra.mxu0 %vm283_vm2, %v5989_v7  ;;  %v6323_v19 = vld [vmem:[%s8719_s3] ss:$0 sm:$0xff]  ;;  %v6000_v61 = vld [vmem:[%s8716_s0 + $0x58] sm:$0xff]  ;;  %vm3168_vm10 = vsmask.f32 5376  ;;  %vm3947_vm11 = vcmask 1040384  }
   0xa   :  { %vm3928_vm12 = vcmask 400384   ;;  %vm4109_vm13 = vcmask 523264   ;;  %vm4408_vm14 = vsmask.f32 4352  ;;  %s6190_s27 = smov [#allocation2]   ;;  %vm5034_vm15 = vcmask 9216  }
   0xb   :  { %s5041_s28 = sshll.u32 %s6190_s27, 4  ;;  %s5042_s28 = int_to_ptr.vmem [resolvable:$true] %s5041_s28 }
  0x19   :  { %5185 = vmatmul.msk.bf16.gmra.mxu0 %vm283_vm2, %v5990_v8 }
  0x29   :  { %5186 = vmatmul.msk.bf16.gmra.mxu0 %vm283_vm2, %v5991_v9 }
  0x39   :  { %5187 = vmatmul.msk.bf16.gmra.mxu0 %vm283_vm2, %v5992_v10 }
  0x49   :  { %5188 = vmatmul.msk.bf16.gmra.mxu0 %vm283_vm2, %v5993_v11 }
  0x59   :  { %5189 = vmatmul.msk.bf16.gmra.mxu0 %vm283_vm2, %v5994_v12 }
  0x69   :  { %5190 = vmatmul.msk.bf16.gmra.mxu0 %vm283_vm2, %v5995_v13 }
  0x79   :  { %5191 = vmatmul.msk.bf16.gmra.mxu0 %vm283_vm2, %v5996_v14 }
  0x86   :  { %v396_v17 = vpop.f32.mrf.mxu0 }
  0x87   :  { %v560_v18 = vmul.f32 %v6314_v15, %v396_v17  ;;  %v6001_v17 = vld [vmem:[%s8716_s0 + $0x60] sm:$0xff] }
  0x89   :  { %5192 = vmatmul.msk.bf16.gmra.mxu0 %vm283_vm2, %v5997_v16  ;;  %v628_v20 = vadd.f32 %v6323_v19, %v560_v18 }
  0x8b   :  { %v692_v23 = vmax.f32 %v628_v20, 0.0 }
  0x8d   :  { %v821_v26 = vrot.slane %v692_v23, 1 }
  0x8e   :  { %v398_v21 = vpop.f32.mrf.mxu0 }
  0x8f   :  { %v561_v22 = vmul.f32 %v6314_v15, %v398_v21 }
  0x91   :  { %v629_v24 = vadd.f32 %v6323_v19, %v561_v22 }
  0x93   :  { %v693_v25 = vmax.f32 %v629_v24, 0.0 }
  0x95   :  { %v822_v27 = vrot.slane %v693_v25, 1 }
  0x96   :  { %v401_v29 = vpop.f32.mrf.mxu0 }
  0x97   :  { %v562_v30 = vmul.f32 %v6314_v15, %v401_v29  ;;  %v823_v31 = vsel %vm820_vm3, %v821_v26, %v822_v27 }
  0x98   :  { %v1012_v32 = vmax.f32 %v692_v23, %v823_v31 }
  0x99   :  { %v630_v33 = vadd.f32 %v6323_v19, %v562_v30  ;;  %5193 = vmatmul.msk.bf16.gmra.mxu0 %vm283_vm2, %v5998_v28 }
  0x9b   :  { %v694_v34 = vmax.f32 %v630_v33, 0.0 }
  0x9d   :  { %v824_v35 = vrot.slane %v694_v34, 1 }
  0x9e   :  { %v403_v36 = vpop.f32.mrf.mxu0 }
  0x9f   :  { %v563_v37 = vmul.f32 %v6314_v15, %v403_v36  ;;  %v825_v38 = vsel %vm820_vm3, %v822_v27, %v824_v35  ;;  %v6002_v36 = vld [vmem:[%s8716_s0 + $0x68] sm:$0xff] }
  0xa0   :  { %v1013_v39 = vmax.f32 %v693_v25, %v825_v38 }
  0xa1   :  { %v631_v40 = vadd.f32 %v6323_v19, %v563_v37 }
  0xa3   :  { %v695_v41 = vmax.f32 %v631_v40, 0.0 }
  0xa5   :  { %v826_v42 = vrot.slane %v695_v41, 1 }
  0xa6   :  { %v406_v44 = vpop.f32.mrf.mxu0 }
  0xa7   :  { %v564_v45 = vmul.f32 %v6314_v15, %v406_v44  ;;  %v827_v46 = vsel %vm820_vm3, %v824_v35, %v826_v42 }
  0xa8   :  { %v1014_v47 = vmax.f32 %v694_v34, %v827_v46 }
  0xa9   :  { %v632_v48 = vadd.f32 %v6323_v19, %v564_v45  ;;  %5194 = vmatmul.msk.bf16.gmra.mxu0 %vm283_vm2, %v5999_v43 }
  0xaa   :  { %v1076_v49 = vmax.f32 %v1012_v32, %v1014_v47 }
  0xab   :  { %v696_v50 = vmax.f32 %v632_v48, 0.0 }
  0xad   :  { %v828_v51 = vrot.slane %v696_v50, 1 }
  0xae   :  { %v408_v52 = vpop.f32.mrf.mxu0 }
  0xaf   :  { %v565_v53 = vmul.f32 %v6314_v15, %v408_v52  ;;  %v829_v54 = vsel %vm820_vm3, %v826_v42, %v828_v51 }
  0xb0   :  { %v1015_v55 = vmax.f32 %v695_v41, %v829_v54  ;;  %v6003_v54 = vld [vmem:[%s8716_s0 + $0x70] sm:$0xff] }
  0xb1   :  { %v633_v56 = vadd.f32 %v6323_v19, %v565_v53 }
  0xb2   :  { %v1077_v57 = vmax.f32 %v1013_v39, %v1015_v55 }
  0xb3   :  { %v697_v58 = vmax.f32 %v633_v56, 0.0 }
  0xb4   :  { %v6349_v59 = vpack.c.bf16 %v1077_v57, %v1076_v49 }
  0xb5   :  { %v830_v60 = vrot.slane %v697_v58, 1 }
  0xb6   :  { %v411_v62 = vpop.f32.mrf.mxu0 }
  0xb7   :  { %v566_v63 = vmul.f32 %v6314_v15, %v411_v62  ;;  %v831_v0 = vsel %vm820_vm3, %v828_v51, %v830_v60 }
  0xb8   :  { %v1016_v1 = vmax.f32 %v696_v50, %v831_v0 }
  0xb9   :  { %v634_v2 = vadd.f32 %v6323_v19, %v566_v63  ;;  %5195 = vmatmul.msk.bf16.gmra.mxu0 %vm283_vm2, %v6000_v61 }
  0xba   :  { %v1078_v4 = vmax.f32 %v1014_v47, %v1016_v1 }
  0xbb   :  { %v698_v5 = vmax.f32 %v634_v2, 0.0 }
  0xbd   :  { %v832_v6 = vrot.slane %v698_v5, 1 }
  0xbe   :  { %v413_v7 = vpop.f32.mrf.mxu0 }
  0xbf   :  { %v567_v8 = vmul.f32 %v6314_v15, %v413_v7  ;;  %v833_v9 = vsel %vm820_vm3, %v830_v60, %v832_v6 }
  0xc0   :  { %v1017_v10 = vmax.f32 %v697_v58, %v833_v9  ;;  %v6004_v9 = vld [vmem:[%s8716_s0 + $0x78] sm:$0xff] }
  0xc1   :  { %v635_v11 = vadd.f32 %v6323_v19, %v567_v8 }
  0xc2   :  { %v1079_v12 = vmax.f32 %v1015_v55, %v1017_v10 }
  0xc3   :  { %v699_v13 = vmax.f32 %v635_v11, 0.0 }
  0xc4   :  { %v6361_v14 = vpack.c.bf16 %v1079_v12, %v1078_v4 }
  0xc5   :  { %v834_v16 = vrot.slane %v699_v13, 1 }
  0xc6   :  { %v416_v18 = vpop.f32.mrf.mxu0 }
  0xc7   :  { %v568_v20 = vmul.f32 %v6314_v15, %v416_v18  ;;  %v835_v21 = vsel %vm820_vm3, %v832_v6, %v834_v16 }
  0xc8   :  { %v1018_v22 = vmax.f32 %v698_v5, %v835_v21 }
  0xc9   :  { %v636_v23 = vadd.f32 %v6323_v19, %v568_v20  ;;  %5196 = vmatmul.msk.bf16.gmra.mxu0 %vm283_vm2, %v6001_v17 }
  0xca   :  { %v1080_v24 = vmax.f32 %v1016_v1, %v1018_v22 }
  0xcb   :  { %v700_v25 = vmax.f32 %v636_v23, 0.0 }
  0xcd   :  { %v836_v26 = vrot.slane %v700_v25, 1 }
  0xce   :  { %v418_v27 = vpop.f32.mrf.mxu0 }
  0xcf   :  { %v569_v28 = vmul.f32 %v6314_v15, %v418_v27  ;;  %v837_v29 = vsel %vm820_vm3, %v834_v16, %v836_v26  ;;  %v6005_v27 = vld [vmem:[%s8716_s0 + $0x80] sm:$0xff] }
  0xd0   :  { %v1019_v30 = vmax.f32 %v699_v13, %v837_v29 }
  0xd1   :  { %v637_v31 = vadd.f32 %v6323_v19, %v569_v28 }
  0xd2   :  { %v1081_v32 = vmax.f32 %v1017_v10, %v1019_v30 }
  0xd3   :  { %v701_v33 = vmax.f32 %v637_v31, 0.0 }
  0xd4   :  { %v6373_v34 = vpack.c.bf16 %v1081_v32, %v1080_v24 }
  0xd5   :  { %v838_v35 = vrot.slane %v701_v33, 1 }
  0xd6   :  { %v421_v37 = vpop.f32.mrf.mxu0 }
  0xd7   :  { %v570_v38 = vmul.f32 %v6314_v15, %v421_v37  ;;  %v839_v39 = vsel %vm820_vm3, %v836_v26, %v838_v35 }
  0xd8   :  { %v1020_v40 = vmax.f32 %v700_v25, %v839_v39 }
  0xd9   :  { %v638_v41 = vadd.f32 %v6323_v19, %v570_v38  ;;  %5197 = vmatmul.msk.bf16.gmra.mxu0 %vm283_vm2, %v6002_v36 }
  0xda   :  { %v1082_v42 = vmax.f32 %v1018_v22, %v1020_v40 }
  0xdb   :  { %v702_v43 = vmax.f32 %v638_v41, 0.0 }
  0xdd   :  { %v840_v44 = vrot.slane %v702_v43, 1 }
  0xde   :  { %v423_v45 = vpop.f32.mrf.mxu0 }
  0xdf   :  { %v571_v46 = vmul.f32 %v6314_v15, %v423_v45  ;;  %v841_v47 = vsel %vm820_vm3, %v838_v35, %v840_v44 }
  0xe0   :  { %v1021_v48 = vmax.f32 %v701_v33, %v841_v47 }
  0xe1   :  { %v639_v49 = vadd.f32 %v6323_v19, %v571_v46 }
  0xe2   :  { %v1083_v50 = vmax.f32 %v1019_v30, %v1021_v48 }
  0xe3   :  { %v703_v51 = vmax.f32 %v639_v49, 0.0 }
  0xe4   :  { %v6385_v52 = vpack.c.bf16 %v1083_v50, %v1082_v42 }
  0xe5   :  { %v842_v53 = vrot.slane %v703_v51, 1 }
  0xe6   :  { %v426_v55 = vpop.f32.mrf.mxu0 }
  0xe7   :  { %v572_v56 = vmul.f32 %v6314_v15, %v426_v55  ;;  %v843_v57 = vsel %vm820_vm3, %v840_v44, %v842_v53 }
  0xe8   :  { %v1022_v58 = vmax.f32 %v702_v43, %v843_v57 }
  0xe9   :  { %v640_v60 = vadd.f32 %v6323_v19, %v572_v56  ;;  %5198 = vmatmul.msk.bf16.gmra.mxu0 %vm283_vm2, %v6003_v54 }
  0xea   :  { %v1084_v61 = vmax.f32 %v1020_v40, %v1022_v58  ;;  %v6006_v40 = vld [vmem:[%s8716_s0 + $0x88] sm:$0xff] }
  0xeb   :  { %v704_v62 = vmax.f32 %v640_v60, 0.0 }
  0xed   :  { %v844_v63 = vrot.slane %v704_v62, 1 }
  0xee   :  { %v428_v0 = vpop.f32.mrf.mxu0 }
  0xef   :  { %v573_v1 = vmul.f32 %v6314_v15, %v428_v0  ;;  %v845_v2 = vsel %vm820_vm3, %v842_v53, %v844_v63 }
  0xf0   :  { %v1023_v4 = vmax.f32 %v703_v51, %v845_v2 }
  0xf1   :  { %v641_v5 = vadd.f32 %v6323_v19, %v573_v1 }
  0xf2   :  { %v1085_v6 = vmax.f32 %v1021_v48, %v1023_v4 }
  0xf3   :  { %v705_v7 = vmax.f32 %v641_v5, 0.0  ;;  %v6007_v5 = vld [vmem:[%s8716_s0 + $0x90] sm:$0xff] }
  0xf4   :  { %v6397_v8 = vpack.c.bf16 %v1085_v6, %v1084_v61 }
  0xf5   :  { %v846_v11 = vrot.slane %v705_v7, 1 }
  0xf6   :  { %v431_v10 = vpop.f32.mrf.mxu0 }
  0xf7   :  { %v574_v12 = vmul.f32 %v6314_v15, %v431_v10  ;;  %v847_v17 = vsel %vm820_vm3, %v844_v63, %v846_v11 }
  0xf8   :  { %v1024_v21 = vmax.f32 %v704_v62, %v847_v17 }
  0xf9   :  { %v642_v13 = vadd.f32 %v6323_v19, %v574_v12  ;;  %5199 = vmatmul.msk.bf16.gmra.mxu0 %vm283_vm2, %v6004_v9 }
  0xfa   :  { %v1086_v24 = vmax.f32 %v1022_v58, %v1024_v21 }
  0xfb   :  { %v706_v16 = vmax.f32 %v642_v13, 0.0 }
  0xfd   :  { %v848_v18 = vrot.slane %v706_v16, 1 }
  0xfe   :  { %v433_v20 = vpop.f32.mrf.mxu0 }
  0xff   :  { %v849_v22 = vsel %vm820_vm3, %v846_v11, %v848_v18  ;;  %v575_v29 = vmul.f32 %v6314_v15, %v433_v20 }
 0x100   :  { %v1025_v23 = vmax.f32 %v705_v7, %v849_v22 }
 0x101   :  { %v643_v33 = vadd.f32 %v6323_v19, %v575_v29 }
 0x102   :  { %v1087_v25 = vmax.f32 %v1023_v4, %v1025_v23 }
 0x103   :  { %v707_v38 = vmax.f32 %v643_v33, 0.0 }
 0x104   :  { %v1199_v26 = vpack.c.bf16 %v1087_v25, %v1086_v24 }
 0x105   :  { %v850_v44 = vrot.slane %v707_v38, 1 }
 0x106   :  { %v436_v28 = vpop.f32.mrf.mxu0 }
 0x107   :  { %v576_v30 = vmul.f32 %v6314_v15, %v436_v28  ;;  %v851_v50 = vsel %vm820_vm3, %v848_v18, %v850_v44 }
 0x108   :  { %v1026_v57 = vmax.f32 %v706_v16, %v851_v50 }
 0x109   :  { %5200 = vmatmul.msk.bf16.gmra.mxu0 %vm283_vm2, %v6005_v27  ;;  %v644_v35 = vadd.f32 %v6323_v19, %v576_v30  ;;  %v6008_v30 = vld [vmem:[%s8716_s0 + $0x98] sm:$0xff] }
 0x10a   :  { %v1088_v7 = vmax.f32 %v1024_v21, %v1026_v57 }
 0x10b   :  { %v708_v39 = vmax.f32 %v644_v35, 0.0 }
 0x10d   :  { %v852_v45 = vrot.slane %v708_v39, 1 }
 0x10e   :  { %v438_v31 = vpop.f32.mrf.mxu0 }
 0x10f   :  { %v577_v32 = vmul.f32 %v6314_v15, %v438_v31  ;;  %v853_v51 = vsel %vm820_vm3, %v850_v44, %v852_v45 }
 0x110   :  { %v1027_v58 = vmax.f32 %v707_v38, %v853_v51 }
 0x111   :  { %v645_v36 = vadd.f32 %v6323_v19, %v577_v32 }
 0x112   :  { %v1089_v2 = vmax.f32 %v1025_v23, %v1027_v58 }
 0x113   :  { %v709_v37 = vmax.f32 %v645_v36, 0.0 }
 0x114   :  { %v1200_v11 = vpack.c.bf16 %v1089_v2, %v1088_v7 }
 0x115   :  { %v854_v42 = vrot.slane %v709_v37, 1 }
 0x116   :  { %v441_v41 = vpop.f32.mrf.mxu0 }
 0x117   :  { %v578_v43 = vmul.f32 %v6314_v15, %v441_v41  ;;  %v855_v48 = vsel %vm820_vm3, %v852_v45, %v854_v42  ;;  %v6009_v45 = vld [vmem:[%s8716_s0 + $0xa0] sm:$0xff] }
 0x118   :  { %v1028_v54 = vmax.f32 %v708_v39, %v855_v48 }
 0x119   :  { %v646_v46 = vadd.f32 %v6323_v19, %v578_v43  ;;  %5201 = vmatmul.msk.bf16.gmra.mxu0 %vm283_vm2, %v6006_v40 }
 0x11a   :  { %v1090_v62 = vmax.f32 %v1026_v57, %v1028_v54 }
 0x11b   :  { %v710_v47 = vmax.f32 %v646_v46, 0.0 }
 0x11d   :  { %v856_v49 = vrot.slane %v710_v47, 1 }
 0x11e   :  { %v443_v53 = vpop.f32.mrf.mxu0 }
 0x11f   :  { %v579_v55 = vmul.f32 %v6314_v15, %v443_v53  ;;  %v857_v56 = vsel %vm820_vm3, %v854_v42, %v856_v49 }
 0x120   :  { %v1029_v60 = vmax.f32 %v709_v37, %v857_v56 }
 0x121   :  { %v647_v61 = vadd.f32 %v6323_v19, %v579_v55 }
 0x122   :  { %v1091_v63 = vmax.f32 %v1027_v58, %v1029_v60 }
 0x123   :  { %v711_v0 = vmax.f32 %v647_v61, 0.0 }
 0x124   :  { %v1201_v1 = vpack.c.bf16 %v1091_v63, %v1090_v62  ;;  %v6010_v63 = vld [vmem:[%s8716_s0 + $0xa8] sm:$0xff] }
 0x125   :  { %v858_v4 = vrot.slane %v711_v0, 1 }
 0x126   :  { %v446_v6 = vpop.f32.mrf.mxu0  ;;  %1540 = vmatpush.bf16.msra.mxu1 %v1201_v1 }
 0x127   :  { %v580_v9 = vmul.f32 %v6314_v15, %v446_v6  ;;  %v859_v10 = vsel %vm820_vm3, %v856_v49, %v858_v4 }
 0x128   :  { %v1030_v12 = vmax.f32 %v710_v47, %v859_v10 }
 0x129   :  { %v648_v13 = vadd.f32 %v6323_v19, %v580_v9  ;;  %5202 = vmatmul.msk.bf16.gmra.mxu0 %vm283_vm2, %v6007_v5 }
 0x12a   :  { %1541 = vmatpush.bf16.msra.mxu1 %v1200_v11  ;;  %v1092_v16 = vmax.f32 %v1028_v54, %v1030_v12 }
 0x12b   :  { %v712_v17 = vmax.f32 %v648_v13, 0.0 }
 0x12d   :  { %v860_v18 = vrot.slane %v712_v17, 1 }
 0x12e   :  { %v448_v20 = vpop.f32.mrf.mxu0  ;;  %1542 = vmatpush.bf16.msra.mxu1 %v1199_v26 }
 0x12f   :  { %v581_v22 = vmul.f32 %v6314_v15, %v448_v20  ;;  %v861_v21 = vsel %vm820_vm3, %v858_v4, %v860_v18 }
 0x130   :  { %v1031_v23 = vmax.f32 %v711_v0, %v861_v21  ;;  %v6011_v21 = vld [vmem:[%s8716_s0 + $0xb0] sm:$0xff] }
 0x131   :  { %v649_v24 = vadd.f32 %v6323_v19, %v581_v22 }
 0x132   :  { %1543 = vmatpush.bf16.msra.mxu1 %v6397_v8  ;;  %v1093_v25 = vmax.f32 %v1029_v60, %v1031_v23 }
 0x133   :  { %v713_v27 = vmax.f32 %v649_v24, 0.0 }
 0x134   :  { %v6440_v28 = vpack.c.bf16 %v1093_v25, %v1092_v16 }
 0x135   :  { %v862_v29 = vrot.slane %v713_v27, 1 }
 0x136   :  { %v451_v31 = vpop.f32.mrf.mxu0  ;;  %1544 = vmatpush.bf16.msra.mxu1 %v6385_v52 }
 0x137   :  { %v582_v26 = vmul.f32 %v6314_v15, %v451_v31  ;;  %v863_v32 = vsel %vm820_vm3, %v860_v18, %v862_v29 }
 0x138   :  { %v1032_v33 = vmax.f32 %v712_v17, %v863_v32 }
 0x139   :  { %v650_v35 = vadd.f32 %v6323_v19, %v582_v26  ;;  %5203 = vmatmul.msk.bf16.gmra.mxu0 %vm283_vm2, %v6008_v30 }
 0x13a   :  { %1545 = vmatpush.bf16.msra.mxu1 %v6373_v34  ;;  %v1094_v8 = vmax.f32 %v1030_v12, %v1032_v33 }
 0x13b   :  { %v714_v36 = vmax.f32 %v650_v35, 0.0 }
 0x13d   :  { %v864_v37 = vrot.slane %v714_v36, 1 }
 0x13e   :  { %v453_v38 = vpop.f32.mrf.mxu0  ;;  %1546 = vmatpush.bf16.msra.mxu1 %v6361_v14 }
 0x13f   :  { %v583_v39 = vmul.f32 %v6314_v15, %v453_v38  ;;  %v865_v52 = vsel %vm820_vm3, %v862_v29, %v864_v37 }
 0x140   :  { %v1033_v40 = vmax.f32 %v713_v27, %v865_v52  ;;  %v6012_v52 = vld [vmem:[%s8716_s0 + $0xb8] sm:$0xff] }
 0x141   :  { %v651_v41 = vadd.f32 %v6323_v19, %v583_v39 }
 0x142   :  { %1547 = vmatpush.bf16.msra.mxu1 %v6349_v59  ;;  %v1095_v42 = vmax.f32 %v1031_v23, %v1033_v40 }
 0x143   :  { %v715_v43 = vmax.f32 %v651_v41, 0.0 }
 0x144   :  { %v6456_v44 = vpack.c.bf16 %v1095_v42, %v1094_v8 }
 0x145   :  { %v866_v34 = vrot.slane %v715_v43, 1 }
 0x146   :  { %v456_v46 = vpop.f32.mrf.mxu0 }
 0x147   :  { %v584_v14 = vmul.f32 %v6314_v15, %v456_v46  ;;  %v867_v47 = vsel %vm820_vm3, %v864_v37, %v866_v34 }
 0x148   :  { %v1034_v48 = vmax.f32 %v714_v36, %v867_v47 }
 0x149   :  { %v652_v49 = vadd.f32 %v6323_v19, %v584_v14  ;;  %5204 = vmatmul.msk.bf16.gmra.mxu0 %vm283_vm2, %v6009_v45 }
 0x14a   :  { %v1096_v59 = vmax.f32 %v1032_v33, %v1034_v48 }
 0x14b   :  { %v716_v50 = vmax.f32 %v652_v49, 0.0 }
 0x14d   :  { %v868_v51 = vrot.slane %v716_v50, 1 }
 0x14e   :  { %v458_v53 = vpop.f32.mrf.mxu0 }
 0x14f   :  { %v585_v54 = vmul.f32 %v6314_v15, %v458_v53  ;;  %v869_v55 = vsel %vm820_vm3, %v866_v34, %v868_v51  ;;  %v6013_v53 = vld [vmem:[%s8716_s0 + $0xc0] sm:$0xff] }
 0x150   :  { %v1035_v56 = vmax.f32 %v715_v43, %v869_v55 }
 0x151   :  { %v653_v57 = vadd.f32 %v6323_v19, %v585_v54 }
 0x152   :  { %v1097_v58 = vmax.f32 %v1033_v40, %v1035_v56 }
 0x153   :  { %v717_v60 = vmax.f32 %v653_v57, 0.0 }
 0x154   :  { %v6468_v61 = vpack.c.bf16 %v1097_v58, %v1096_v59 }
 0x155   :  { %v870_v62 = vrot.slane %v717_v60, 1 }
 0x156   :  { %v461_v0 = vpop.f32.mrf.mxu0 }
 0x157   :  { %v586_v1 = vmul.f32 %v6314_v15, %v461_v0  ;;  %v871_v2 = vsel %vm820_vm3, %v868_v51, %v870_v62 }
 0x158   :  { %v1036_v4 = vmax.f32 %v716_v50, %v871_v2 }
 0x159   :  { %v654_v5 = vadd.f32 %v6323_v19, %v586_v1  ;;  %5205 = vmatmul.msk.bf16.gmra.mxu0 %vm283_vm2, %v6010_v63 }
 0x15a   :  { %v1098_v6 = vmax.f32 %v1034_v48, %v1036_v4 }
 0x15b   :  { %v718_v7 = vmax.f32 %v654_v5, 0.0 }
 0x15d   :  { %v872_v9 = vrot.slane %v718_v7, 1 }
 0x15e   :  { %v463_v10 = vpop.f32.mrf.mxu0 }
 0x15f   :  { %v587_v11 = vmul.f32 %v6314_v15, %v463_v10  ;;  %v873_v12 = vsel %vm820_vm3, %v870_v62, %v872_v9 }
 0x160   :  { %v1037_v13 = vmax.f32 %v717_v60, %v873_v12 }
 0x161   :  { %v655_v16 = vadd.f32 %v6323_v19, %v587_v11 }
 0x162   :  { %v1099_v17 = vmax.f32 %v1035_v56, %v1037_v13 }
 0x163   :  { %v719_v18 = vmax.f32 %v655_v16, 0.0 }
 0x164   :  { %v6480_v20 = vpack.c.bf16 %v1099_v17, %v1098_v6 }
 0x165   :  { %v874_v22 = vrot.slane %v719_v18, 1 }
 0x166   :  { %v466_v23 = vpop.f32.mrf.mxu0 }
 0x167   :  { %v588_v24 = vmul.f32 %v6314_v15, %v466_v23  ;;  %v875_v25 = vsel %vm820_vm3, %v872_v9, %v874_v22 }
 0x168   :  { %v1038_v27 = vmax.f32 %v718_v7, %v875_v25 }
 0x169   :  { %v656_v29 = vadd.f32 %v6323_v19, %v588_v24  ;;  %5206 = vmatmul.msk.bf16.gmra.mxu0 %vm283_vm2, %v6011_v21 }
 0x16a   :  { %v1100_v30 = vmax.f32 %v1036_v4, %v1038_v27  ;;  %v6014_v4 = vld [vmem:[%s8716_s0 + $0xc8] sm:$0xff] }
 0x16b   :  { %v720_v31 = vmax.f32 %v656_v29, 0.0 }
 0x16d   :  { %v876_v26 = vrot.slane %v720_v31, 1 }
 0x16e   :  { %v468_v32 = vpop.f32.mrf.mxu0 }
 0x16f   :  { %v589_v33 = vmul.f32 %v6314_v15, %v468_v32  ;;  %v877_v35 = vsel %vm820_vm3, %v874_v22, %v876_v26 }
 0x170   :  { %v1039_v8 = vmax.f32 %v719_v18, %v877_v35 }
 0x171   :  { %v657_v36 = vadd.f32 %v6323_v19, %v589_v33 }
 0x172   :  { %v1101_v37 = vmax.f32 %v1037_v13, %v1039_v8 }
 0x173   :  { %v721_v38 = vmax.f32 %v657_v36, 0.0 }
 0x174   :  { %v6492_v39 = vpack.c.bf16 %v1101_v37, %v1100_v30  ;;  %v5218_v30 = vld [vmem:[%s8726_s10] sm:$0xf] }
 0x175   :  { %v878_v41 = vrot.slane %v721_v38, 1 }
 0x176   :  { %v471_v40 = vpop.f32.mrf.mxu0 }
 0x177   :  { %v590_v42 = vmul.f32 %v6314_v15, %v471_v40  ;;  %v879_v45 = vsel %vm820_vm3, %v876_v26, %v878_v41 }
 0x178   :  { %v1040_v47 = vmax.f32 %v720_v31, %v879_v45  ;;  %v6024_v31 = vld [vmem:[%s8726_s10 + $0xc] sm:$0xf0] }
 0x179   :  { %v658_v43 = vadd.f32 %v6323_v19, %v590_v42  ;;  %5207 = vmatmul.msk.bf16.gmra.mxu0 %vm283_vm2, %v6012_v52  ;;  %v5219_v32 = vor.u32 %v6024_v31, %v5218_v30  ;;  %v6015_v52 = vld [vmem:[%s8716_s0 + $0xd0] sm:$0xff] }
 0x17a   :  { %v1102_v59 = vmax.f32 %v1038_v27, %v1040_v47 }
 0x17b   :  { %v722_v34 = vmax.f32 %v658_v43, 0.0  ;;  %1548 = vmatmul.bf16.vlgmr.msra.gmra.mxu1 %v5219_v32 }
 0x17d   :  { %v880_v46 = vrot.slane %v722_v34, 1 }
 0x17e   :  { %v473_v14 = vpop.f32.mrf.mxu0 }
 0x17f   :  { %v881_v48 = vsel %vm820_vm3, %v878_v41, %v880_v46  ;;  %v591_v55 = vmul.f32 %v6314_v15, %v473_v14 }
 0x180   :  { %v1041_v49 = vmax.f32 %v721_v38, %v881_v48 }
 0x181   :  { %v659_v60 = vadd.f32 %v6323_v19, %v591_v55 }
 0x182   :  { %v1103_v50 = vmax.f32 %v1039_v8, %v1041_v49 }
 0x183   :  { %v723_v1 = vmax.f32 %v659_v60, 0.0 }
 0x184   :  { %v1207_v51 = vpack.c.bf16 %v1103_v50, %v1102_v59 }
 0x185   :  { %v882_v9 = vrot.slane %v723_v1, 1 }
 0x186   :  { %v476_v54 = vpop.f32.mrf.mxu0 }
 0x187   :  { %v592_v56 = vmul.f32 %v6314_v15, %v476_v54  ;;  %v883_v17 = vsel %vm820_vm3, %v880_v46, %v882_v9  ;;  %v6028_v54 = vld [vmem:[%s8726_s10 + $0x2c] sm:$0xf0] }
 0x188   :  { %v1042_v25 = vmax.f32 %v722_v34, %v883_v17 }
 0x189   :  { %5208 = vmatmul.msk.bf16.gmra.mxu0 %vm283_vm2, %v6013_v53  ;;  %v660_v62 = vadd.f32 %v6323_v19, %v592_v56  ;;  %v5234_v53 = vld [vmem:[%s8726_s10 + $0x20] sm:$0xf] }
 0x18a   :  { %v1104_v41 = vmax.f32 %v1040_v47, %v1042_v25 }
 0x18b   :  { %v724_v2 = vmax.f32 %v660_v62, 0.0 }
 0x18d   :  { %v884_v10 = vrot.slane %v724_v2, 1 }
 0x18e   :  { %v478_v57 = vpop.f32.mrf.mxu0 }
 0x18f   :  { %v593_v58 = vmul.f32 %v6314_v15, %v478_v57  ;;  %v885_v18 = vsel %vm820_vm3, %v882_v9, %v884_v10  ;;  %v5235_v57 = vor.u32 %v6028_v54, %v5234_v53 }
 0x190   :  { %v1043_v27 = vmax.f32 %v723_v1, %v885_v18 }
 0x191   :  { %v661_v63 = vadd.f32 %v6323_v19, %v593_v58  ;;  %1553 = vmatmul.bf16.gmra.mxu1 %v5235_v57 }
 0x192   :  { %v1105_v37 = vmax.f32 %v1041_v49, %v1043_v27 }
 0x193   :  { %v725_v0 = vmax.f32 %v661_v63, 0.0  ;;  %v6016_v63 = vld [vmem:[%s8716_s0 + $0xd8] sm:$0xff] }
 0x194   :  { %v1208_v34 = vpack.c.bf16 %v1105_v37, %v1104_v41 }
 0x195   :  { %v886_v6 = vrot.slane %v725_v0, 1 }
 0x196   :  { %v481_v5 = vpop.f32.mrf.mxu0 }
 0x197   :  { %v594_v7 = vmul.f32 %v6314_v15, %v481_v5  ;;  %v887_v13 = vsel %vm820_vm3, %v884_v10, %v886_v6  ;;  %v5220_v10 = vld [vmem:[%s8726_s10 + $0x10] sm:$0xf0] }
 0x198   :  { %v1044_v21 = vmax.f32 %v724_v2, %v887_v13 }
 0x199   :  { %v662_v11 = vadd.f32 %v6323_v19, %v594_v7  ;;  %5209 = vmatmul.msk.bf16.gmra.mxu0 %vm283_vm2, %v6014_v4 }
 0x19a   :  { %v1106_v33 = vmax.f32 %v1042_v25, %v1044_v21  ;;  %v6017_v25 = vld [vmem:[%s8716_s0 + $0xe0] sm:$0xff] }
 0x19b   :  { %v726_v12 = vmax.f32 %v662_v11, 0.0 }
 0x19d   :  { %v888_v16 = vrot.slane %v726_v12, 1 }
 0x19e   :  { %v483_v22 = vpop.f32.mrf.mxu0 }
 0x19f   :  { %v595_v23 = vmul.f32 %v6314_v15, %v483_v22  ;;  %v889_v24 = vsel %vm820_vm3, %v886_v6, %v888_v16 }
 0x1a0   :  { %v1045_v29 = vmax.f32 %v725_v0, %v889_v24 }
 0x1a1   :  { %v663_v26 = vadd.f32 %v6323_v19, %v595_v23 }
 0x1a2   :  { %v1107_v35 = vmax.f32 %v1043_v27, %v1045_v29 }
 0x1a3   :  { %v727_v8 = vmax.f32 %v663_v26, 0.0 }
 0x1a4   :  { %v1209_v36 = vpack.c.bf16 %v1107_v35, %v1106_v33 }
 0x1a5   :  { %v890_v38 = vrot.slane %v727_v8, 1 }
 0x1a6   :  { %v486_v40 = vpop.f32.mrf.mxu0  ;;  %1618 = vmatpush.bf16.msra.mxu2 %v1209_v36  ;;  %v5236_v36 = vld [vmem:[%s8726_s10 + $0x30] sm:$0xf0] }
 0x1a7   :  { %v596_v42 = vmul.f32 %v6314_v15, %v486_v40  ;;  %v891_v43 = vsel %vm820_vm3, %v888_v16, %v890_v38  ;;  %v6036_v40 = vld [vmem:[%s8726_s10 + $0x6c] sm:$0xf0] }
 0x1a8   :  { %v1046_v45 = vmax.f32 %v726_v12, %v891_v43 }
 0x1a9   :  { %v664_v46 = vadd.f32 %v6323_v19, %v596_v42  ;;  %5210 = vmatmul.msk.bf16.gmra.mxu0 %vm283_vm2, %v6015_v52  ;;  %v5266_v52 = vld [vmem:[%s8726_s10 + $0x60] sm:$0xf] }
 0x1aa   :  { %1619 = vmatpush.bf16.msra.mxu2 %v1208_v34  ;;  %v1108_v14 = vmax.f32 %v1044_v21, %v1046_v45  ;;  %v5267_v34 = vor.u32 %v6036_v40, %v5266_v52  ;;  %v5314_v52 = vld [vmem:[%s8726_s10 + $0xc0] sm:$0xf]  ;;  %v6048_v40 = vld [vmem:[%s8726_s10 + $0xcc] sm:$0xf0] }
 0x1ab   :  { %v728_v48 = vmax.f32 %v664_v46, 0.0 }
 0x1ad   :  { %v892_v49 = vrot.slane %v728_v48, 1 }
 0x1ae   :  { %v488_v59 = vpop.f32.mrf.mxu0  ;;  %1620 = vmatpush.bf16.msra.mxu2 %v1207_v51 }
 0x1af   :  { %v597_v50 = vmul.f32 %v6314_v15, %v488_v59  ;;  %v893_v47 = vsel %vm820_vm3, %v890_v38, %v892_v49 }
 0x1b0   :  { %v1047_v55 = vmax.f32 %v727_v8, %v893_v47  ;;  %v6026_v8 = vld [vmem:[%s8726_s10 + $0x24] sm:$0xf] }
 0x1b1   :  { %v665_v56 = vadd.f32 %v6323_v19, %v597_v50  ;;  %v5239_v43 = vor.u32 %v6026_v8, %v5236_v36 }
 0x1b2   :  { %1621 = vmatpush.bf16.msra.mxu2 %v6492_v39  ;;  %v1109_v58 = vmax.f32 %v1045_v29, %v1047_v55 }
 0x1b3   :  { %v729_v51 = vmax.f32 %v665_v56, 0.0 }
 0x1b4   :  { %v6547_v60 = vpack.c.bf16 %v1109_v58, %v1108_v14 }
 0x1b5   :  { %v894_v62 = vrot.slane %v729_v51, 1 }
 0x1b6   :  { %v491_v0 = vpop.f32.mrf.mxu0  ;;  %1622 = vmatpush.bf16.msra.mxu2 %v6480_v20  ;;  %v6022_v20 = vld [vmem:[%s8726_s10 + $0x4] sm:$0xf] }
 0x1b7   :  { %v598_v1 = vmul.f32 %v6314_v15, %v491_v0  ;;  %v895_v2 = vsel %vm820_vm3, %v892_v49, %v894_v62  ;;  %v5223_v17 = vor.u32 %v6022_v20, %v5220_v10  ;;  %v6018_v49 = vld [vmem:[%s8716_s0 + $0xe8] sm:$0xff] }
 0x1b8   :  { %v1048_v4 = vmax.f32 %v728_v48, %v895_v2  ;;  %v6040_v2 = vld [vmem:[%s8726_s10 + $0x8c] sm:$0xf0] }
 0x1b9   :  { %v666_v39 = vadd.f32 %v6323_v19, %v598_v1  ;;  %5211 = vmatmul.msk.bf16.gmra.mxu0 %vm283_vm2, %v6016_v63  ;;  %v5282_v1 = vld [vmem:[%s8726_s10 + $0x80] sm:$0xf] }
 0x1ba   :  { %1623 = vmatpush.bf16.msra.mxu2 %v6468_v61  ;;  %v1110_v5 = vmax.f32 %v1046_v45, %v1048_v4  ;;  %v5250_v61 = vld [vmem:[%s8726_s10 + $0x40] sm:$0xf] }
 0x1bb   :  { %v730_v6 = vmax.f32 %v666_v39, 0.0 }
 0x1bd   :  { %v896_v7 = vrot.slane %v730_v6, 1 }
 0x1be   :  { %v493_v9 = vpop.f32.mrf.mxu0  ;;  %1624 = vmatpush.bf16.msra.mxu2 %v6456_v44  ;;  %v6032_v44 = vld [vmem:[%s8726_s10 + $0x4c] sm:$0xf0] }
 0x1bf   :  { %v599_v11 = vmul.f32 %v6314_v15, %v493_v9  ;;  %v897_v12 = vsel %vm820_vm3, %v894_v62, %v896_v7  ;;  %v5251_v18 = vor.u32 %v6032_v44, %v5250_v61  ;;  %v5252_v62 = vld [vmem:[%s8726_s10 + $0x50] sm:$0xf0] }
 0x1c0   :  { %v1049_v13 = vmax.f32 %v729_v51, %v897_v12  ;;  %v6030_v51 = vld [vmem:[%s8726_s10 + $0x44] sm:$0xf] }
 0x1c1   :  { %v667_v16 = vadd.f32 %v6323_v19, %v599_v11  ;;  %1558 = vmatmul.bf16.gmra.mxu1 %v5251_v18  ;;  %v6019_v11 = vld [vmem:[%s8716_s0 + $0xf0] sm:$0xff] }
 0x1c2   :  { %1625 = vmatpush.bf16.msra.mxu2 %v6440_v28  ;;  %v1111_v22 = vmax.f32 %v1047_v55, %v1049_v13 }
 0x1c3   :  { %v731_v21 = vmax.f32 %v667_v16, 0.0 }
 0x1c4   :  { %v6575_v23 = vpack.c.bf16 %v1111_v22, %v1110_v5  ;;  %v5255_v5 = vor.u32 %v6030_v51, %v5252_v62 }
 0x1c5   :  { %v898_v24 = vrot.slane %v731_v21, 1  ;;  %1626 = vmatmul.bf16.vlgmr.msra.gmra.mxu2 %v5223_v17 }
 0x1c6   :  { %v496_v27 = vpop.f32.mrf.mxu0 }
 0x1c7   :  { %v600_v29 = vmul.f32 %v6314_v15, %v496_v27  ;;  %v899_v30 = vsel %vm820_vm3, %v896_v7, %v898_v24 }
 0x1c8   :  { %v1050_v31 = vmax.f32 %v730_v6, %v899_v30  ;;  %v5283_v6 = vor.u32 %v6040_v2, %v5282_v1  ;;  %v6044_v30 = vld [vmem:[%s8726_s10 + $0xac] sm:$0xf0] }
 0x1c9   :  { %v668_v26 = vadd.f32 %v6323_v19, %v600_v29  ;;  %5212 = vmatmul.msk.bf16.gmra.mxu0 %vm283_vm2, %v6017_v25  ;;  %v5268_v25 = vld [vmem:[%s8726_s10 + $0x70] sm:$0xf0]  ;;  %v5298_v29 = vld [vmem:[%s8726_s10 + $0xa0] sm:$0xf] }
 0x1ca   :  { %v1112_v28 = vmax.f32 %v1048_v4, %v1050_v31 }
 0x1cb   :  { %v732_v32 = vmax.f32 %v668_v26, 0.0 }
 0x1cd   :  { %v900_v33 = vrot.slane %v732_v32, 1 }
 0x1ce   :  { %v498_v35 = vpop.f32.mrf.mxu0 }
 0x1cf   :  { %v601_v37 = vmul.f32 %v6314_v15, %v498_v35  ;;  %v901_v38 = vsel %vm820_vm3, %v898_v24, %v900_v33  ;;  %v6034_v24 = vld [vmem:[%s8726_s10 + $0x64] sm:$0xf]  ;;  %v6020_v35 = vld [vmem:[%s8716_s0 + $0xf8] sm:$0xff] }
 0x1d0   :  { %v1051_v41 = vmax.f32 %v731_v21, %v901_v38  ;;  %v5271_v26 = vor.u32 %v6034_v24, %v5268_v25  ;;  %v5284_v38 = vld [vmem:[%s8726_s10 + $0x90] sm:$0xf0] }
 0x1d1   :  { %v669_v42 = vadd.f32 %v6323_v19, %v601_v37  ;;  %1563 = vmatmul.bf16.gmra.mxu1 %v5267_v34  ;;  %v6038_v37 = vld [vmem:[%s8726_s10 + $0x84] sm:$0xf] }
 0x1d2   :  { %v1113_v45 = vmax.f32 %v1049_v13, %v1051_v41 }
 0x1d3   :  { %v733_v46 = vmax.f32 %v669_v42, 0.0  ;;  %v5315_v42 = vor.u32 %v6048_v40, %v5314_v52  ;;  %v5346_v52 = vld [vmem:[%s8726_s10 + $0x100] sm:$0xf]  ;;  %v6056_v40 = vld [vmem:[%s8726_s10 + $0x10c] sm:$0xf0] }
 0x1d4   :  { %v6599_v14 = vpack.c.bf16 %v1113_v45, %v1112_v28  ;;  %v5299_v28 = vor.u32 %v6044_v30, %v5298_v29  ;;  %v6046_v30 = vld [vmem:[%s8726_s10 + $0xc4] sm:$0xf] }
 0x1d5   :  { %v902_v48 = vrot.slane %v733_v46, 1  ;;  %1631 = vmatmul.bf16.gmra.mxu2 %v5239_v43 }
 0x1d6   :  { %v501_v59 = vpop.f32.mrf.mxu0 }
 0x1d7   :  { %v602_v50 = vmul.f32 %v6314_v15, %v501_v59  ;;  %v903_v47 = vsel %vm820_vm3, %v900_v33, %v902_v48 }
 0x1d8   :  { %v1052_v53 = vmax.f32 %v732_v32, %v903_v47 }
 0x1d9   :  { %v670_v54 = vadd.f32 %v6323_v19, %v602_v50  ;;  %5213 = vmatmul.msk.bf16.gmra.mxu0 %vm283_vm2, %v6018_v49 }
 0x1da   :  { %v1114_v55 = vmax.f32 %v1050_v31, %v1052_v53 }
 0x1db   :  { %v734_v56 = vmax.f32 %v670_v54, 0.0  ;;  %v5330_v54 = vld [vmem:[%s8726_s10 + $0xe0] sm:$0xf] }
 0x1dd   :  { %v904_v57 = vrot.slane %v734_v56, 1 }
 0x1de   :  { %v503_v58 = vpop.f32.mrf.mxu0 }
 0x1df   :  { %v603_v63 = vmul.f32 %v6314_v15, %v503_v58  ;;  %v905_v0 = vsel %vm820_vm3, %v902_v48, %v904_v57  ;;  %v5300_v48 = vld [vmem:[%s8726_s10 + $0xb0] sm:$0xf0] }
 0x1e0   :  { %v1053_v4 = vmax.f32 %v733_v46, %v905_v0  ;;  %v6042_v46 = vld [vmem:[%s8726_s10 + $0xa4] sm:$0xf] }
 0x1e1   :  { %v671_v39 = vadd.f32 %v6323_v19, %v603_v63  ;;  %1568 = vmatmul.bf16.gmra.mxu1 %v5283_v6 }
 0x1e2   :  { %v1115_v7 = vmax.f32 %v1051_v41, %v1053_v4  ;;  %v5287_v41 = vor.u32 %v6038_v37, %v5284_v38 }
 0x1e3   :  { %v735_v9 = vmax.f32 %v671_v39, 0.0 }
 0x1e4   :  { %v6623_v20 = vpack.c.bf16 %v1115_v7, %v1114_v55  ;;  %v6052_v55 = vld [vmem:[%s8726_s10 + $0xec] sm:$0xf0] }
 0x1e5   :  { %v906_v10 = vrot.slane %v735_v9, 1  ;;  %1636 = vmatmul.bf16.gmra.mxu2 %v5255_v5  ;;  %v5331_v51 = vor.u32 %v6052_v55, %v5330_v54  ;;  %v6702_v5 = vld [vmem:[%s8718_s2] ss:$0 sm:$0xff] }
 0x1e6   :  { %v506_v12 = vpop.f32.mrf.mxu0 }
 0x1e7   :  { %v604_v61 = vmul.f32 %v6314_v15, %v506_v12  ;;  %v907_v44 = vsel %vm820_vm3, %v904_v57, %v906_v10 }
 0x1e8   :  { %v6630_v13 = vmax.f32 %v734_v56, %v907_v44 }
 0x1e9   :  { %v6633_v16 = vadd.f32 %v6323_v19, %v604_v61  ;;  %5214 = vmatmul.msk.bf16.gmra.mxu0 %vm283_vm2, %v6019_v11 }
 0x1ea   :  { %v1116_v17 = vmax.f32 %v1052_v53, %v6630_v13  ;;  %v5303_v53 = vor.u32 %v6042_v46, %v5300_v48 }
 0x1eb   :  { %v736_v18 = vmax.f32 %v6633_v16, 0.0 }
 0x1ed   :  { %v6640_v22 = vrot.slane %v736_v18, 1 }
 0x1ee   :  { %v508_v21 = vpop.f32.mrf.mxu0 }
 0x1ef   :  { %v909_v27 = vsel %vm820_vm3, %v906_v10, %v6640_v22  ;;  %v605_v47 = vmul.f32 %v6314_v15, %v508_v21 }
 0x1f0   :  { %v6656_v31 = vmax.f32 %v735_v9, %v909_v27 }
 0x1f1   :  { %1573 = vmatmul.bf16.gmra.mxu1 %v5299_v28 }
 0x1f2   :  { %v1117_v32 = vmax.f32 %v1053_v4, %v6656_v31 }
 0x1f4   :  { %v6659_v33 = vpack.c.bf16 %v1117_v32, %v1116_v17 }
 0x1f5   :  { %1641 = vmatmul.bf16.gmra.mxu2 %v5271_v26  ;;  %v5316_v26 = vld [vmem:[%s8726_s10 + $0xd0] sm:$0xf0] }
 0x1f6   :  { %v511_v8 = vpop.f32.mrf.mxu0 }
 0x1f7   :  { %v606_v59 = vmul.f32 %v6314_v15, %v511_v8 }
 0x1f8   :  { %v6723_v38 = vpop.f32.mrf.mxu1 }
 0x1f9   :  { %5215 = vmatmul.msk.bf16.gmra.mxu0 %vm283_vm2, %v6020_v35  ;;  %v674_v62 = vadd.f32 %v6323_v19, %v606_v59 }
 0x1fb   :  { %v738_v4 = vmax.f32 %v674_v62, 0.0 }
 0x1fd   :  { %v912_v12 = vrot.slane %v738_v4, 1 }
 0x1fe   :  { %v513_v36 = vpop.f32.mrf.mxu0 }
 0x1ff   :  { %v607_v34 = vmul.f32 %v6314_v15, %v513_v36 }
 0x201   :  { %1578 = vmatmul.bf16.gmra.mxu1 %v5315_v42  ;;  %v675_v56 = vadd.f32 %v6323_v19, %v607_v34  ;;  %v5347_v34 = vor.u32 %v6056_v40, %v5346_v52 }
 0x203   :  { %v739_v0 = vmax.f32 %v675_v56, 0.0 }
 0x205   :  { %1646 = vmatmul.bf16.gmra.mxu2 %v5287_v41  ;;  %v914_v9 = vrot.slane %v739_v0, 1 }
 0x206   :  { %v516_v43 = vpop.f32.mrf.mxu0 }
 0x207   :  { %v608_v45 = vmul.f32 %v6314_v15, %v516_v43  ;;  %v915_v24 = vsel %vm820_vm3, %v912_v12, %v914_v9  ;;  %v5319_v43 = vor.u32 %v6046_v30, %v5316_v26 }
 0x208   :  { %v1058_v8 = vmax.f32 %v738_v4, %v915_v24  ;;  %v6050_v4 = vld [vmem:[%s8726_s10 + $0xe4] sm:$0xf] }
 0x209   :  { %v676_v57 = vadd.f32 %v6323_v19, %v608_v45 }
 0x20b   :  { %v740_v1 = vmax.f32 %v676_v57, 0.0 }
 0x20d   :  { %v916_v10 = vrot.slane %v740_v1, 1 }
 0x20e   :  { %v518_v49 = vpop.f32.mrf.mxu0 }
 0x20f   :  { %v609_v50 = vmul.f32 %v6314_v15, %v518_v49  ;;  %v673_v15 = vadd.f32 %v6323_v19, %v605_v47  ;;  %v917_v25 = vsel %vm820_vm3, %v914_v9, %v916_v10  ;;  %v6060_v9 = vld [vmem:[%s8726_s10 + $0x12c] sm:$0xf0] }
 0x210   :  { %v1059_v36 = vmax.f32 %v739_v0, %v917_v25 }
 0x211   :  { %v677_v58 = vadd.f32 %v6323_v19, %v609_v50  ;;  %1583 = vmatmul.bf16.gmra.mxu1 %v5331_v51  ;;  %v737_v7 = vmax.f32 %v673_v15, 0.0  ;;  %v6708_v19 = vld [vmem:[%s8719_s3] ss:$0 sm:$0xff]  ;;  %v6739_v51 = vpop.f32.mrf.mxu1 }
 0x213   :  { %v741_v63 = vmax.f32 %v677_v58, 0.0  ;;  %v910_v17 = vrot.slane %v737_v7, 1 }
 0x215   :  { %1651 = vmatmul.bf16.gmra.mxu2 %v5303_v53  ;;  %v918_v39 = vrot.slane %v741_v63, 1  ;;  %v913_v35 = vsel %vm820_vm3, %v910_v17, %v912_v12  ;;  %v911_v42 = vsel %vm820_vm3, %v6640_v22, %v910_v17 }
 0x216   :  { %v521_v2 = vpop.f32.mrf.mxu0  ;;  %v1057_v48 = vmax.f32 %v737_v7, %v913_v35  ;;  %v1056_v50 = vmax.f32 %v736_v18, %v911_v42  ;;  %v6064_v42 = vld [vmem:[%s8726_s10 + $0x14c] sm:$0xf0] }
 0x217   :  { %v610_v6 = vmul.f32 %v6702_v5, %v521_v2  ;;  %v919_v44 = vsel %vm820_vm3, %v916_v10, %v918_v39 }
 0x218   :  { %v1060_v29 = vmax.f32 %v740_v1, %v919_v44  ;;  %v1121_v47 = vmax.f32 %v1057_v48, %v1059_v36  ;;  %v1120_v55 = vmax.f32 %v1056_v50, %v1058_v8  ;;  %v1119_v58 = vmax.f32 %v6656_v31, %v1057_v48  ;;  %v5332_v31 = vld [vmem:[%s8726_s10 + $0xf0] sm:$0xf0] }
 0x219   :  { %v678_v11 = vadd.f32 %v6708_v19, %v610_v6  ;;  %v1118_v16 = vmax.f32 %v6630_v13, %v1056_v50  ;;  %v6751_v7 = vpop.f32.mrf.mxu1  ;;  %v5362_v13 = vld [vmem:[%s8726_s10 + $0x120] sm:$0xf]  ;;  %v5335_v12 = vor.u32 %v6050_v4, %v5332_v31 }
 0x21a   :  { %v1122_v45 = vmax.f32 %v1058_v8, %v1060_v29  ;;  %v1216_v57 = vpack.c.bf16 %v1121_v47, %v1120_v55  ;;  %v5226_v8 = vld [vmem:[%s8726_s10 + $0x8] sm:$0xf] }
 0x21b   :  { %v742_v61 = vmax.f32 %v678_v11, 0.0  ;;  %v1215_v0 = vpack.c.bf16 %v1119_v58, %v1118_v16 }
 0x21d   :  { %v920_v21 = vrot.slane %v742_v61, 1 }
 0x21e   :  { %v523_v27 = vpop.f32.mrf.mxu0 }
 0x21f   :  { %v611_v28 = vmul.f32 %v6702_v5, %v523_v27  ;;  %v921_v32 = vsel %vm820_vm3, %v918_v39, %v920_v21 }
 0x220   :  { %v1061_v37 = vmax.f32 %v741_v63, %v921_v32 }
 0x221   :  { %v679_v41 = vadd.f32 %v6708_v19, %v611_v28  ;;  %1588 = vmatmul.bf16.gmra.mxu1 %v5347_v34  ;;  %v6766_v30 = vpop.f32.mrf.mxu1 }
 0x222   :  { %v1123_v46 = vmax.f32 %v1059_v36, %v1061_v37 }
 0x223   :  { %v743_v49 = vmax.f32 %v679_v41, 0.0 }
 0x224   :  { %v1217_v59 = vpack.c.bf16 %v1123_v46, %v1122_v45 }
 0x225   :  { %v922_v53 = vrot.slane %v743_v49, 1  ;;  %1656 = vmatmul.bf16.gmra.mxu2 %v5319_v43 }
 0x226   :  { %v526_v54 = vpop.f32.mrf.mxu0  ;;  %1696 = vmatpush.bf16.msra.mxu3 %v1217_v59 }
 0x227   :  { %v612_v56 = vmul.f32 %v6702_v5, %v526_v54  ;;  %v923_v22 = vsel %vm820_vm3, %v920_v21, %v922_v53 }
 0x228   :  { %v1062_v62 = vmax.f32 %v742_v61, %v923_v22  ;;  %v5363_v61 = vor.u32 %v6060_v9, %v5362_v13  ;;  %v5394_v13 = vld [vmem:[%s8726_s10 + $0x160] sm:$0xf]  ;;  %v6068_v9 = vld [vmem:[%s8726_s10 + $0x16c] sm:$0xf0] }
 0x229   :  { %v680_v63 = vadd.f32 %v6708_v19, %v612_v56 }
 0x22a   :  { %1697 = vmatpush.bf16.msra.mxu3 %v1216_v57  ;;  %v1124_v18 = vmax.f32 %v1060_v29, %v1062_v62 }
 0x22b   :  { %v744_v15 = vmax.f32 %v680_v63, 0.0 }
 0x22d   :  { %v924_v1 = vrot.slane %v744_v15, 1 }
 0x22e   :  { %v528_v2 = vpop.f32.mrf.mxu0  ;;  %1698 = vmatpush.bf16.msra.mxu3 %v1215_v0 }
 0x22f   :  { %v613_v39 = vmul.f32 %v6702_v5, %v528_v2  ;;  %v925_v6 = vsel %vm820_vm3, %v922_v53, %v924_v1 }
 0x230   :  { %v1063_v10 = vmax.f32 %v743_v49, %v925_v6 }
 0x231   :  { %v681_v11 = vadd.f32 %v6708_v19, %v613_v39  ;;  %1593 = vmatmul.bf16.gmra.mxu1 %v5363_v61 }
 0x232   :  { %1699 = vmatpush.bf16.msra.mxu3 %v6659_v33  ;;  %v1125_v44 = vmax.f32 %v1061_v37, %v1063_v10  ;;  %v6054_v37 = vld [vmem:[%s8726_s10 + $0x104] sm:$0xf] }
 0x233   :  { %v745_v17 = vmax.f32 %v681_v11, 0.0 }
 0x234   :  { %v6761_v21 = vpack.c.bf16 %v1125_v44, %v1124_v18  ;;  %v5242_v18 = vld [vmem:[%s8726_s10 + $0x28] sm:$0xf]  ;;  %v5395_v44 = vor.u32 %v6068_v9, %v5394_v13 }
 0x235   :  { %v926_v24 = vrot.slane %v745_v17, 1  ;;  %1661 = vmatmul.bf16.gmra.mxu2 %v5335_v12 }
 0x236   :  { %v531_v25 = vpop.f32.mrf.mxu0  ;;  %1700 = vmatpush.bf16.msra.mxu3 %v6623_v20  ;;  %v6025_v20 = vld [vmem:[%s8726_s10 + $0x14] sm:$0xf0] }
 0x237   :  { %v614_v27 = vmul.f32 %v6702_v5, %v531_v25  ;;  %v927_v29 = vsel %vm820_vm3, %v924_v1, %v926_v24  ;;  %v5227_v45 = vor.u32 %v6025_v20, %v5226_v8  ;;  %v6058_v1 = vld [vmem:[%s8726_s10 + $0x124] sm:$0xf] }
 0x238   :  { %v1064_v26 = vmax.f32 %v744_v15, %v927_v29  ;;  %v6029_v15 = vld [vmem:[%s8726_s10 + $0x34] sm:$0xf0] }
 0x239   :  { %v682_v28 = vadd.f32 %v6708_v19, %v614_v27  ;;  %v5243_v31 = vor.u32 %v6029_v15, %v5242_v18  ;;  %v6066_v18 = vld [vmem:[%s8726_s10 + $0x164] sm:$0xf]  ;;  %v5396_v15 = vld [vmem:[%s8726_s10 + $0x170] sm:$0xf0] }
 0x23a   :  { %1701 = vmatpush.bf16.msra.mxu3 %v6599_v14  ;;  %v1126_v33 = vmax.f32 %v1062_v62, %v1064_v26  ;;  %v5348_v14 = vld [vmem:[%s8726_s10 + $0x110] sm:$0xf0] }
 0x23b   :  { %v746_v32 = vmax.f32 %v682_v28, 0.0  ;;  %v5351_v46 = vor.u32 %v6054_v37, %v5348_v14  ;;  %v5258_v14 = vld [vmem:[%s8726_s10 + $0x48] sm:$0xf] }
 0x23d   :  { %v928_v35 = vrot.slane %v746_v32, 1 }
 0x23e   :  { %v533_v36 = vpop.f32.mrf.mxu0  ;;  %1702 = vmatpush.bf16.msra.mxu3 %v6575_v23  ;;  %v6785_v41 = vpop.f32.mrf.mxu1  ;;  %v5378_v23 = vld [vmem:[%s8726_s10 + $0x140] sm:$0xf] }
 0x23f   :  { %v615_v52 = vmul.f32 %v6702_v5, %v533_v36  ;;  %v929_v40 = vsel %vm820_vm3, %v926_v24, %v928_v35  ;;  %v5379_v48 = vor.u32 %v6064_v42, %v5378_v23  ;;  %v5380_v23 = vld [vmem:[%s8726_s10 + $0x150] sm:$0xf0] }
 0x240   :  { %v1065_v43 = vmax.f32 %v745_v17, %v929_v40  ;;  %v6033_v40 = vld [vmem:[%s8726_s10 + $0x54] sm:$0xf0] }
 0x241   :  { %v683_v34 = vadd.f32 %v6708_v19, %v615_v52  ;;  %1598 = vmatmul.bf16.gmra.mxu1 %v5379_v48 }
 0x242   :  { %1703 = vmatpush.bf16.msra.mxu3 %v6547_v60  ;;  %v1127_v49 = vmax.f32 %v1063_v10, %v1065_v43 }
 0x243   :  { %v747_v59 = vmax.f32 %v683_v34, 0.0 }
 0x244   :  { %v6795_v50 = vpack.c.bf16 %v1127_v49, %v1126_v33  ;;  %v5259_v49 = vor.u32 %v6033_v40, %v5258_v14  ;;  %v6041_v14 = vld [vmem:[%s8726_s10 + $0x94] sm:$0xf0] }
 0x245   :  { %v930_v47 = vrot.slane %v747_v59, 1  ;;  %1704 = vmatmul.bf16.vlgmr.msra.gmra.mxu3 %v5227_v45  ;;  %1666 = vmatmul.bf16.gmra.mxu2 %v5351_v46  ;;  %v5410_v45 = vld [vmem:[%s8726_s10 + $0x180] sm:$0xf]  ;;  %v6072_v46 = vld [vmem:[%s8726_s10 + $0x18c] sm:$0xf0] }
 0x246   :  { %v536_v53 = vpop.f32.mrf.mxu0  ;;  %v6799_v22 = vpop.f32.mrf.mxu1 }
 0x247   :  { %v616_v54 = vmul.f32 %v6702_v5, %v536_v53  ;;  %v931_v55 = vsel %vm820_vm3, %v928_v35, %v930_v47  ;;  %v5411_v53 = vor.u32 %v6072_v46, %v5410_v45 }
 0x248   :  { %v1627_v56 = vpop.f32.mrf.mxu2  ;;  %v1066_v57 = vmax.f32 %v746_v32, %v931_v55 }
 0x249   :  { %v684_v58 = vadd.f32 %v6708_v19, %v616_v54  ;;  %v6803_v60 = vadd.f32 %v1627_v56, %v6723_v38  ;;  %v5364_v38 = vld [vmem:[%s8726_s10 + $0x130] sm:$0xf0] }
 0x24a   :  { %v1128_v62 = vmax.f32 %v1064_v26, %v1066_v57  ;;  %v5367_v61 = vor.u32 %v6058_v1, %v5364_v38  ;;  %v5426_v1 = vld [vmem:[%s8726_s10 + $0x1a0] sm:$0xf]  ;;  %v6076_v38 = vld [vmem:[%s8726_s10 + $0x1ac] sm:$0x30] }
 0x24b   :  { %v748_v63 = vmax.f32 %v684_v58, 0.0 }
 0x24d   :  { %v932_v16 = vrot.slane %v748_v63, 1 }
 0x24e   :  { %v538_v0 = vpop.f32.mrf.mxu0  ;;  %v6819_v6 = vpop.f32.mrf.mxu1 }
 0x24f   :  { %v617_v2 = vmul.f32 %v6702_v5, %v538_v0  ;;  %v933_v4 = vsel %vm820_vm3, %v930_v47, %v932_v16 }
 0x250   :  { %v1629_v39 = vpop.f32.mrf.mxu2  ;;  %v1067_v10 = vmax.f32 %v747_v59, %v933_v4  ;;  %v5399_v4 = vor.u32 %v6066_v18, %v5396_v15 }
 0x251   :  { %v685_v11 = vadd.f32 %v6708_v19, %v617_v2  ;;  %v6829_v12 = vadd.f32 %v1629_v39, %v6739_v51  ;;  %1603 = vmatmul.bf16.gmra.mxu1 %v5395_v44 }
 0x252   :  { %v1129_v17 = vmax.f32 %v1065_v43, %v1067_v10 }
 0x253   :  { %v749_v24 = vmax.f32 %v685_v11, 0.0 }
 0x254   :  { %v6831_v25 = vpack.c.bf16 %v1129_v17, %v1128_v62 }
 0x255   :  { %v934_v27 = vrot.slane %v749_v24, 1  ;;  %1709 = vmatmul.bf16.gmra.mxu3 %v5243_v31  ;;  %1671 = vmatmul.bf16.gmra.mxu2 %v5367_v61  ;;  %v5427_v31 = vor.u32 %v6076_v38, %v5426_v1 }
 0x256   :  { %v541_v29 = vpop.f32.mrf.mxu0  ;;  %v6835_v32 = vpop.f32.mrf.mxu1 }
 0x257   :  { %v618_v26 = vmul.f32 %v6702_v5, %v541_v29  ;;  %v935_v28 = vsel %vm820_vm3, %v932_v16, %v934_v27  ;;  %v6037_v16 = vld [vmem:[%s8726_s10 + $0x74] sm:$0xf0] }
 0x258   :  { %v1632_v33 = vpop.f32.mrf.mxu2  ;;  %v6837_v51 = vmax.f32 %v748_v63, %v935_v28 }
 0x259   :  { %v6840_v35 = vadd.f32 %v6708_v19, %v618_v26  ;;  %v6843_v8 = vadd.f32 %v1632_v33, %v6751_v7  ;;  %v6062_v7 = vld [vmem:[%s8726_s10 + $0x144] sm:$0xf]  ;;  %v5290_v33 = vld [vmem:[%s8726_s10 + $0x88] sm:$0xf] }
 0x25a   :  { %v1130_v36 = vmax.f32 %v1066_v57, %v6837_v51  ;;  %v5383_v47 = vor.u32 %v6062_v7, %v5380_v23 }
 0x25b   :  { %v750_v20 = vmax.f32 %v6840_v35, 0.0 }
 0x25d   :  { %v6849_v37 = vrot.slane %v750_v20, 1 }
 0x25e   :  { %v543_v52 = vpop.f32.mrf.mxu0  ;;  %v6865_v34 = vpop.f32.mrf.mxu1 }
 0x25f   :  { %v937_v42 = vsel %vm820_vm3, %v934_v27, %v6849_v37  ;;  %v619_v27 = vmul.f32 %v6702_v5, %v543_v52  ;;  %v5412_v52 = vld [vmem:[%s8726_s10 + $0x190] sm:$0xf0] }
 0x260   :  { %v1634_v43 = vpop.f32.mrf.mxu2  ;;  %v6873_v48 = vmax.f32 %v749_v24, %v937_v42 }
 0x261   :  { %v6876_v59 = vadd.f32 %v1634_v43, %v6766_v30  ;;  %1608 = vmatmul.bf16.gmra.mxu1 %v5411_v53  ;;  %v5274_v30 = vld [vmem:[%s8726_s10 + $0x68] sm:$0xf]  ;;  %v687_v40 = vadd.f32 %v6708_v19, %v619_v27 }
 0x262   :  { %v1131_v54 = vmax.f32 %v1067_v10, %v6873_v48  ;;  %v5275_v2 = vor.u32 %v6037_v16, %v5274_v30 }
 0x264   :  { %v6879_v55 = vpack.c.bf16 %v1131_v54, %v1130_v36  ;;  %v751_v54 = vmax.f32 %v687_v40, 0.0 }
 0x265   :  { %1714 = vmatmul.bf16.gmra.mxu3 %v5259_v49  ;;  %1676 = vmatmul.bf16.gmra.mxu2 %v5383_v47  ;;  %v5291_v47 = vor.u32 %v6041_v14, %v5290_v33  ;;  %v6074_v33 = vld [vmem:[%s8726_s10 + $0x1a4] sm:$0xf] }
 0x266   :  { %v546_v56 = vpop.f32.mrf.mxu0  ;;  %v6881_v58 = vpop.f32.mrf.mxu1 }
 0x267   :  { %v620_v9 = vmul.f32 %v6702_v5, %v546_v56 }
 0x268   :  { %v1637_v57 = vpop.f32.mrf.mxu2 }
 0x269   :  { %v6884_v62 = vadd.f32 %v1637_v57, %v6785_v41  ;;  %v688_v29 = vadd.f32 %v6708_v19, %v620_v9 }
 0x26b   :  { %v752_v7 = vmax.f32 %v688_v29, 0.0 }
 0x26d   :  { %v940_v56 = vrot.slane %v752_v7, 1 }
 0x26e   :  { %v548_v63 = vpop.f32.mrf.mxu0  ;;  %v6900_v41 = vpop.f32.mrf.mxu1 }
 0x26f   :  { %v621_v39 = vmul.f32 %v6702_v5, %v548_v63 }
 0x270   :  { %v6898_v0 = vpop.f32.mrf.mxu2 }
 0x271   :  { %1613 = vmatmul.bf16.gmra.mxu1 %v5427_v31  ;;  %v689_v44 = vadd.f32 %v6708_v19, %v621_v39 }
 0x273   :  { %v753_v28 = vmax.f32 %v689_v44, 0.0 }
 0x275   :  { %1719 = vmatmul.bf16.gmra.mxu3 %v5275_v2  ;;  %1681 = vmatmul.bf16.gmra.mxu2 %v5399_v4  ;;  %v942_v46 = vrot.slane %v753_v28, 1 }
 0x276   :  { %v551_v13 = vpop.f32.mrf.mxu0  ;;  %v6911_v61 = vpop.f32.mrf.mxu1 }
 0x277   :  { %v622_v10 = vmul.f32 %v6702_v5, %v551_v13  ;;  %v943_v16 = vsel %vm820_vm3, %v940_v56, %v942_v46 }
 0x278   :  { %v1642_v11 = vpop.f32.mrf.mxu2  ;;  %v1072_v38 = vmax.f32 %v752_v7, %v943_v16 }
 0x279   :  { %v690_v17 = vadd.f32 %v6708_v19, %v622_v10  ;;  %v6916_v24 = vadd.f32 %v1642_v11, %v6819_v6  ;;  %v6070_v6 = vld [vmem:[%s8726_s10 + $0x184] sm:$0xf] }
 0x27a   :  { %v5415_v53 = vor.u32 %v6070_v6, %v5412_v52 }
 0x27b   :  { %v754_v26 = vmax.f32 %v690_v17, 0.0 }
 0x27d   :  { %v944_v42 = vrot.slane %v754_v26, 1 }
 0x27e   :  { %v553_v36 = vpop.f32.mrf.mxu0  ;;  %v6936_v45 = vpop.f32.mrf.mxu1 }
 0x27f   :  { %v623_v23 = vmul.f32 %v6702_v5, %v553_v36  ;;  %v945_v30 = vsel %vm820_vm3, %v942_v46, %v944_v42  ;;  %v938_v5 = vrot.slane %v751_v54, 1 }
 0x280   :  { %v6934_v43 = vpop.f32.mrf.mxu2  ;;  %v1073_v1 = vmax.f32 %v753_v28, %v945_v30 }
 0x281   :  { %v691_v49 = vadd.f32 %v6708_v19, %v623_v23  ;;  %v1535_v19 = vsel %vm820_vm3, 4294967295, %v6188_v3  ;;  %v941_v13 = vsel %vm820_vm3, %v938_v5, %v940_v56  ;;  %v939_v44 = vsel %vm820_vm3, %v6849_v37, %v938_v5  ;;  %v5306_v3 = vld [vmem:[%s8726_s10 + $0xa8] sm:$0xf]  ;;  %v5428_v37 = vld [vmem:[%s8726_s10 + $0x1b0] sm:$0x30] }
 0x282   :  { %v1536_v11 = vsel %vm1534_vm4, %v1535_v19, 0  ;;  %v1071_v27 = vmax.f32 %v751_v54, %v941_v13  ;;  %v5354_v19 = vld [vmem:[%s8726_s10 + $0x108] sm:$0xf] }
 0x283   :  { %v755_v57 = vmax.f32 %v691_v49, 0.0 }
 0x284   :  { %v1135_v28 = vmax.f32 %v1071_v27, %v1073_v1  ;;  %v1133_v40 = vmax.f32 %v6873_v48, %v1071_v27 }
 0x285   :  { %v946_v63 = vrot.slane %v755_v57, 1  ;;  %1724 = vmatmul.bf16.gmra.mxu3 %v5291_v47  ;;  %1686 = vmatmul.bf16.gmra.mxu2 %v5415_v53  ;;  %v5322_v47 = vld [vmem:[%s8726_s10 + $0xc8] sm:$0xf] }
 0x286   :  { %v6944_v31 = vpop.f32.mrf.mxu1 }
 0x287   :  { %v1075_v18 = vmax.f32 %v755_v57, %v946_v63  ;;  %v947_v15 = vsel %vm820_vm3, %v944_v42, %v946_v63  ;;  %v6053_v63 = vld [vmem:[%s8726_s10 + $0xf4] sm:$0xf0] }
 0x288   :  { %v1074_v2 = vmax.f32 %v754_v26, %v947_v15  ;;  %v1647_v4 = vpop.f32.mrf.mxu2  ;;  %v1070_v26 = vmax.f32 %v750_v20, %v939_v44  ;;  %v5431_v20 = vor.u32 %v6074_v33, %v5428_v37  ;;  %v5260_v44 = vld [vmem:[%s8726_s10 + $0x58] sm:$0xf0]  ;;  %v6061_v33 = vld [vmem:[%s8726_s10 + $0x134] sm:$0xf0] }
 0x289   :  { %v1137_v39 = vmax.f32 %v1073_v1, %v1075_v18  ;;  %v6948_v9 = vadd.f32 %v1647_v4, %v6865_v34  ;;  %v6045_v34 = vld [vmem:[%s8726_s10 + $0xb4] sm:$0xf0]  ;;  %v6027_v18 = vld [vmem:[%s8726_s10 + $0x2c] sm:$0xf] }
 0x28a   :  { %v1136_v10 = vmax.f32 %v1072_v38, %v1074_v2  ;;  %v1134_v36 = vmax.f32 %v1070_v26, %v1072_v38  ;;  %v5307_v35 = vor.u32 %v6045_v34, %v5306_v3  ;;  %v1132_v7 = vmax.f32 %v6837_v51, %v1070_v26  ;;  %v6049_v51 = vld [vmem:[%s8726_s10 + $0xd4] sm:$0xf0]  ;;  %v5370_v34 = vld [vmem:[%s8726_s10 + $0x128] sm:$0xf] }
 0x28b   :  { %v5323_v54 = vor.u32 %v6049_v51, %v5322_v47  ;;  %v6057_v4 = vld [vmem:[%s8726_s10 + $0x114] sm:$0xf0]  ;;  %v5386_v51 = vld [vmem:[%s8726_s10 + $0x148] sm:$0xf] }
 0x28c   :  { %v1224_v17 = vpack.c.bf16 %v1137_v39, %v1136_v10  ;;  %v1223_v52 = vpack.c.bf16 %v1135_v28, %v1134_v36  ;;  %v1222_v23 = vpack.c.bf16 %v1133_v40, %v1132_v7  ;;  %v5355_v10 = vor.u32 %v6057_v4, %v5354_v19 }
 0x28e   :  { %v1538_v29 = vand.u32 %v1536_v11, %v1224_v17  ;;  %v1584_v6 = vpop.f32.mrf.mxu1  ;;  %v6031_v11 = vld [vmem:[%s8726_s10 + $0x4c] sm:$0xf] }
 0x28f   :  { %v5263_v17 = vor.u32 %v6031_v11, %v5260_v44  ;;  %v5308_v11 = vld [vmem:[%s8726_s10 + $0xb8] sm:$0xf0] }
 0x290   :  { %1775 = vmatpush.bf16.msrb.mxu1 %v1538_v29  ;;  %v6966_v14 = vpop.f32.mrf.mxu2 }
 0x294   :  { %1776 = vmatpush.bf16.msrb.mxu1 %v1223_v52  ;;  %v5276_v52 = vld [vmem:[%s8726_s10 + $0x78] sm:$0xf0] }
 0x295   :  { %1729 = vmatmul.bf16.gmra.mxu3 %v5307_v35  ;;  %1691 = vmatmul.bf16.gmra.mxu2 %v5431_v20  ;;  %v6035_v20 = vld [vmem:[%s8726_s10 + $0x6c] sm:$0xf] }
 0x296   :  { %v6970_v46 = vpop.f32.mrf.mxu1  ;;  %v5279_v40 = vor.u32 %v6035_v20, %v5276_v52 }
 0x298   :  { %1777 = vmatpush.bf16.msrb.mxu1 %v1222_v23  ;;  %v1652_v42 = vpop.f32.mrf.mxu2 }
 0x299   :  { %v6973_v49 = vadd.f32 %v1652_v42, %v6900_v41  ;;  %v5228_v41 = vld [vmem:[%s8726_s10 + $0x18] sm:$0xf0] }
 0x29c   :  { %1778 = vmatpush.bf16.msrb.mxu1 %v6879_v55  ;;  %v6023_v55 = vld [vmem:[%s8726_s10 + $0xc] sm:$0xf] }
 0x29d   :  { %v5231_v56 = vor.u32 %v6023_v55, %v5228_v41 }
 0x29e   :  { %v1589_v53 = vpop.f32.mrf.mxu1 }
 0x2a0   :  { %1779 = vmatpush.bf16.msrb.mxu1 %v6831_v25  ;;  %v6983_v48 = vpop.f32.mrf.mxu2 }
 0x2a4   :  { %1780 = vmatpush.bf16.msrb.mxu1 %v6795_v50  ;;  %v5338_v50 = vld [vmem:[%s8726_s10 + $0xe8] sm:$0xf] }
 0x2a5   :  { %1734 = vmatmul.bf16.gmra.mxu3 %v5323_v54  ;;  %v5339_v5 = vor.u32 %v6053_v63, %v5338_v50  ;;  %v5292_v50 = vld [vmem:[%s8726_s10 + $0x98] sm:$0xf0] }
 0x2a6   :  { %v6993_v57 = vpop.f32.mrf.mxu1 }
 0x2a8   :  { %1781 = vmatpush.bf16.msrb.mxu1 %v6761_v21  ;;  %v1657_v25 = vpop.f32.mrf.mxu2 }
 0x2a9   :  { %v6996_v30 = vadd.f32 %v1657_v25, %v6936_v45  ;;  %v5244_v45 = vld [vmem:[%s8726_s10 + $0x38] sm:$0xf0]  ;;  %v6039_v25 = vld [vmem:[%s8726_s10 + $0x8c] sm:$0xf] }
 0x2aa   :  { %v5247_v15 = vor.u32 %v6027_v18, %v5244_v45  ;;  %v5295_v63 = vor.u32 %v6039_v25, %v5292_v50  ;;  %v6081_v25 = vld [vmem:[%s8720_s4 + $0x18] sm:$0xff]  ;;  %v5434_v50 = vld [vmem:[%s8726_s10 + $0x1a8] sm:$0xf] }
 0x2ab   :  { %5440 = vmatmul.msk.bf16.vlgmr.msrb.gmra.mxu1 %vm1491_vm5, %v5231_v56  ;;  %2024 = vmatpush.bf16.msrb.mxu2 %v6081_v25 }
 0x2ae   :  { %v1594_v21 = vpop.f32.mrf.mxu1 }
 0x2b0   :  { %v7005_v16 = vpop.f32.mrf.mxu2 }
 0x2b5   :  { %1739 = vmatmul.bf16.gmra.mxu3 %v5339_v5 }
 0x2b6   :  { %v7013_v38 = vpop.f32.mrf.mxu1 }
 0x2b8   :  { %v1662_v1 = vpop.f32.mrf.mxu2 }
 0x2b9   :  { %v7015_v2 = vadd.f32 %v1662_v1, %v1584_v6  ;;  %v5371_v6 = vor.u32 %v6061_v33, %v5370_v34  ;;  %v6069_v1 = vld [vmem:[%s8726_s10 + $0x174] sm:$0xf0] }
 0x2bb   :  { %5441 = vmatmul.msk.bf16.gmra.mxu1 %vm1491_vm5, %v5247_v15  ;;  %v5402_v15 = vld [vmem:[%s8726_s10 + $0x168] sm:$0xf] }
 0x2be   :  { %v1599_v13 = vpop.f32.mrf.mxu1 }
 0x2c0   :  { %v7024_v39 = vpop.f32.mrf.mxu2 }
 0x2c5   :  { %1744 = vmatmul.bf16.gmra.mxu3 %v5355_v10 }
 0x2c6   :  { %v7037_v28 = vpop.f32.mrf.mxu1 }
 0x2c8   :  { %v1705_v27 = vpop.f32.mrf.mxu3  ;;  %v1667_v3 = vpop.f32.mrf.mxu2 }
 0x2c9   :  { %v7033_v29 = vadd.f32 %v1705_v27, %v6803_v60  ;;  %v7035_v26 = vadd.f32 %v1667_v3, %v1589_v53  ;;  %v6065_v53 = vld [vmem:[%s8726_s10 + $0x154] sm:$0xf0] }
 0x2ca   :  { %v5387_v41 = vor.u32 %v6065_v53, %v5386_v51 }
 0x2cb   :  { %5442 = vmatmul.msk.bf16.gmra.mxu1 %vm1491_vm5, %v5263_v17 }
 0x2ce   :  { %v1604_v35 = vpop.f32.mrf.mxu1 }
 0x2d0   :  { %v1707_v37 = vpop.f32.mrf.mxu3  ;;  %v7046_v36 = vpop.f32.mrf.mxu2 }
 0x2d1   :  { %v7049_v60 = vadd.f32 %v1707_v37, %v6829_v12  ;;  %v5418_v37 = vld [vmem:[%s8726_s10 + $0x188] sm:$0xf] }
 0x2d5   :  { %1749 = vmatmul.bf16.gmra.mxu3 %v5371_v6  ;;  %v6073_v6 = vld [vmem:[%s8726_s10 + $0x194] sm:$0xf0] }
 0x2d6   :  { %v7062_v12 = vpop.f32.mrf.mxu1 }
 0x2d8   :  { %v1710_v7 = vpop.f32.mrf.mxu3  ;;  %v1672_v23 = vpop.f32.mrf.mxu2 }
 0x2d9   :  { %v7058_v42 = vadd.f32 %v1710_v7, %v6843_v8  ;;  %v7060_v47 = vadd.f32 %v1672_v23, %v1594_v21 }
 0x2db   :  { %5443 = vmatmul.msk.bf16.gmra.mxu1 %vm1491_vm5, %v5279_v40  ;;  %v5419_v40 = vor.u32 %v6073_v6, %v5418_v37  ;;  %v6055_v37 = vld [vmem:[%s8726_s10 + $0x10c] sm:$0xf]  ;;  %v5356_v6 = vld [vmem:[%s8726_s10 + $0x118] sm:$0xf0] }
 0x2de   :  { %v1609_v56 = vpop.f32.mrf.mxu1 }
 0x2e0   :  { %v1712_v54 = vpop.f32.mrf.mxu3  ;;  %v7071_v55 = vpop.f32.mrf.mxu2 }
 0x2e1   :  { %v7074_v8 = vadd.f32 %v1712_v54, %v6876_v59 }
 0x2e5   :  { %1754 = vmatmul.bf16.gmra.mxu3 %v5387_v41  ;;  %v6079_v41 = vld [vmem:[%s8720_s4 + $0x8] sm:$0xff] }
 0x2e6   :  { %v7087_v59 = vpop.f32.mrf.mxu1  ;;  %2129 = vmatpush.bf16.msrb.mxu3 %v6079_v41 }
 0x2e8   :  { %v1715_v21 = vpop.f32.mrf.mxu3  ;;  %v1677_v5 = vpop.f32.mrf.mxu2 }
 0x2e9   :  { %v7083_v18 = vadd.f32 %v1715_v21, %v6884_v62  ;;  %v7085_v45 = vadd.f32 %v1677_v5, %v1599_v13  ;;  %v5403_v62 = vor.u32 %v6069_v1, %v5402_v15  ;;  %v6043_v13 = vld [vmem:[%s8726_s10 + $0xac] sm:$0xf]  ;;  %v6078_v21 = vld [vmem:[%s8720_s4] sm:$0xff]  ;;  %v5340_v1 = vld [vmem:[%s8726_s10 + $0xf8] sm:$0xf0] }
 0x2ea   :  { %v5311_v44 = vor.u32 %v6043_v13, %v5308_v11  ;;  %2130 = vmatpush.bf16.msrb.mxu3 %v6078_v21  ;;  %v6051_v15 = vld [vmem:[%s8726_s10 + $0xec] sm:$0xf]  ;;  %v5372_v21 = vld [vmem:[%s8726_s10 + $0x138] sm:$0xf0] }
 0x2eb   :  { %5444 = vmatmul.msk.bf16.gmra.mxu1 %vm1491_vm5, %v5295_v63 }
 0x2ee   :  { %v1614_v10 = vpop.f32.mrf.mxu1 }
 0x2f0   :  { %v7096_v19 = vpop.f32.mrf.mxu3  ;;  %v7098_v4 = vpop.f32.mrf.mxu2 }
 0x2f5   :  { %1759 = vmatmul.bf16.gmra.mxu3 %v5403_v62  ;;  %v5343_v62 = vor.u32 %v6051_v15, %v5340_v1 }
 0x2f6   :  { %v1616_v33 = vpop.f32.mrf.mxu1 }
 0x2f8   :  { %v1720_v17 = vpop.f32.mrf.mxu3  ;;  %v1682_v27 = vpop.f32.mrf.mxu2 }
 0x2f9   :  { %v7107_v3 = vadd.f32 %v1720_v17, %v6916_v24  ;;  %v7109_v34 = vadd.f32 %v1682_v27, %v1604_v35  ;;  %v6047_v24 = vld [vmem:[%s8726_s10 + $0xcc] sm:$0xf]  ;;  %v5324_v35 = vld [vmem:[%s8726_s10 + $0xd8] sm:$0xf0] }
 0x2fa   :  { %v5327_v7 = vor.u32 %v6047_v24, %v5324_v35 }
 0x2fb   :  { %5445 = vmatmul.msk.bf16.gmra.mxu1 %vm1491_vm5, %v5311_v44 }
 0x300   :  { %v7118_v20 = vpop.f32.mrf.mxu3  ;;  %v7120_v52 = vpop.f32.mrf.mxu2 }
 0x305   :  { %1764 = vmatmul.bf16.gmra.mxu3 %v5419_v40  ;;  %v5359_v40 = vor.u32 %v6055_v37, %v5356_v6 }
 0x308   :  { %v1725_v23 = vpop.f32.mrf.mxu3  ;;  %v1687_v51 = vpop.f32.mrf.mxu2 }
 0x309   :  { %v7129_v53 = vadd.f32 %v1725_v23, %v6948_v9  ;;  %v7131_v54 = vadd.f32 %v1687_v51, %v1609_v56  ;;  %v6077_v9 = vld [vmem:[%s8726_s10 + $0x1b4] sm:$0x30]  ;;  %v6088_v23 = vld [vmem:[%s8720_s4 + $0x50] sm:$0xff] }
 0x30a   :  { %v5435_v5 = vor.u32 %v6077_v9, %v5434_v50 }
 0x30b   :  { %5446 = vmatmul.msk.bf16.gmra.mxu1 %vm1491_vm5, %v5327_v7 }
 0x310   :  { %v7146_v56 = vpop.f32.mrf.mxu3  ;;  %v7148_v63 = vpop.f32.mrf.mxu2 }
 0x311   :  { %8735 = vst [vmem:[#allocation5_spill] sm:$0xff] %v7148_v63 }
 0x315   :  { %1769 = vmatmul.bf16.gmra.mxu3 %v5435_v5 }
 0x318   :  { %v1730_v13 = vpop.f32.mrf.mxu3  ;;  %v1692_v11 = vpop.f32.mrf.mxu2 }
 0x319   :  { %v7160_v44 = vadd.f32 %v1730_v13, %v6973_v49  ;;  %v7162_v17 = vadd.f32 %v1692_v11, %v1614_v10  ;;  %v6080_v49 = vld [vmem:[%s8720_s4 + $0x10] sm:$0xff]  ;;  %v6089_v10 = vld [vmem:[%s8720_s4 + $0x58] sm:$0xff] }
 0x31a   :  { %2025 = vmatpush.bf16.msrb.mxu2 %v6080_v49  ;;  %2904 = vmatpush.bf16.msrb.mxu0 %v6089_v10 }
 0x31b   :  { %5447 = vmatmul.msk.bf16.gmra.mxu1 %vm1491_vm5, %v5343_v62 }
 0x31e   :  { %2905 = vmatpush.bf16.msrb.mxu0 %v6088_v23 }
 0x320   :  { %v7165_v27 = vpop.f32.mrf.mxu3  ;;  %v1694_v33 = vpop.f32.mrf.mxu2 }
 0x328   :  { %v1735_v24 = vpop.f32.mrf.mxu3  ;;  %v1783_v35 = vpop.f32.mrf.mxu1 }
 0x329   :  { %v7180_v7 = vadd.f32 %v1735_v24, %v6996_v30  ;;  %v1784_v25 = vadd.f32 %v1783_v35, %v7033_v29  ;;  %v6059_v30 = vld [vmem:[%s8726_s10 + $0x12c] sm:$0xf] }
 0x32a   :  { %v5375_v5 = vor.u32 %v6059_v30, %v5372_v21 }
 0x32b   :  { %5448 = vmatmul.msk.bf16.gmra.mxu1 %vm1491_vm5, %v5359_v40  ;;  %v6063_v40 = vld [vmem:[%s8726_s10 + $0x14c] sm:$0xf] }
 0x330   :  { %v7186_v51 = vpop.f32.mrf.mxu3  ;;  %v1785_v41 = vpop.f32.mrf.mxu1 }
 0x331   :  { %v1786_v50 = vadd.f32 %v1785_v41, %v7049_v60 }
 0x333   :  { %v1852_v9 = vpack.c.bf16 %v1786_v50, %v1784_v25 }
 0x335   :  { %5486 = vmatmul.msk.bf16.vlgmr.msrb.gmra.mxu3 %vm1981_vm6, %v1852_v9  ;;  %v1877_v13 = vshll.u32 %v1852_v9, 16  ;;  %v2210_v10 = vrot.slane %v1852_v9, 1 }
 0x337   :  { %v1879_v6 = vrot.slane %v1877_v13, 1 }
 0x338   :  { %v1740_v15 = vpop.f32.mrf.mxu3  ;;  %v1788_v1 = vpop.f32.mrf.mxu1 }
 0x339   :  { %v7198_v62 = vadd.f32 %v1740_v15, %v7015_v2  ;;  %v1789_v29 = vadd.f32 %v1788_v1, %v7058_v42  ;;  %v5388_v2 = vld [vmem:[%s8726_s10 + $0x158] sm:$0xf0]  ;;  %v1875_v42 = vshrl.u32 %v1852_v9, 16 }
 0x33a   :  { %v5391_v41 = vor.u32 %v6063_v40, %v5388_v2  ;;  %v1640_v40 = vadd.f32 %v6898_v0, %v6799_v22 }
 0x33b   :  { %v2374_v60 = vpack.c.bf16 %v1789_v29, %v1786_v50  ;;  %5449 = vmatmul.msk.bf16.gmra.mxu1 %vm1491_vm5, %v5375_v5  ;;  %v1880_v23 = vor.u32 %v1879_v6, %v1875_v42 }
 0x33d   :  { %v2574_v9 = vshrl.u32 %v2374_v60, 16  ;;  %v2577_v5 = vshll.u32 %v2374_v60, 16  ;;  %v2403_v42 = vrot.slane %v2374_v60, 1 }
 0x340   :  { %v7202_v11 = vpop.f32.mrf.mxu3  ;;  %v1790_v33 = vpop.f32.mrf.mxu1 }
 0x341   :  { %v1791_v37 = vadd.f32 %v1790_v33, %v7074_v8 }
 0x343   :  { %v7205_v49 = vpack.c.bf16 %v1791_v37, %v1789_v29 }
 0x345   :  { %5487 = vmatmul.msk.bf16.gmra.mxu3 %vm1981_vm6, %v7205_v49  ;;  %v1882_v24 = vshll.u32 %v7205_v49, 16  ;;  %v1886_v8 = vshrl.u32 %v7205_v49, 16  ;;  %v2211_v35 = vrot.slane %v7205_v49, 1 }
 0x347   :  { %v1884_v25 = vrot.slane %v1882_v24, 1  ;;  %v7218_v50 = vrot.slane %v1882_v24, 3  ;;  %v7220_v30 = vrot.slane %v1886_v8, 2  ;;  %v7223_v21 = vsel %vm820_vm3, %v2210_v10, %v2211_v35 }
 0x348   :  { %8736 = vst [vmem:[#allocation6_spill] sm:$0xff] %v7223_v21  ;;  %v1745_v15 = vpop.f32.mrf.mxu3  ;;  %v1793_v1 = vpop.f32.mrf.mxu1  ;;  %v2579_v10 = vrot.slane %v2577_v5, 2  ;;  %v2827_v24 = vrot.slane %v2374_v60, 2 }
 0x349   :  { %v7226_v29 = vadd.f32 %v1745_v15, %v7035_v26  ;;  %v1794_v13 = vadd.f32 %v1793_v1, %v7083_v18  ;;  %v1885_v33 = vsel %vm1873_vm7, %v1880_v23, %v1884_v25  ;;  %v3171_v6 = vor.u32 %v7218_v50, %v7220_v30  ;;  %v6067_v1 = vld [vmem:[%s8726_s10 + $0x16c] sm:$0xf] }
 0x34a   :  { %5466 = vmatmul.msk.bf16.vlgmr.msrb.gmra.mxu2 %vm1981_vm6, %v1885_v33  ;;  %v2576_v26 = vrot.slane %v2574_v9, 1  ;;  %v1718_v30 = vadd.f32 %v7096_v19, %v1640_v40  ;;  %v5404_v19 = vld [vmem:[%s8726_s10 + $0x178] sm:$0xf0] }
 0x34b   :  { %v7235_v2 = vpack.c.bf16 %v1794_v13, %v1791_v37  ;;  %5450 = vmatmul.msk.bf16.gmra.mxu1 %vm1491_vm5, %v5391_v41 }
 0x34c   :  { %v2580_v33 = vor.u32 %v2579_v10, %v2576_v26  ;;  %v3374_v26 = vrot.slane %v7205_v49, 3 }
 0x34d   :  { %v2404_v18 = vrot.slane %v7235_v2, 1  ;;  %v2582_v23 = vshrl.u32 %v7235_v2, 16  ;;  %v2585_v15 = vshll.u32 %v7235_v2, 16  ;;  %v2828_v50 = vrot.slane %v7235_v2, 2 }
 0x34f   :  { %v2584_v22 = vrot.slane %v2582_v23, 1  ;;  %v2587_v0 = vrot.slane %v2585_v15, 2  ;;  %v2829_v37 = vsel %vm2826_vm8, %v2827_v24, %v2828_v50  ;;  %v7245_v41 = vsel %vm820_vm3, %v2403_v42, %v2404_v18 }
 0x350   :  { %8737 = vst [vmem:[#allocation7_spill] sm:$0xff] %v7245_v41  ;;  %v7247_v9 = vpop.f32.mrf.mxu3  ;;  %v1795_v60 = vpop.f32.mrf.mxu1  ;;  %5582 = vmatmul.msk.bf16.vlgmr.msrb.gmra.mxu0 %vm1981_vm6, %v2829_v37  ;;  %v5407_v24 = vor.u32 %v6067_v1, %v5404_v19 }
 0x351   :  { %v1796_v5 = vadd.f32 %v1795_v60, %v1718_v30  ;;  %v2588_v40 = vor.u32 %v2587_v0, %v2584_v22  ;;  %v1888_v60 = vor.u32 %v1886_v8, %v1884_v25 }
 0x353   :  { %v7256_v2 = vpack.c.bf16 %v1796_v5, %v1794_v13  ;;  %v7259_v42 = vsel %vm2572_vm9, %v2580_v33, %v2588_v40  ;;  %v2998_v13 = vrot.slane %v7205_v49, 2 }
 0x355   :  { %5488 = vmatmul.msk.bf16.gmra.mxu3 %vm1981_vm6, %v7256_v2  ;;  %v1890_v23 = vshll.u32 %v7256_v2, 16  ;;  %v1894_v15 = vshrl.u32 %v7256_v2, 16  ;;  %v2213_v30 = vrot.slane %v7256_v2, 1  ;;  %v3375_v37 = vrot.slane %v7256_v2, 3 }
 0x356   :  { %v2999_v10 = vrot.slane %v7256_v2, 2 }
 0x357   :  { %v1892_v22 = vrot.slane %v1890_v23, 1  ;;  %v3173_v0 = vrot.slane %v1890_v23, 3  ;;  %v3172_v1 = vrot.slane %v1894_v15, 2  ;;  %v7271_v19 = vsel %vm820_vm3, %v2211_v35, %v2213_v30 }
 0x358   :  { %8738 = vst [vmem:[#allocation8_spill] sm:$0xff] %v7271_v19  ;;  %v1750_v33 = vpop.f32.mrf.mxu3  ;;  %v1798_v21 = vpop.f32.mrf.mxu1  ;;  %v7274_v41 = vsel %vm381_vm1, %v3374_v26, %v3375_v37  ;;  %v7277_v63 = vsel %vm2826_vm8, %v2998_v13, %v2999_v10  ;;  %v1645_v23 = vadd.f32 %v6934_v43, %v6835_v32 }
 0x359   :  { %8739 = vst [vmem:[#allocation9_spill] sm:$0xff] %v7274_v41  ;;  %v7280_v8 = vadd.f32 %v1750_v33, %v7060_v47  ;;  %v1799_v49 = vadd.f32 %v1798_v21, %v7107_v3  ;;  %v1893_v25 = vsel %vm1873_vm7, %v1888_v60, %v1892_v22  ;;  %v3174_v35 = vor.u32 %v3173_v0, %v3172_v1 }
 0x35a   :  { %8740 = vst [vmem:[#allocation10_spill] sm:$0xff] %v7277_v63  ;;  %5467 = vmatmul.msk.bf16.gmra.mxu2 %vm1981_vm6, %v1893_v25  ;;  %v1723_v3 = vadd.f32 %v7118_v20, %v1645_v23  ;;  %v6071_v20 = vld [vmem:[%s8726_s10 + $0x18c] sm:$0xf] }
 0x35b   :  { %v2376_v2 = vpack.c.bf16 %v1799_v49, %v1796_v5  ;;  %5451 = vmatmul.msk.bf16.gmra.mxu1 %vm1491_vm5, %v5407_v24  ;;  %v7289_v26 = vsel %vm3168_vm10, %v3171_v6, %v3174_v35  ;;  %v6087_v6 = vld [vmem:[%s8720_s4 + $0x48] sm:$0xff] }
 0x35c   :  { %8741 = vst [vmem:[#allocation11_spill] sm:$0xff] %v7289_v26  ;;  %2734 = vmatpush.bf16.msra.mxu1 %v6087_v6 }
 0x35d   :  { %v2830_v13 = vrot.slane %v2376_v2, 2  ;;  %v2591_v47 = vshrl.u32 %v2376_v2, 16  ;;  %v2594_v33 = vshll.u32 %v2376_v2, 16  ;;  %v2406_v63 = vrot.slane %v2376_v2, 1 }
 0x35f   :  { %v2831_v21 = vsel %vm2826_vm8, %v2828_v50, %v2830_v13  ;;  %v2593_v60 = vrot.slane %v2591_v47, 1  ;;  %v2596_v25 = vrot.slane %v2594_v33, 2  ;;  %v7294_v5 = vsel %vm820_vm3, %v2404_v18, %v2406_v63  ;;  %v5420_v18 = vld [vmem:[%s8726_s10 + $0x198] sm:$0xf0] }
 0x360   :  { %v7296_v24 = vpop.f32.mrf.mxu3  ;;  %v1800_v0 = vpop.f32.mrf.mxu1  ;;  %5583 = vmatmul.msk.bf16.gmra.mxu0 %vm1981_vm6, %v2831_v21  ;;  %v1896_v33 = vor.u32 %v1894_v15, %v1892_v22  ;;  %v6086_v21 = vld [vmem:[%s8720_s4 + $0x40] sm:$0xff] }
 0x361   :  { %v1801_v32 = vadd.f32 %v1800_v0, %v1723_v3  ;;  %v2597_v43 = vor.u32 %v2596_v25, %v2593_v60  ;;  %v5423_v3 = vor.u32 %v6071_v20, %v5420_v18  ;;  %2735 = vmatpush.bf16.msra.mxu1 %v6086_v21  ;;  %v1650_v18 = vadd.f32 %v6966_v14, %v6881_v58 }
 0x363   :  { %v7302_v1 = vpack.c.bf16 %v1801_v32, %v1799_v49  ;;  %v7311_v50 = vsel %vm2572_vm9, %v2588_v40, %v2597_v43 }
 0x365   :  { %5489 = vmatmul.msk.bf16.gmra.mxu3 %vm1981_vm6, %v7302_v1  ;;  %v1898_v2 = vshll.u32 %v7302_v1, 16  ;;  %v1902_v49 = vshrl.u32 %v7302_v1, 16  ;;  %v2215_v23 = vrot.slane %v7302_v1, 1  ;;  %v3377_v47 = vrot.slane %v7302_v1, 3 }
 0x366   :  { %v3001_v40 = vrot.slane %v7302_v1, 2 }
 0x367   :  { %v1900_v60 = vrot.slane %v1898_v2, 1  ;;  %v7324_v25 = vsel %vm820_vm3, %v2213_v30, %v2215_v23  ;;  %v7327_v0 = vsel %vm381_vm1, %v3375_v37, %v3377_v47  ;;  %v3176_v6 = vrot.slane %v1902_v49, 2 }
 0x368   :  { %8742 = vst [vmem:[#allocation12_spill] sm:$0xff] %v7324_v25  ;;  %v1755_v26 = vpop.f32.mrf.mxu3  ;;  %v1803_v41 = vpop.f32.mrf.mxu1  ;;  %v3177_v19 = vrot.slane %v1898_v2, 3  ;;  %v7330_v15 = vsel %vm2826_vm8, %v2999_v10, %v3001_v40 }
 0x369   :  { %8743 = vst [vmem:[#allocation13_spill] sm:$0xff] %v7327_v0  ;;  %v7333_v22 = vadd.f32 %v1755_v26, %v7085_v45  ;;  %v1804_v1 = vadd.f32 %v1803_v41, %v7129_v53  ;;  %v1901_v20 = vsel %vm1873_vm7, %v1896_v33, %v1900_v60  ;;  %v1728_v53 = vadd.f32 %v7146_v56, %v1650_v18  ;;  %v5436_v56 = vld [vmem:[%s8726_s10 + $0x1b8] sm:$0x30] }
 0x36a   :  { %8744 = vst [vmem:[#allocation14_spill] sm:$0xff] %v7330_v15  ;;  %5468 = vmatmul.msk.bf16.gmra.mxu2 %vm1981_vm6, %v1901_v20  ;;  %v3178_v30 = vor.u32 %v3177_v19, %v3176_v6  ;;  %v6075_v6 = vld [vmem:[%s8726_s10 + $0x1ac] sm:$0xf] }
 0x36b   :  { %v2377_v37 = vpack.c.bf16 %v1804_v1, %v1801_v32  ;;  %5452 = vmatmul.msk.bf16.gmra.mxu1 %vm1491_vm5, %v5423_v3 }
 0x36c   :  { %v7342_v2 = vsel %vm3168_vm10, %v3174_v35, %v3178_v30 }
 0x36d   :  { %8745 = vst [vmem:[#allocation15_spill] sm:$0xff] %v7342_v2  ;;  %v2832_v10 = vrot.slane %v2377_v37, 2  ;;  %v2600_v21 = vshrl.u32 %v2377_v37, 16  ;;  %v2603_v45 = vshll.u32 %v2377_v37, 16  ;;  %v2408_v26 = vrot.slane %v2377_v37, 1 }
 0x36f   :  { %v2833_v41 = vsel %vm2826_vm8, %v2830_v13, %v2832_v10  ;;  %v2602_v33 = vrot.slane %v2600_v21, 1  ;;  %v2605_v20 = vrot.slane %v2603_v45, 2  ;;  %v7347_v19 = vsel %vm820_vm3, %v2406_v63, %v2408_v26 }
 0x370   :  { %v7349_v32 = vpop.f32.mrf.mxu3  ;;  %v1805_v3 = vpop.f32.mrf.mxu1  ;;  %5584 = vmatmul.msk.bf16.gmra.mxu0 %vm1981_vm6, %v2833_v41  ;;  %v1904_v45 = vor.u32 %v1902_v49, %v1900_v60 }
 0x371   :  { %v1806_v58 = vadd.f32 %v1805_v3, %v1728_v53  ;;  %v2606_v14 = vor.u32 %v2605_v20, %v2602_v33  ;;  %v5439_v53 = vor.u32 %v6075_v6, %v5436_v56 }
 0x373   :  { %v1856_v35 = vpack.c.bf16 %v1806_v58, %v1804_v1  ;;  %v7359_v13 = vsel %vm2572_vm9, %v2597_v43, %v2606_v14 }
 0x375   :  { %5490 = vmatmul.msk.bf16.gmra.mxu3 %vm1981_vm6, %v1856_v35  ;;  %v1906_v63 = vshll.u32 %v1856_v35, 16  ;;  %v1910_v37 = vshrl.u32 %v1856_v35, 16  ;;  %v2217_v18 = vrot.slane %v1856_v35, 1  ;;  %v3379_v21 = vrot.slane %v1856_v35, 3 }
 0x376   :  { %v3003_v1 = vrot.slane %v1856_v35, 2 }
 0x377   :  { %v1908_v41 = vrot.slane %v1906_v63, 1  ;;  %v7363_v33 = vsel %vm820_vm3, %v2215_v23, %v2217_v18  ;;  %v7366_v20 = vsel %vm381_vm1, %v3377_v47, %v3379_v21  ;;  %v3180_v3 = vrot.slane %v1910_v37, 2 }
 0x378   :  { %v1760_v15 = vpop.f32.mrf.mxu3  ;;  %v1808_v43 = vpop.f32.mrf.mxu1  ;;  %v3181_v2 = vrot.slane %v1906_v63, 3  ;;  %v7369_v0 = vsel %vm2826_vm8, %v3001_v40, %v3003_v1  ;;  %v1655_v47 = vadd.f32 %v6983_v48, %v6911_v61 }
 0x379   :  { %8746 = vst [vmem:[#allocation16_spill] sm:$0xff] %v7369_v0  ;;  %v7372_v25 = vadd.f32 %v1760_v15, %v7109_v34  ;;  %v1809_v49 = vadd.f32 %v1808_v43, %v7160_v44  ;;  %v1909_v60 = vsel %vm1873_vm7, %v1904_v45, %v1908_v41 }
 0x37a   :  { %5469 = vmatmul.msk.bf16.gmra.mxu2 %vm1981_vm6, %v1909_v60  ;;  %v3182_v23 = vor.u32 %v3181_v2, %v3180_v3  ;;  %v1733_v44 = vadd.f32 %v7165_v27, %v1655_v47  ;;  %v1912_v47 = vor.u32 %v1910_v37, %v1908_v41 }
 0x37b   :  { %v2378_v35 = vpack.c.bf16 %v1809_v49, %v1806_v58  ;;  %5453 = vmatmul.msk.bf16.gmra.mxu1 %vm1491_vm5, %v5439_v53 }
 0x37c   :  { %v7381_v6 = vsel %vm3168_vm10, %v3178_v30, %v3182_v23 }
 0x37d   :  { %8747 = vst [vmem:[#allocation17_spill] sm:$0xff] %v7381_v6  ;;  %v2834_v40 = vrot.slane %v2378_v35, 2  ;;  %v2609_v56 = vshrl.u32 %v2378_v35, 16  ;;  %v2612_v34 = vshll.u32 %v2378_v35, 16  ;;  %v2410_v15 = vrot.slane %v2378_v35, 1 }
 0x37f   :  { %v2835_v63 = vsel %vm2826_vm8, %v2832_v10, %v2834_v40  ;;  %v2611_v45 = vrot.slane %v2609_v56, 1  ;;  %v2614_v43 = vrot.slane %v2612_v34, 2  ;;  %v7386_v2 = vsel %vm820_vm3, %v2408_v26, %v2410_v15 }
 0x380   :  { %v7388_v58 = vpop.f32.mrf.mxu3  ;;  %v1810_v53 = vpop.f32.mrf.mxu1  ;;  %5585 = vmatmul.msk.bf16.gmra.mxu0 %vm1981_vm6, %v2835_v63 }
 0x381   :  { %v1811_v61 = vadd.f32 %v1810_v53, %v1733_v44  ;;  %v2615_v48 = vor.u32 %v2614_v43, %v2611_v45 }
 0x383   :  { %v1857_v30 = vpack.c.bf16 %v1811_v61, %v1809_v49  ;;  %v7392_v3 = vsel %vm2572_vm9, %v2606_v14, %v2615_v48 }
 0x385   :  { %5491 = vmatmul.msk.bf16.gmra.mxu3 %vm1981_vm6, %v1857_v30  ;;  %v1914_v27 = vshll.u32 %v1857_v30, 16  ;;  %v1918_v10 = vshrl.u32 %v1857_v30, 16  ;;  %v2219_v60 = vrot.slane %v1857_v30, 1  ;;  %v3381_v35 = vrot.slane %v1857_v30, 3 }
 0x386   :  { %v3005_v26 = vrot.slane %v1857_v30, 2 }
 0x387   :  { %v1916_v56 = vrot.slane %v1914_v27, 1  ;;  %v7396_v34 = vsel %vm820_vm3, %v2217_v18, %v2219_v60  ;;  %v7399_v63 = vsel %vm381_vm1, %v3379_v21, %v3381_v35  ;;  %v3184_v44 = vrot.slane %v1918_v10, 2 }
 0x388   :  { %v1765_v49 = vpop.f32.mrf.mxu3  ;;  %v1813_v45 = vpop.f32.mrf.mxu1  ;;  %v3185_v14 = vrot.slane %v1914_v27, 3  ;;  %v7402_v43 = vsel %vm2826_vm8, %v3003_v1, %v3005_v26  ;;  %v1660_v21 = vadd.f32 %v7005_v16, %v6944_v31 }
 0x389   :  { %8748 = vst [vmem:[#allocation18_spill] sm:$0xff] %v7402_v43  ;;  %v7405_v53 = vadd.f32 %v1765_v49, %v7131_v54  ;;  %v1814_v37 = vadd.f32 %v1813_v45, %v7180_v7  ;;  %v1917_v41 = vsel %vm1873_vm7, %v1912_v47, %v1916_v56 }
 0x38a   :  { %5470 = vmatmul.msk.bf16.gmra.mxu2 %vm1981_vm6, %v1917_v41  ;;  %v3186_v18 = vor.u32 %v3185_v14, %v3184_v44  ;;  %v1738_v7 = vadd.f32 %v7186_v51, %v1660_v21 }
 0x38b   :  { %v2379_v30 = vpack.c.bf16 %v1814_v37, %v1811_v61  ;;  %5558 = vmatmul.msk.bf16.vlgmr.msra.gmra.mxu1 %vm1981_vm6, %v7259_v42 }
 0x38c   :  { %v7415_v1 = vsel %vm3168_vm10, %v3182_v23, %v3186_v18 }
 0x38d   :  { %8749 = vst [vmem:[#allocation19_spill] sm:$0xff] %v7415_v1  ;;  %v2836_v27 = vrot.slane %v2379_v30, 2  ;;  %v2618_v54 = vshrl.u32 %v2379_v30, 16  ;;  %v2621_v49 = vshll.u32 %v2379_v30, 16  ;;  %v2412_v43 = vrot.slane %v2379_v30, 1 }
 0x38f   :  { %v2837_v47 = vsel %vm2826_vm8, %v2834_v40, %v2836_v27  ;;  %v2620_v45 = vrot.slane %v2618_v54, 1  ;;  %v2623_v44 = vrot.slane %v2621_v49, 2  ;;  %v7420_v61 = vsel %vm820_vm3, %v2410_v15, %v2412_v43 }
 0x390   :  { %v7422_v42 = vpop.f32.mrf.mxu3  ;;  %v1815_v14 = vpop.f32.mrf.mxu1  ;;  %5586 = vmatmul.msk.bf16.gmra.mxu0 %vm1981_vm6, %v2837_v47  ;;  %v1920_v54 = vor.u32 %v1918_v10, %v1916_v56 }
 0x391   :  { %v1816_v31 = vadd.f32 %v1815_v14, %v1738_v7  ;;  %v2624_v16 = vor.u32 %v2623_v44, %v2620_v45 }
 0x393   :  { %v1858_v23 = vpack.c.bf16 %v1816_v31, %v1814_v37  ;;  %v7426_v41 = vsel %vm2572_vm9, %v2615_v48, %v2624_v16 }
 0x395   :  { %5492 = vmatmul.msk.bf16.gmra.mxu3 %vm1981_vm6, %v1858_v23  ;;  %v1922_v51 = vshll.u32 %v1858_v23, 16  ;;  %v1926_v40 = vshrl.u32 %v1858_v23, 16  ;;  %v2221_v30 = vrot.slane %v1858_v23, 1  ;;  %v3383_v21 = vrot.slane %v1858_v23, 3 }
 0x396   :  { %v3007_v15 = vrot.slane %v1858_v23, 2 }
 0x397   :  { %v1924_v49 = vrot.slane %v1922_v51, 1  ;;  %v7430_v0 = vsel %vm820_vm3, %v2219_v60, %v2221_v30  ;;  %v7433_v47 = vsel %vm381_vm1, %v3381_v35, %v3383_v21  ;;  %v3188_v7 = vrot.slane %v1926_v40, 2 }
 0x398   :  { %v1770_v37 = vpop.f32.mrf.mxu3  ;;  %v1818_v45 = vpop.f32.mrf.mxu1  ;;  %v3189_v48 = vrot.slane %v1922_v51, 3  ;;  %v7436_v44 = vsel %vm2826_vm8, %v3005_v26, %v3007_v15  ;;  %v1665_v35 = vadd.f32 %v7024_v39, %v6970_v46 }
 0x399   :  { %8750 = vst [vmem:[#allocation20_spill] sm:$0xff] %v7436_v44  ;;  %v7439_v14 = vadd.f32 %v1770_v37, %v7162_v17  ;;  %v1819_v10 = vadd.f32 %v1818_v45, %v7198_v62  ;;  %v1925_v56 = vsel %vm1873_vm7, %v1920_v54, %v1924_v49 }
 0x39a   :  { %5471 = vmatmul.msk.bf16.gmra.mxu2 %vm1981_vm6, %v1925_v56  ;;  %v3190_v60 = vor.u32 %v3189_v48, %v3188_v7  ;;  %v1743_v62 = vadd.f32 %v7202_v11, %v1665_v35 }
 0x39b   :  { %v2380_v23 = vpack.c.bf16 %v1819_v10, %v1816_v31  ;;  %5559 = vmatmul.msk.bf16.gmra.mxu1 %vm1981_vm6, %v7311_v50 }
 0x39c   :  { %v7449_v26 = vsel %vm3168_vm10, %v3186_v18, %v3190_v60 }
 0x39d   :  { %8751 = vst [vmem:[#allocation21_spill] sm:$0xff] %v7449_v26  ;;  %v2838_v51 = vrot.slane %v2380_v23, 2  ;;  %v2627_v17 = vshrl.u32 %v2380_v23, 16  ;;  %v2630_v37 = vshll.u32 %v2380_v23, 16  ;;  %v2414_v44 = vrot.slane %v2380_v23, 1 }
 0x39f   :  { %v2839_v54 = vsel %vm2826_vm8, %v2836_v27, %v2838_v51  ;;  %v2629_v45 = vrot.slane %v2627_v17, 1  ;;  %v2632_v7 = vrot.slane %v2630_v37, 2  ;;  %v7454_v31 = vsel %vm820_vm3, %v2412_v43, %v2414_v44 }
 0x3a0   :  { %v1820_v50 = vpop.f32.mrf.mxu1  ;;  %5587 = vmatmul.msk.bf16.gmra.mxu0 %vm1981_vm6, %v2839_v54  ;;  %v1772_v46 = vpop.f32.mrf.mxu3  ;;  %v1928_v17 = vor.u32 %v1926_v40, %v1924_v49 }
 0x3a1   :  { %v1821_v39 = vadd.f32 %v1820_v50, %v1743_v62  ;;  %v2633_v18 = vor.u32 %v2632_v7, %v2629_v45 }
 0x3a3   :  { %v1859_v48 = vpack.c.bf16 %v1821_v39, %v1819_v10  ;;  %v7458_v56 = vsel %vm2572_vm9, %v2624_v16, %v2633_v18 }
 0x3a5   :  { %5493 = vmatmul.msk.bf16.gmra.mxu3 %vm1981_vm6, %v1859_v48  ;;  %v1930_v11 = vshll.u32 %v1859_v48, 16  ;;  %v1934_v23 = vshrl.u32 %v1859_v48, 16  ;;  %v2223_v27 = vrot.slane %v1859_v48, 1  ;;  %v3385_v35 = vrot.slane %v1859_v48, 3 }
 0x3a6   :  { %v3009_v37 = vrot.slane %v1859_v48, 2 }
 0x3a7   :  { %v1932_v43 = vrot.slane %v1930_v11, 1  ;;  %v7462_v26 = vsel %vm820_vm3, %v2221_v30, %v2223_v27  ;;  %v7465_v54 = vsel %vm381_vm1, %v3383_v21, %v3385_v35  ;;  %v3192_v62 = vrot.slane %v1934_v23, 2 }
 0x3a8   :  { %v1823_v10 = vpop.f32.mrf.mxu1  ;;  %v3193_v45 = vrot.slane %v1930_v11, 3  ;;  %v7468_v16 = vsel %vm2826_vm8, %v3007_v15, %v3009_v37  ;;  %v1670_v30 = vadd.f32 %v7046_v36, %v6993_v57 }
 0x3a9   :  { %8752 = vst [vmem:[#allocation22_spill] sm:$0xff] %v7468_v16  ;;  %v1824_v7 = vadd.f32 %v1823_v10, %v7226_v29  ;;  %v1933_v50 = vsel %vm1873_vm7, %v1928_v17, %v1932_v43 }
 0x3aa   :  { %5472 = vmatmul.msk.bf16.gmra.mxu2 %vm1981_vm6, %v1933_v50  ;;  %v3194_v40 = vor.u32 %v3193_v45, %v3192_v62  ;;  %v1748_v29 = vadd.f32 %v7247_v9, %v1670_v30  ;;  %v1936_v30 = vor.u32 %v1934_v23, %v1932_v43 }
 0x3ab   :  { %v2381_v49 = vpack.c.bf16 %v1824_v7, %v1821_v39  ;;  %5560 = vmatmul.msk.bf16.gmra.mxu1 %vm1981_vm6, %v7359_v13 }
 0x3ac   :  { %v7478_v21 = vsel %vm3168_vm10, %v3190_v60, %v3194_v40 }
 0x3ad   :  { %8753 = vst [vmem:[#allocation23_spill] sm:$0xff] %v7478_v21  ;;  %v2840_v46 = vrot.slane %v2381_v49, 2  ;;  %v2636_v15 = vshrl.u32 %v2381_v49, 16  ;;  %v2639_v48 = vshll.u32 %v2381_v49, 16  ;;  %v2416_v11 = vrot.slane %v2381_v49, 1 }
 0x3af   :  { %v2841_v17 = vsel %vm2826_vm8, %v2838_v51, %v2840_v46  ;;  %v2638_v10 = vrot.slane %v2636_v15, 1  ;;  %v2641_v62 = vrot.slane %v2639_v48, 2  ;;  %v7483_v39 = vsel %vm820_vm3, %v2414_v44, %v2416_v11 }
 0x3b0   :  { %v1825_v13 = vpop.f32.mrf.mxu1  ;;  %5588 = vmatmul.msk.bf16.gmra.mxu0 %vm1981_vm6, %v2841_v17 }
 0x3b1   :  { %v1826_v57 = vadd.f32 %v1825_v13, %v1748_v29  ;;  %v2642_v36 = vor.u32 %v2641_v62, %v2638_v10 }
 0x3b3   :  { %v1860_v60 = vpack.c.bf16 %v1826_v57, %v1824_v7  ;;  %v7487_v45 = vsel %vm2572_vm9, %v2633_v18, %v2642_v36 }
 0x3b5   :  { %5494 = vmatmul.msk.bf16.gmra.mxu3 %vm1981_vm6, %v1860_v60  ;;  %v1938_v50 = vshll.u32 %v1860_v60, 16  ;;  %v1942_v9 = vshrl.u32 %v1860_v60, 16  ;;  %v2225_v49 = vrot.slane %v1860_v60, 1  ;;  %v3387_v51 = vrot.slane %v1860_v60, 3 }
 0x3b6   :  { %v3011_v15 = vrot.slane %v1860_v60, 2 }
 0x3b7   :  { %v1940_v48 = vrot.slane %v1938_v50, 1  ;;  %v7491_v44 = vsel %vm820_vm3, %v2223_v27, %v2225_v49  ;;  %v7494_v17 = vsel %vm381_vm1, %v3385_v35, %v3387_v51  ;;  %v3196_v29 = vrot.slane %v1942_v9, 2 }
 0x3b8   :  { %v1828_v7 = vpop.f32.mrf.mxu1  ;;  %v2132_v10 = vpop.f32.mrf.mxu3  ;;  %v3197_v18 = vrot.slane %v1938_v50, 3  ;;  %v7497_v62 = vsel %vm2826_vm8, %v3009_v37, %v3011_v15  ;;  %v1675_v27 = vadd.f32 %v7071_v55, %v7013_v38 }
 0x3b9   :  { %8754 = vst [vmem:[#allocation24_spill] sm:$0xff] %v7497_v62  ;;  %v1829_v13 = vadd.f32 %v1828_v7, %v7280_v8  ;;  %v1941_v16 = vsel %vm1873_vm7, %v1936_v30, %v1940_v48 }
 0x3ba   :  { %5473 = vmatmul.msk.bf16.gmra.mxu2 %vm1981_vm6, %v1941_v16  ;;  %v3198_v23 = vor.u32 %v3197_v18, %v3196_v29  ;;  %v1753_v8 = vadd.f32 %v7296_v24, %v1675_v27  ;;  %v1944_v27 = vor.u32 %v1942_v9, %v1940_v48 }
 0x3bb   :  { %v2382_v43 = vpack.c.bf16 %v1829_v13, %v1826_v57  ;;  %5561 = vmatmul.msk.bf16.gmra.mxu1 %vm1981_vm6, %v7392_v3 }
 0x3bc   :  { %v7507_v35 = vsel %vm3168_vm10, %v3194_v40, %v3198_v23 }
 0x3bd   :  { %8755 = vst [vmem:[#allocation25_spill] sm:$0xff] %v7507_v35  ;;  %v2842_v60 = vrot.slane %v2382_v43, 2  ;;  %v2645_v37 = vshrl.u32 %v2382_v43, 16  ;;  %v2648_v50 = vshll.u32 %v2382_v43, 16  ;;  %v2418_v62 = vrot.slane %v2382_v43, 1 }
 0x3bf   :  { %v2843_v30 = vsel %vm2826_vm8, %v2840_v46, %v2842_v60  ;;  %v2647_v16 = vrot.slane %v2645_v37, 1  ;;  %v2650_v29 = vrot.slane %v2648_v50, 2  ;;  %v7512_v57 = vsel %vm820_vm3, %v2416_v11, %v2418_v62 }
 0x3c0   :  { %v1830_v3 = vpop.f32.mrf.mxu1  ;;  %v2134_v7 = vpop.f32.mrf.mxu3  ;;  %5589 = vmatmul.msk.bf16.gmra.mxu0 %vm1981_vm6, %v2843_v30 }
 0x3c1   :  { %v1831_v38 = vadd.f32 %v1830_v3, %v1753_v8  ;;  %v2651_v55 = vor.u32 %v2650_v29, %v2647_v16 }
 0x3c3   :  { %v7515_v40 = vpack.c.bf16 %v1831_v38, %v1829_v13  ;;  %v7518_v18 = vsel %vm2572_vm9, %v2642_v36, %v2651_v55 }
 0x3c5   :  { %5495 = vmatmul.msk.bf16.gmra.mxu3 %vm1981_vm6, %v7515_v40  ;;  %v1946_v24 = vshll.u32 %v7515_v40, 16  ;;  %v1950_v46 = vshrl.u32 %v7515_v40, 16  ;;  %v2227_v11 = vrot.slane %v7515_v40, 1  ;;  %v3389_v43 = vrot.slane %v7515_v40, 3 }
 0x3c6   :  { %v3013_v37 = vrot.slane %v7515_v40, 2 }
 0x3c7   :  { %v1948_v50 = vrot.slane %v1946_v24, 1  ;;  %v7528_v13 = vsel %vm820_vm3, %v2225_v49, %v2227_v11  ;;  %v7531_v36 = vsel %vm381_vm1, %v3387_v51, %v3389_v43  ;;  %v3200_v8 = vrot.slane %v1950_v46, 2 }
 0x3c8   :  { %v1833_v30 = vpop.f32.mrf.mxu1  ;;  %v7533_v16 = vpop.f32.mrf.mxu3  ;;  %v3201_v29 = vrot.slane %v1946_v24, 3  ;;  %v7536_v3 = vsel %vm2826_vm8, %v3011_v15, %v3013_v37  ;;  %v1680_v51 = vadd.f32 %v7098_v4, %v7037_v28  ;;  %v6085_v15 = vld [vmem:[%s8720_s4 + $0x38] sm:$0xff] }
 0x3c9   :  { %8756 = vst [vmem:[#allocation26_spill] sm:$0xff] %v7536_v3  ;;  %v1834_v35 = vadd.f32 %v1833_v30, %v7333_v22  ;;  %v1949_v9 = vsel %vm1873_vm7, %v1944_v27, %v1948_v50  ;;  %2480 = vmatpush.bf16.msra.mxu3 %v6085_v15 }
 0x3ca   :  { %5474 = vmatmul.msk.bf16.gmra.mxu2 %vm1981_vm6, %v1949_v9  ;;  %v3202_v48 = vor.u32 %v3201_v29, %v3200_v8 }
 0x3cb   :  { %v7541_v49 = vpack.c.bf16 %v1834_v35, %v1831_v38  ;;  %5562 = vmatmul.msk.bf16.gmra.mxu1 %vm1981_vm6, %v7426_v41  ;;  %v1758_v41 = vadd.f32 %v7349_v32, %v1680_v51 }
 0x3cc   :  { %v7551_v40 = vsel %vm3168_vm10, %v3198_v23, %v3202_v48 }
 0x3cd   :  { %8757 = vst [vmem:[#allocation27_spill] sm:$0xff] %v7551_v40  ;;  %v2027_v22 = vpop.f32.mrf.mxu2  ;;  %v2844_v24 = vrot.slane %v7541_v49, 2  ;;  %v2654_v27 = vshrl.u32 %v7541_v49, 16  ;;  %v2657_v38 = vshll.u32 %v7541_v49, 16  ;;  %v2420_v8 = vrot.slane %v7541_v49, 1  ;;  %v6084_v49 = vld [vmem:[%s8720_s4 + $0x30] sm:$0xff] }
 0x3ce   :  { %v7558_v30 = vadd.f32 %v2132_v10, %v2027_v22  ;;  %2481 = vmatpush.bf16.msra.mxu3 %v6084_v49 }
 0x3cf   :  { %v2845_v28 = vsel %vm2826_vm8, %v2842_v60, %v2844_v24  ;;  %v2656_v4 = vrot.slane %v2654_v27, 1  ;;  %v2659_v29 = vrot.slane %v2657_v38, 2  ;;  %v7562_v23 = vsel %vm820_vm3, %v2418_v62, %v2420_v8 }
 0x3d0   :  { %v1835_v9 = vpop.f32.mrf.mxu1  ;;  %v2139_v3 = vpop.f32.mrf.mxu3  ;;  %5590 = vmatmul.msk.bf16.gmra.mxu0 %vm1981_vm6, %v2845_v28 }
 0x3d1   :  { %v1836_v40 = vadd.f32 %v1835_v9, %v1758_v41  ;;  %v2660_v32 = vor.u32 %v2659_v29, %v2656_v4  ;;  %v1952_v41 = vor.u32 %v1950_v46, %v1948_v50 }
 0x3d3   :  { %v7568_v10 = vpack.c.bf16 %v1836_v40, %v1834_v35  ;;  %v7571_v60 = vsel %vm2572_vm9, %v2651_v55, %v2660_v32 }
 0x3d5   :  { %v2029_v51 = vpop.f32.mrf.mxu2  ;;  %5496 = vmatmul.msk.bf16.gmra.mxu3 %vm1981_vm6, %v7568_v10  ;;  %v1954_v62 = vshll.u32 %v7568_v10, 16  ;;  %v1958_v15 = vshrl.u32 %v7568_v10, 16  ;;  %v2229_v22 = vrot.slane %v7568_v10, 1  ;;  %v3391_v27 = vrot.slane %v7568_v10, 3 }
 0x3d6   :  { %v7579_v38 = vadd.f32 %v2134_v7, %v2029_v51  ;;  %v3015_v35 = vrot.slane %v7568_v10, 2 }
 0x3d7   :  { %v1956_v28 = vrot.slane %v1954_v62, 1  ;;  %v7583_v55 = vsel %vm820_vm3, %v2227_v11, %v2229_v22  ;;  %v7586_v4 = vsel %vm381_vm1, %v3389_v43, %v3391_v27  ;;  %v3204_v29 = vrot.slane %v1958_v15, 2 }
 0x3d8   :  { %v1838_v9 = vpop.f32.mrf.mxu1  ;;  %v7588_v49 = vpop.f32.mrf.mxu3  ;;  %v3205_v21 = vrot.slane %v1954_v62, 3  ;;  %v7591_v1 = vsel %vm2826_vm8, %v3013_v37, %v3015_v35  ;;  %v1685_v43 = vadd.f32 %v7120_v52, %v7062_v12 }
 0x3d9   :  { %8758 = vst [vmem:[#allocation28_spill] sm:$0xff] %v7591_v1  ;;  %v1839_v7 = vadd.f32 %v1838_v9, %v7372_v25  ;;  %v1957_v46 = vsel %vm1873_vm7, %v1952_v41, %v1956_v28 }
 0x3da   :  { %5475 = vmatmul.msk.bf16.gmra.mxu2 %vm1981_vm6, %v1957_v46  ;;  %v3206_v50 = vor.u32 %v3205_v21, %v3204_v29  ;;  %v6083_v46 = vld [vmem:[%s8720_s4 + $0x28] sm:$0xff] }
 0x3db   :  { %v7596_v11 = vpack.c.bf16 %v1839_v7, %v1836_v40  ;;  %5563 = vmatmul.msk.bf16.gmra.mxu1 %vm1981_vm6, %v7458_v56  ;;  %v1763_v40 = vadd.f32 %v7388_v58, %v1685_v43  ;;  %2287 = vmatpush.bf16.msra.mxu2 %v6083_v46 }
 0x3dc   :  { %v7603_v10 = vsel %vm3168_vm10, %v3202_v48, %v3206_v50 }
 0x3dd   :  { %8759 = vst [vmem:[#allocation29_spill] sm:$0xff] %v7603_v10  ;;  %v2032_v37 = vpop.f32.mrf.mxu2  ;;  %v2846_v51 = vrot.slane %v7596_v11, 2  ;;  %v2663_v25 = vshrl.u32 %v7596_v11, 16  ;;  %v2666_v62 = vshll.u32 %v7596_v11, 16  ;;  %v2422_v21 = vrot.slane %v7596_v11, 1 }
 0x3de   :  { %v7611_v41 = vadd.f32 %v7533_v16, %v2032_v37 }
 0x3df   :  { %v2847_v56 = vsel %vm2826_vm8, %v2844_v24, %v2846_v51  ;;  %v2665_v12 = vrot.slane %v2663_v25, 1  ;;  %v2668_v52 = vrot.slane %v2666_v62, 2  ;;  %v7615_v48 = vsel %vm820_vm3, %v2420_v8, %v2422_v21  ;;  %v6082_v25 = vld [vmem:[%s8720_s4 + $0x20] sm:$0xff] }
 0x3e0   :  { %v1840_v29 = vpop.f32.mrf.mxu1  ;;  %v2144_v9 = vpop.f32.mrf.mxu3  ;;  %5591 = vmatmul.msk.bf16.gmra.mxu0 %vm1981_vm6, %v2847_v56  ;;  %2288 = vmatpush.bf16.msra.mxu2 %v6082_v25 }
 0x3e1   :  { %v1841_v11 = vadd.f32 %v1840_v29, %v1763_v40  ;;  %v2669_v58 = vor.u32 %v2668_v52, %v2665_v12 }
 0x3e3   :  { %v7621_v16 = vpack.c.bf16 %v1841_v11, %v1839_v7  ;;  %v7624_v24 = vsel %vm2572_vm9, %v2660_v32, %v2669_v58  ;;  %v1960_v32 = vor.u32 %v1958_v15, %v1956_v28 }
 0x3e5   :  { %v2034_v43 = vpop.f32.mrf.mxu2  ;;  %5497 = vmatmul.msk.bf16.gmra.mxu3 %vm1981_vm6, %v7621_v16  ;;  %v1962_v8 = vshll.u32 %v7621_v16, 16  ;;  %v1966_v37 = vshrl.u32 %v7621_v16, 16  ;;  %v8732_v62 = vrot.slane %v7621_v16, 1  ;;  %v3393_v7 = vrot.slane %v7621_v16, 3 }
 0x3e6   :  { %v7635_v40 = vadd.f32 %v2139_v3, %v2034_v43  ;;  %v3017_v56 = vrot.slane %v7621_v16, 2 }
 0x3e7   :  { %v1964_v12 = vrot.slane %v1962_v8, 1  ;;  %v7641_v52 = vsel %vm820_vm3, %v2229_v22, %v8732_v62  ;;  %v7644_v29 = vsel %vm381_vm1, %v3391_v27, %v3393_v7  ;;  %v3208_v46 = vrot.slane %v1966_v37, 2  ;;  %v8761_v22 = vld [vmem:[#allocation5_spill] sm:$0xff] }
 0x3e8   :  { %v1843_v1 = vpop.f32.mrf.mxu1  ;;  %v2147_v10 = vpop.f32.mrf.mxu3  ;;  %v3209_v6 = vrot.slane %v1962_v8, 3  ;;  %v7647_v3 = vsel %vm2826_vm8, %v3015_v35, %v3017_v56  ;;  %v1690_v27 = vadd.f32 %v8761_v22, %v7087_v59 }
 0x3e9   :  { %8760 = vst [vmem:[#allocation30_spill] sm:$0xff] %v7647_v3  ;;  %v1844_v15 = vadd.f32 %v1843_v1, %v7405_v53  ;;  %v1965_v28 = vsel %vm1873_vm7, %v1960_v32, %v1964_v12 }
 0x3ea   :  { %5476 = vmatmul.msk.bf16.gmra.mxu2 %vm1981_vm6, %v1965_v28  ;;  %v3210_v43 = vor.u32 %v3209_v6, %v3208_v46 }
 0x3eb   :  { %v7652_v25 = vpack.c.bf16 %v1844_v15, %v1841_v11  ;;  %5564 = vmatmul.msk.bf16.gmra.mxu1 %vm1981_vm6, %v7487_v45  ;;  %v1768_v11 = vadd.f32 %v7422_v42, %v1690_v27  ;;  %v8763_v27 = vld [vmem:[#allocation7_spill] sm:$0xff] }
 0x3ec   :  { %v7659_v8 = vsel %vm3168_vm10, %v3206_v50, %v3210_v43 }
 0x3ed   :  { %8762 = vst [vmem:[#allocation5_spill] sm:$0xff] %v7659_v8  ;;  %v2037_v35 = vpop.f32.mrf.mxu2  ;;  %v2848_v62 = vrot.slane %v7652_v25, 2  ;;  %v2672_v53 = vshrl.u32 %v7652_v25, 16  ;;  %v2675_v1 = vshll.u32 %v7652_v25, 16  ;;  %v8733_v6 = vrot.slane %v7652_v25, 1 }
 0x3ee   :  { %v7667_v32 = vadd.f32 %v7588_v49, %v2037_v35 }
 0x3ef   :  { %v2849_v45 = vsel %vm2826_vm8, %v2846_v51, %v2848_v62  ;;  %v2674_v59 = vrot.slane %v2672_v53, 1  ;;  %v2677_v46 = vrot.slane %v2675_v1, 2  ;;  %v7673_v50 = vsel %vm820_vm3, %v2422_v21, %v8733_v6 }
 0x3f0   :  { %v1845_v28 = vpop.f32.mrf.mxu1  ;;  %v2149_v22 = vpop.f32.mrf.mxu3  ;;  %5592 = vmatmul.msk.bf16.gmra.mxu0 %vm1981_vm6, %v2849_v45 }
 0x3f1   :  { %v1846_v3 = vadd.f32 %v1845_v28, %v1768_v11  ;;  %v7676_v8 = vor.u32 %v2677_v46, %v2674_v59  ;;  %v1968_v28 = vor.u32 %v1966_v37, %v1964_v12 }
 0x3f3   :  { %v7678_v42 = vpack.c.bf16 %v1846_v3, %v1844_v15  ;;  %v2679_v49 = vsel %vm2572_vm9, %v2669_v58, %v7676_v8 }
 0x3f5   :  { %v2039_v51 = vpop.f32.mrf.mxu2  ;;  %5534 = vmatmul.msk.bf16.vlgmr.msra.gmra.mxu3 %vm1981_vm6, %v8763_v27  ;;  %v3395_v35 = vrot.slane %v7678_v42, 3  ;;  %v3213_v21 = vshrl.u32 %v7678_v42, 16  ;;  %v3216_v53 = vshll.u32 %v7678_v42, 16  ;;  %v8734_v1 = vrot.slane %v7678_v42, 2 }
 0x3f6   :  { %v7688_v11 = vadd.f32 %v2144_v9, %v2039_v51 }
 0x3f7   :  { %v7691_v3 = vsel %vm381_vm1, %v3393_v7, %v3395_v35  ;;  %v3215_v15 = vrot.slane %v3213_v21, 2  ;;  %v3218_v45 = vrot.slane %v3216_v53, 3  ;;  %v7696_v58 = vsel %vm2826_vm8, %v3017_v56, %v8734_v1 }
 0x3f8   :  { %v1848_v59 = vpop.f32.mrf.mxu1  ;;  %v2152_v46 = vpop.f32.mrf.mxu3 }
 0x3f9   :  { %v1849_v27 = vadd.f32 %v1848_v59, %v7439_v14  ;;  %v3219_v6 = vor.u32 %v3218_v45, %v3215_v15 }
 0x3fa   :  { %5477 = vmatmul.msk.bf16.gmra.mxu2 %vm1981_vm6, %v1968_v28 }
 0x3fb   :  { %v3162_v9 = vpack.c.bf16 %v1849_v27, %v1849_v27  ;;  %5565 = vmatmul.msk.bf16.gmra.mxu1 %vm1981_vm6, %v7518_v18  ;;  %v7703_v7 = vsel %vm3168_vm10, %v3210_v43, %v3219_v6 }
 0x3fd   :  { %v3222_v51 = vshll.u32 %v3162_v9, 16  ;;  %v3397_v21 = vrot.slane %v3162_v9, 3  ;;  %v2042_v53 = vpop.f32.mrf.mxu2 }
 0x3fe   :  { %v7705_v56 = vadd.f32 %v2147_v10, %v2042_v53  ;;  %v8764_v10 = vld [vmem:[#allocation6_spill] sm:$0xff] }
 0x3ff   :  { %v3224_v1 = vrot.slane %v3222_v51, 3  ;;  %v7708_v37 = vsel %vm381_vm1, %v3395_v35, %v3397_v21  ;;  %v6095_v51 = vld [vmem:[%s8720_s4 + $0x88] sm:$0xff] }
 0x400   :  { %v1850_v14 = vpop.f32.mrf.mxu1  ;;  %v2154_v12 = vpop.f32.mrf.mxu3  ;;  %5593 = vmatmul.msk.bf16.gmra.mxu0 %vm1981_vm6, %v2848_v62  ;;  %3453 = vmatpush.bf16.msrb.mxu1 %v6095_v51 }
 0x401   :  { %v7712_v15 = vsel %vm3168_vm10, %v3219_v6, %v3224_v1  ;;  %v8765_v1 = vld [vmem:[#allocation8_spill] sm:$0xff] }
 0x405   :  { %v2044_v18 = vpop.f32.mrf.mxu2  ;;  %5535 = vmatmul.msk.bf16.gmra.mxu3 %vm1981_vm6, %v7294_v5 }
 0x406   :  { %v7716_v43 = vadd.f32 %v2149_v22, %v2044_v18 }
 0x408   :  { %v2157_v45 = vpop.f32.mrf.mxu3  ;;  %v7724_v28 = vpop.f32.mrf.mxu1 }
 0x40a   :  { %5510 = vmatmul.msk.bf16.vlgmr.msra.gmra.mxu2 %vm1981_vm6, %v8764_v10 }
 0x40b   :  { %5566 = vmatmul.msk.bf16.gmra.mxu1 %vm1981_vm6, %v7571_v60 }
 0x40d   :  { %v2047_v35 = vpop.f32.mrf.mxu2 }
 0x40e   :  { %v7722_v59 = vadd.f32 %v2152_v46, %v2047_v35 }
 0x410   :  { %v2159_v62 = vpop.f32.mrf.mxu3  ;;  %v7736_v46 = vpop.f32.mrf.mxu1 }
 0x415   :  { %v2049_v6 = vpop.f32.mrf.mxu2  ;;  %5536 = vmatmul.msk.bf16.gmra.mxu3 %vm1981_vm6, %v7347_v19 }
 0x416   :  { %v7728_v5 = vadd.f32 %v2154_v12, %v2049_v6  ;;  %v8766_v12 = vld [vmem:[#allocation12_spill] sm:$0xff] }
 0x418   :  { %v2162_v22 = vpop.f32.mrf.mxu3  ;;  %v7748_v14 = vpop.f32.mrf.mxu1 }
 0x41a   :  { %5511 = vmatmul.msk.bf16.gmra.mxu2 %vm1981_vm6, %v8765_v1 }
 0x41b   :  { %5567 = vmatmul.msk.bf16.gmra.mxu1 %vm1981_vm6, %v7624_v24  ;;  %v6094_v24 = vld [vmem:[%s8720_s4 + $0x80] sm:$0xff] }
 0x41c   :  { %3454 = vmatpush.bf16.msrb.mxu1 %v6094_v24 }
 0x41d   :  { %v2052_v60 = vpop.f32.mrf.mxu2 }
 0x41e   :  { %v7734_v27 = vadd.f32 %v2157_v45, %v2052_v60 }
 0x420   :  { %v2164_v9 = vpop.f32.mrf.mxu3 }
 0x425   :  { %v2054_v19 = vpop.f32.mrf.mxu2  ;;  %5537 = vmatmul.msk.bf16.gmra.mxu3 %vm1981_vm6, %v7386_v2  ;;  %v7755_v2 = vpop.f32.mrf.mxu1 }
 0x426   :  { %v7743_v21 = vadd.f32 %v2159_v62, %v2054_v19 }
 0x428   :  { %v2167_v53 = vpop.f32.mrf.mxu3 }
 0x42a   :  { %5512 = vmatmul.msk.bf16.gmra.mxu2 %vm1981_vm6, %v8766_v12 }
 0x42b   :  { %5568 = vmatmul.msk.bf16.gmra.mxu1 %vm1981_vm6, %v2679_v49 }
 0x42d   :  { %v2057_v18 = vpop.f32.mrf.mxu2  ;;  %v7765_v49 = vpop.f32.mrf.mxu1 }
 0x42e   :  { %v7753_v45 = vadd.f32 %v2162_v22, %v2057_v18 }
 0x430   :  { %v2169_v10 = vpop.f32.mrf.mxu3 }
 0x435   :  { %v2059_v35 = vpop.f32.mrf.mxu2  ;;  %5538 = vmatmul.msk.bf16.gmra.mxu3 %vm1981_vm6, %v7420_v61 }
 0x436   :  { %v7759_v62 = vadd.f32 %v2164_v9, %v2059_v35  ;;  %v7773_v9 = vpop.f32.mrf.mxu1  ;;  %v8768_v35 = vld [vmem:[#allocation13_spill] sm:$0xff] }
 0x438   :  { %v2172_v6 = vpop.f32.mrf.mxu3 }
 0x43a   :  { %5513 = vmatmul.msk.bf16.gmra.mxu2 %vm1981_vm6, %v7363_v33  ;;  %v8767_v33 = vld [vmem:[#allocation9_spill] sm:$0xff] }
 0x43b   :  { %5569 = vmatmul.msk.bf16.gmra.mxu1 %vm1981_vm6, %v7676_v8 }
 0x43d   :  { %v2062_v22 = vpop.f32.mrf.mxu2 }
 0x43e   :  { %v7767_v1 = vadd.f32 %v2167_v53, %v2062_v22  ;;  %v7781_v12 = vpop.f32.mrf.mxu1 }
 0x440   :  { %v2174_v60 = vpop.f32.mrf.mxu3 }
 0x445   :  { %v2064_v51 = vpop.f32.mrf.mxu2  ;;  %5539 = vmatmul.msk.bf16.gmra.mxu3 %vm1981_vm6, %v7454_v31 }
 0x446   :  { %v7771_v61 = vadd.f32 %v2169_v10, %v2064_v51 }
 0x448   :  { %v2177_v19 = vpop.f32.mrf.mxu3 }
 0x44a   :  { %5514 = vmatmul.msk.bf16.gmra.mxu2 %vm1981_vm6, %v7396_v34  ;;  %v7789_v34 = vpop.f32.mrf.mxu1 }
 0x44b   :  { %5654 = vmatmul.msk.bf16.vlgmr.msrb.gmra.mxu1 %vm1981_vm6, %v8767_v33 }
 0x44d   :  { %v2067_v8 = vpop.f32.mrf.mxu2 }
 0x44e   :  { %v7779_v24 = vadd.f32 %v2172_v6, %v2067_v8 }
 0x450   :  { %v2179_v53 = vpop.f32.mrf.mxu3 }
 0x452   :  { %v7795_v33 = vpop.f32.mrf.mxu1 }
 0x455   :  { %v2069_v18 = vpop.f32.mrf.mxu2  ;;  %5540 = vmatmul.msk.bf16.gmra.mxu3 %vm1981_vm6, %v7483_v39 }
 0x456   :  { %v7785_v31 = vadd.f32 %v2174_v60, %v2069_v18 }
 0x458   :  { %v2182_v10 = vpop.f32.mrf.mxu3 }
 0x45a   :  { %5515 = vmatmul.msk.bf16.gmra.mxu2 %vm1981_vm6, %v7430_v0 }
 0x45b   :  { %5655 = vmatmul.msk.bf16.gmra.mxu1 %vm1981_vm6, %v8768_v35 }
 0x45d   :  { %v2072_v6 = vpop.f32.mrf.mxu2 }
 0x45e   :  { %v7793_v22 = vadd.f32 %v2177_v19, %v2072_v6  ;;  %v7807_v19 = vpop.f32.mrf.mxu1 }
 0x45f   :  { %8769 = vst [vmem:[#allocation7_spill] sm:$0xff] %v7807_v19 }
 0x460   :  { %v2184_v51 = vpop.f32.mrf.mxu3 }
 0x465   :  { %v2074_v8 = vpop.f32.mrf.mxu2  ;;  %5541 = vmatmul.msk.bf16.gmra.mxu3 %vm1981_vm6, %v7512_v57 }
 0x466   :  { %v7799_v39 = vadd.f32 %v2179_v53, %v2074_v8  ;;  %v7813_v8 = vpop.f32.mrf.mxu1 }
 0x468   :  { %v2187_v60 = vpop.f32.mrf.mxu3 }
 0x46a   :  { %5516 = vmatmul.msk.bf16.gmra.mxu2 %vm1981_vm6, %v7462_v26 }
 0x46b   :  { %5656 = vmatmul.msk.bf16.gmra.mxu1 %vm1981_vm6, %v7366_v20 }
 0x46d   :  { %v2077_v0 = vpop.f32.mrf.mxu2 }
 0x46e   :  { %v7805_v18 = vadd.f32 %v2182_v10, %v2077_v0  ;;  %v7821_v0 = vpop.f32.mrf.mxu1 }
 0x470   :  { %v2189_v35 = vpop.f32.mrf.mxu3 }
 0x475   :  { %v2079_v6 = vpop.f32.mrf.mxu2  ;;  %5542 = vmatmul.msk.bf16.gmra.mxu3 %vm1981_vm6, %v7562_v23 }
 0x476   :  { %v7811_v57 = vadd.f32 %v2184_v51, %v2079_v6 }
 0x478   :  { %v2483_v53 = vpop.f32.mrf.mxu3 }
 0x47a   :  { %5517 = vmatmul.msk.bf16.gmra.mxu2 %vm1981_vm6, %v7491_v44 }
 0x47b   :  { %5657 = vmatmul.msk.bf16.gmra.mxu1 %vm1981_vm6, %v7399_v63  ;;  %v7831_v63 = vpop.f32.mrf.mxu1 }
 0x47c   :  { %8770 = vst [vmem:[#allocation6_spill] sm:$0xff] %v7831_v63 }
 0x47d   :  { %v2082_v20 = vpop.f32.mrf.mxu2 }
 0x47e   :  { %v7819_v26 = vadd.f32 %v2187_v60, %v2082_v20  ;;  %v6093_v60 = vld [vmem:[%s8720_s4 + $0x78] sm:$0xff] }
 0x47f   :  { %3280 = vmatpush.bf16.msrb.mxu3 %v6093_v60 }
 0x480   :  { %v2485_v10 = vpop.f32.mrf.mxu3 }
 0x483   :  { %v7845_v20 = vpop.f32.mrf.mxu1 }
 0x485   :  { %v2084_v19 = vpop.f32.mrf.mxu2  ;;  %5543 = vmatmul.msk.bf16.gmra.mxu3 %vm1981_vm6, %v7615_v48 }
 0x486   :  { %v7825_v23 = vadd.f32 %v2189_v35, %v2084_v19 }
 0x488   :  { %v2488_v51 = vpop.f32.mrf.mxu3 }
 0x48a   :  { %5518 = vmatmul.msk.bf16.gmra.mxu2 %vm1981_vm6, %v7528_v13  ;;  %v6092_v13 = vld [vmem:[%s8720_s4 + $0x70] sm:$0xff] }
 0x48b   :  { %5658 = vmatmul.msk.bf16.gmra.mxu1 %vm1981_vm6, %v7433_v47  ;;  %3281 = vmatpush.bf16.msrb.mxu3 %v6092_v13  ;;  %v8771_v13 = vrot.slane %v7652_v25, 1 }
 0x48d   :  { %v2290_v44 = vpop.f32.mrf.mxu2 }
 0x48e   :  { %v2350_v6 = vadd.f32 %v2290_v44, %v7558_v30 }
 0x490   :  { %v7837_v48 = vadd.f32 %v2483_v53, %v2350_v6  ;;  %v2490_v19 = vpop.f32.mrf.mxu3 }
 0x495   :  { %v2292_v35 = vpop.f32.mrf.mxu2  ;;  %5544 = vmatmul.msk.bf16.gmra.mxu3 %vm1981_vm6, %v7673_v50  ;;  %v7859_v50 = vpop.f32.mrf.mxu1 }
 0x496   :  { %v2351_v47 = vadd.f32 %v2292_v35, %v7579_v38  ;;  %v6091_v38 = vld [vmem:[%s8720_s4 + $0x68] sm:$0xff] }
 0x497   :  { %3075 = vmatpush.bf16.msrb.mxu2 %v6091_v38  ;;  %v8772_v38 = vld [vmem:[#allocation11_spill] sm:$0xff] }
 0x498   :  { %v7847_v63 = vadd.f32 %v2485_v10, %v2351_v47  ;;  %v2493_v30 = vpop.f32.mrf.mxu3 }
 0x49a   :  { %5519 = vmatmul.msk.bf16.gmra.mxu2 %vm1981_vm6, %v7583_v55  ;;  %v6090_v55 = vld [vmem:[%s8720_s4 + $0x60] sm:$0xff] }
 0x49b   :  { %5659 = vmatmul.msk.bf16.gmra.mxu1 %vm1981_vm6, %v7465_v54  ;;  %3076 = vmatpush.bf16.msrb.mxu2 %v6090_v55 }
 0x49d   :  { %v2295_v53 = vpop.f32.mrf.mxu2  ;;  %v7872_v35 = vpop.f32.mrf.mxu1 }
 0x49e   :  { %v2352_v44 = vadd.f32 %v2295_v53, %v7611_v41 }
 0x4a0   :  { %v7854_v60 = vadd.f32 %v2488_v51, %v2352_v44  ;;  %v2495_v6 = vpop.f32.mrf.mxu3 }
 0x4a5   :  { %v2297_v10 = vpop.f32.mrf.mxu2  ;;  %5545 = vmatmul.msk.bf16.gmra.mxu3 %vm1981_vm6, %v8771_v13  ;;  %v7879_v44 = vpop.f32.mrf.mxu1 }
 0x4a6   :  { %v2353_v54 = vadd.f32 %v2297_v10, %v7635_v40 }
 0x4a8   :  { %v7868_v41 = vadd.f32 %v2490_v19, %v2353_v54  ;;  %v2498_v51 = vpop.f32.mrf.mxu3  ;;  %v8773_v54 = vrot.slane %v7621_v16, 1 }
 0x4aa   :  { %5520 = vmatmul.msk.bf16.gmra.mxu2 %vm1981_vm6, %v7641_v52 }
 0x4ab   :  { %5660 = vmatmul.msk.bf16.gmra.mxu1 %vm1981_vm6, %v7494_v17 }
 0x4ad   :  { %v2300_v25 = vpop.f32.mrf.mxu2 }
 0x4ae   :  { %v2354_v47 = vadd.f32 %v2300_v25, %v7667_v32 }
 0x4b0   :  { %v7877_v40 = vadd.f32 %v2493_v30, %v2354_v47  ;;  %v2500_v53 = vpop.f32.mrf.mxu3  ;;  %v7892_v30 = vpop.f32.mrf.mxu1 }
 0x4b5   :  { %v2302_v19 = vpop.f32.mrf.mxu2  ;;  %5630 = vmatmul.msk.bf16.vlgmr.msrb.gmra.mxu3 %vm1981_vm6, %v8772_v38 }
 0x4b6   :  { %v2355_v10 = vadd.f32 %v2302_v19, %v7688_v11  ;;  %v8774_v11 = vld [vmem:[#allocation15_spill] sm:$0xff] }
 0x4b8   :  { %v7884_v52 = vadd.f32 %v2495_v6, %v2355_v10  ;;  %v2503_v13 = vpop.f32.mrf.mxu3  ;;  %v7901_v38 = vpop.f32.mrf.mxu1 }
 0x4b9   :  { %8775 = vst [vmem:[#allocation8_spill] sm:$0xff] %v7901_v38  ;;  %v8797_v38 = vld [vmem:[#allocation29_spill] sm:$0xff] }
 0x4ba   :  { %5521 = vmatmul.msk.bf16.gmra.mxu2 %vm1981_vm6, %v8773_v54 }
 0x4bb   :  { %5661 = vmatmul.msk.bf16.gmra.mxu1 %vm1981_vm6, %v7531_v36  ;;  %v8776_v36 = vld [vmem:[#allocation10_spill] sm:$0xff] }
 0x4bd   :  { %v2305_v17 = vpop.f32.mrf.mxu2 }
 0x4be   :  { %v2356_v32 = vadd.f32 %v2305_v17, %v7705_v56 }
 0x4c0   :  { %v7894_v55 = vadd.f32 %v2498_v51, %v2356_v32  ;;  %v2505_v25 = vpop.f32.mrf.mxu3  ;;  %v7910_v17 = vpop.f32.mrf.mxu1 }
 0x4c1   :  { %8777 = vst [vmem:[#allocation12_spill] sm:$0xff] %v7910_v17 }
 0x4c5   :  { %v2307_v47 = vpop.f32.mrf.mxu2  ;;  %5631 = vmatmul.msk.bf16.gmra.mxu3 %vm1981_vm6, %v8774_v11 }
 0x4c6   :  { %v2357_v6 = vadd.f32 %v2307_v47, %v7716_v43 }
 0x4c8   :  { %v7899_v16 = vadd.f32 %v2500_v53, %v2357_v6  ;;  %v2508_v19 = vpop.f32.mrf.mxu3  ;;  %v8778_v53 = vld [vmem:[#allocation17_spill] sm:$0xff]  ;;  %v8779_v6 = vld [vmem:[#allocation14_spill] sm:$0xff] }
 0x4ca   :  { %5606 = vmatmul.msk.bf16.vlgmr.msrb.gmra.mxu2 %vm1981_vm6, %v8776_v36 }
 0x4cb   :  { %5662 = vmatmul.msk.bf16.gmra.mxu1 %vm1981_vm6, %v7586_v4  ;;  %v7921_v4 = vpop.f32.mrf.mxu1 }
 0x4cc   :  { %8780 = vst [vmem:[#allocation9_spill] sm:$0xff] %v7921_v4 }
 0x4cd   :  { %v2310_v56 = vpop.f32.mrf.mxu2 }
 0x4ce   :  { %v2358_v51 = vadd.f32 %v2310_v56, %v7722_v59 }
 0x4d0   :  { %v7908_v10 = vadd.f32 %v2503_v13, %v2358_v51  ;;  %v2510_v54 = vpop.f32.mrf.mxu3 }
 0x4d5   :  { %v2312_v43 = vpop.f32.mrf.mxu2  ;;  %5632 = vmatmul.msk.bf16.gmra.mxu3 %vm1981_vm6, %v8778_v53  ;;  %v8781_v53 = vld [vmem:[#allocation19_spill] sm:$0xff] }
 0x4d6   :  { %v2359_v32 = vadd.f32 %v2312_v43, %v7728_v5 }
 0x4d8   :  { %v7915_v47 = vadd.f32 %v2505_v25, %v2359_v32  ;;  %v2513_v11 = vpop.f32.mrf.mxu3  ;;  %v7929_v25 = vpop.f32.mrf.mxu1 }
 0x4d9   :  { %8782 = vst [vmem:[#allocation13_spill] sm:$0xff] %v7929_v25  ;;  %v8793_v25 = vld [vmem:[#allocation27_spill] sm:$0xff] }
 0x4da   :  { %5607 = vmatmul.msk.bf16.gmra.mxu2 %vm1981_vm6, %v8779_v6 }
 0x4db   :  { %5663 = vmatmul.msk.bf16.gmra.mxu1 %vm1981_vm6, %v7644_v29  ;;  %v8783_v29 = vld [vmem:[#allocation16_spill] sm:$0xff] }
 0x4dd   :  { %v2315_v59 = vpop.f32.mrf.mxu2 }
 0x4de   :  { %v2360_v13 = vadd.f32 %v2315_v59, %v7734_v27 }
 0x4e0   :  { %v7924_v36 = vadd.f32 %v2508_v19, %v2360_v13  ;;  %v2515_v56 = vpop.f32.mrf.mxu3  ;;  %v7940_v13 = vpop.f32.mrf.mxu1 }
 0x4e1   :  { %8784 = vst [vmem:[#allocation11_spill] sm:$0xff] %v7940_v13  ;;  %v8788_v13 = vld [vmem:[#allocation23_spill] sm:$0xff] }
 0x4e5   :  { %v2317_v51 = vpop.f32.mrf.mxu2  ;;  %5633 = vmatmul.msk.bf16.gmra.mxu3 %vm1981_vm6, %v8781_v53 }
 0x4e6   :  { %v2361_v5 = vadd.f32 %v2317_v51, %v7743_v21  ;;  %v8785_v51 = vld [vmem:[#allocation21_spill] sm:$0xff] }
 0x4e8   :  { %v7931_v43 = vadd.f32 %v2510_v54, %v2361_v5  ;;  %v2518_v32 = vpop.f32.mrf.mxu3 }
 0x4ea   :  { %5608 = vmatmul.msk.bf16.gmra.mxu2 %vm1981_vm6, %v8783_v29  ;;  %v8786_v29 = vld [vmem:[#allocation18_spill] sm:$0xff] }
 0x4eb   :  { %5664 = vmatmul.msk.bf16.gmra.mxu1 %vm1981_vm6, %v7691_v3  ;;  %v7949_v3 = vpop.f32.mrf.mxu1 }
 0x4ec   :  { %8787 = vst [vmem:[#allocation15_spill] sm:$0xff] %v7949_v3 }
 0x4ed   :  { %v2320_v27 = vpop.f32.mrf.mxu2 }
 0x4ee   :  { %v2362_v19 = vadd.f32 %v2320_v27, %v7753_v45 }
 0x4f0   :  { %v7938_v6 = vadd.f32 %v2513_v11, %v2362_v19  ;;  %v2520_v59 = vpop.f32.mrf.mxu3 }
 0x4f5   :  { %v2322_v21 = vpop.f32.mrf.mxu2  ;;  %5634 = vmatmul.msk.bf16.gmra.mxu3 %vm1981_vm6, %v8785_v51 }
 0x4f6   :  { %v2363_v54 = vadd.f32 %v2322_v21, %v7759_v62 }
 0x4f8   :  { %v7945_v53 = vadd.f32 %v2515_v56, %v2363_v54  ;;  %v2523_v5 = vpop.f32.mrf.mxu3  ;;  %v8789_v54 = vld [vmem:[#allocation20_spill] sm:$0xff] }
 0x4fa   :  { %5609 = vmatmul.msk.bf16.gmra.mxu2 %vm1981_vm6, %v8786_v29 }
 0x4fb   :  { %5665 = vmatmul.msk.bf16.gmra.mxu1 %vm1981_vm6, %v7708_v37 }
 0x4fd   :  { %v2325_v45 = vpop.f32.mrf.mxu2 }
 0x4fe   :  { %v2364_v11 = vadd.f32 %v2325_v45, %v7767_v1  ;;  %v8790_v45 = vld [vmem:[#allocation25_spill] sm:$0xff] }
 0x500   :  { %v7954_v27 = vadd.f32 %v2518_v32, %v2364_v11  ;;  %v2525_v19 = vpop.f32.mrf.mxu3 }
 0x505   :  { %v2327_v51 = vpop.f32.mrf.mxu2  ;;  %5635 = vmatmul.msk.bf16.gmra.mxu3 %vm1981_vm6, %v8788_v13 }
 0x506   :  { %v2365_v62 = vadd.f32 %v2327_v51, %v7771_v61  ;;  %v2907_v51 = vpop.f32.mrf.mxu0 }
 0x508   :  { %v7959_v56 = vadd.f32 %v2520_v59, %v2365_v62  ;;  %v2528_v21 = vpop.f32.mrf.mxu3  ;;  %v8791_v59 = vld [vmem:[#allocation22_spill] sm:$0xff] }
 0x50a   :  { %5610 = vmatmul.msk.bf16.gmra.mxu2 %vm1981_vm6, %v8789_v54 }
 0x50d   :  { %v2330_v29 = vpop.f32.mrf.mxu2 }
 0x50e   :  { %v2366_v37 = vadd.f32 %v2330_v29, %v7779_v24  ;;  %v3456_v29 = vpop.f32.mrf.mxu1 }
 0x510   :  { %v7964_v3 = vadd.f32 %v2523_v5, %v2366_v37  ;;  %v2530_v1 = vpop.f32.mrf.mxu3 }
 0x515   :  { %v2332_v32 = vpop.f32.mrf.mxu2  ;;  %5636 = vmatmul.msk.bf16.gmra.mxu3 %vm1981_vm6, %v8790_v45 }
 0x516   :  { %v2367_v13 = vadd.f32 %v2332_v32, %v7785_v31 }
 0x518   :  { %v7969_v11 = vadd.f32 %v2525_v19, %v2367_v13  ;;  %v2533_v61 = vpop.f32.mrf.mxu3  ;;  %v2909_v19 = vpop.f32.mrf.mxu0  ;;  %v8795_v13 = vld [vmem:[#allocation24_spill] sm:$0xff] }
 0x51a   :  { %5611 = vmatmul.msk.bf16.gmra.mxu2 %vm1981_vm6, %v8791_v59  ;;  %v3458_v59 = vpop.f32.mrf.mxu1 }
 0x51d   :  { %v2335_v62 = vpop.f32.mrf.mxu2 }
 0x51e   :  { %v2368_v54 = vadd.f32 %v2335_v62, %v7793_v22 }
 0x520   :  { %v7974_v24 = vadd.f32 %v2528_v21, %v2368_v54  ;;  %v2535_v5 = vpop.f32.mrf.mxu3  ;;  %v2912_v54 = vpop.f32.mrf.mxu0 }
 0x522   :  { %8792 = vst [vmem:[#allocation10_spill] sm:$0xff] %v7974_v24  ;;  %v8801_v24 = vld [vmem:[#allocation5_spill] sm:$0xff] }
 0x525   :  { %v2337_v37 = vpop.f32.mrf.mxu2  ;;  %5637 = vmatmul.msk.bf16.gmra.mxu3 %vm1981_vm6, %v8793_v25  ;;  %v3461_v25 = vpop.f32.mrf.mxu1 }
 0x526   :  { %v2369_v31 = vadd.f32 %v2337_v37, %v7799_v39 }
 0x528   :  { %v7979_v32 = vadd.f32 %v2530_v1, %v2369_v31  ;;  %v2538_v45 = vpop.f32.mrf.mxu3  ;;  %v8799_v31 = vld [vmem:[#allocation26_spill] sm:$0xff] }
 0x52a   :  { %8794 = vst [vmem:[#allocation17_spill] sm:$0xff] %v7979_v32  ;;  %5612 = vmatmul.msk.bf16.gmra.mxu2 %vm1981_vm6, %v8795_v13  ;;  %v2914_v13 = vpop.f32.mrf.mxu0 }
 0x52d   :  { %v2340_v4 = vpop.f32.mrf.mxu2 }
 0x52e   :  { %v2370_v22 = vadd.f32 %v2340_v4, %v7805_v18 }
 0x530   :  { %v7984_v21 = vadd.f32 %v2533_v61, %v2370_v22  ;;  %v2540_v62 = vpop.f32.mrf.mxu3  ;;  %v3463_v22 = vpop.f32.mrf.mxu1 }
 0x532   :  { %8796 = vst [vmem:[#allocation14_spill] sm:$0xff] %v7984_v21  ;;  %v7996_v21 = vpop.f32.mrf.mxu0 }
 0x535   :  { %v2342_v17 = vpop.f32.mrf.mxu2  ;;  %5638 = vmatmul.msk.bf16.gmra.mxu3 %vm1981_vm6, %v8797_v38 }
 0x536   :  { %v2371_v39 = vadd.f32 %v2342_v17, %v7811_v57 }
 0x538   :  { %v7989_v1 = vadd.f32 %v2535_v5, %v2371_v39  ;;  %v3283_v37 = vpop.f32.mrf.mxu3  ;;  %v2797_v39 = vadd.f32 %v7724_v28, %v7837_v48  ;;  %v8016_v28 = vld [vmem:[%s8721_s5] ss:$0 sm:$0xff] }
 0x53a   :  { %8798 = vst [vmem:[#allocation19_spill] sm:$0xff] %v7989_v1  ;;  %5613 = vmatmul.msk.bf16.gmra.mxu2 %vm1981_vm6, %v8799_v31  ;;  %v8802_v31 = vld [vmem:[#allocation28_spill] sm:$0xff] }
 0x53d   :  { %v2345_v32 = vpop.f32.mrf.mxu2 }
 0x53e   :  { %v2372_v18 = vadd.f32 %v2345_v32, %v7819_v26  ;;  %v8007_v26 = vpop.f32.mrf.mxu1  ;;  %v2967_v32 = vadd.f32 %v2907_v51, %v2797_v39 }
 0x540   :  { %v7994_v4 = vadd.f32 %v2538_v45, %v2372_v18  ;;  %v3285_v61 = vpop.f32.mrf.mxu3 }
 0x542   :  { %8800 = vst [vmem:[#allocation16_spill] sm:$0xff] %v7994_v4  ;;  %v8009_v4 = vpop.f32.mrf.mxu0 }
 0x545   :  { %v2347_v38 = vpop.f32.mrf.mxu2  ;;  %5639 = vmatmul.msk.bf16.gmra.mxu3 %vm1981_vm6, %v8801_v24 }
 0x546   :  { %v2373_v57 = vadd.f32 %v2347_v38, %v7825_v23  ;;  %v2798_v23 = vadd.f32 %v7736_v46, %v7847_v63  ;;  %v8018_v38 = vpop.f32.mrf.mxu1 }
 0x548   :  { %v8001_v17 = vadd.f32 %v2540_v62, %v2373_v57  ;;  %v3288_v5 = vpop.f32.mrf.mxu3  ;;  %v2968_v48 = vadd.f32 %v2909_v19, %v2798_v23 }
 0x54a   :  { %5614 = vmatmul.msk.bf16.gmra.mxu2 %vm1981_vm6, %v8802_v31  ;;  %v8030_v19 = vpop.f32.mrf.mxu0 }
 0x54d   :  { %v3078_v45 = vpop.f32.mrf.mxu2 }
 0x54e   :  { %v3138_v18 = vadd.f32 %v3078_v45, %v2967_v32  ;;  %v8803_v32 = vld [vmem:[#allocation30_spill] sm:$0xff] }
 0x550   :  { %v3343_v1 = vadd.f32 %v3283_v37, %v3138_v18  ;;  %v3290_v24 = vpop.f32.mrf.mxu3  ;;  %v8026_v37 = vld [vmem:[%s8722_s6] ss:$0 sm:$0xff] }
 0x552   :  { %v3516_v62 = vadd.f32 %v3456_v29, %v3343_v1  ;;  %v2799_v1 = vadd.f32 %v7748_v14, %v7854_v60  ;;  %v2800_v60 = vadd.f32 %v7755_v2, %v7868_v41 }
 0x554   :  { %v3544_v51 = vmul.f32 %v8016_v28, %v3516_v62  ;;  %v2969_v45 = vadd.f32 %v2912_v54, %v2799_v1  ;;  %v2970_v1 = vadd.f32 %v2914_v13, %v2800_v60 }
 0x555   :  { %v3080_v57 = vpop.f32.mrf.mxu2  ;;  %5640 = vmatmul.msk.bf16.gmra.mxu3 %vm1981_vm6, %v7703_v7 }
 0x556   :  { %v3139_v46 = vadd.f32 %v3080_v57, %v2968_v48  ;;  %v3572_v39 = vadd.f32 %v8026_v37, %v3544_v51  ;;  %v8037_v48 = vpop.f32.mrf.mxu1 }
 0x558   :  { %v3344_v63 = vadd.f32 %v3285_v61, %v3139_v46  ;;  %v3293_v29 = vpop.f32.mrf.mxu3  ;;  %v3596_v23 = vmax.f32 %v3572_v39, 0.0 }
 0x55a   :  { %v3517_v31 = vadd.f32 %v3458_v59, %v3344_v63  ;;  %5615 = vmatmul.msk.bf16.gmra.mxu2 %vm1981_vm6, %v8803_v32  ;;  %v3644_v59 = vrot.slane %v3596_v23, 1  ;;  %v8041_v32 = vpop.f32.mrf.mxu0 }
 0x55c   :  { %v3545_v7 = vmul.f32 %v8016_v28, %v3517_v31 }
 0x55d   :  { %v3083_v18 = vpop.f32.mrf.mxu2 }
 0x55e   :  { %v3573_v62 = vadd.f32 %v8026_v37, %v3545_v7  ;;  %v3140_v61 = vadd.f32 %v3083_v18, %v2969_v45  ;;  %v2801_v18 = vadd.f32 %v7765_v49, %v7877_v40 }
 0x560   :  { %v3345_v57 = vadd.f32 %v3288_v5, %v3140_v61  ;;  %v3295_v14 = vpop.f32.mrf.mxu3  ;;  %v3597_v51 = vmax.f32 %v3573_v62, 0.0  ;;  %v8052_v62 = vpop.f32.mrf.mxu1 }
 0x562   :  { %v3518_v46 = vadd.f32 %v3461_v25, %v3345_v57  ;;  %v3645_v63 = vrot.slane %v3597_v51, 1  ;;  %v8059_v60 = vpop.f32.mrf.mxu0 }
 0x564   :  { %v3546_v54 = vmul.f32 %v8016_v28, %v3518_v46  ;;  %v3646_v39 = vsel %vm820_vm3, %v3644_v59, %v3645_v63 }
 0x565   :  { %v3085_v31 = vpop.f32.mrf.mxu2  ;;  %5641 = vmatmul.msk.bf16.gmra.mxu3 %vm1981_vm6, %v7712_v15  ;;  %v8047_v5 = vmax.f32 %v3596_v23, %v3646_v39  ;;  %v2971_v23 = vadd.f32 %v7996_v21, %v2801_v18 }
 0x566   :  { %v3574_v7 = vadd.f32 %v8026_v37, %v3546_v54  ;;  %v3141_v2 = vadd.f32 %v3085_v31, %v2970_v1 }
 0x568   :  { %v3598_v41 = vmax.f32 %v3574_v7, 0.0  ;;  %v3346_v45 = vadd.f32 %v3290_v24, %v3141_v2  ;;  %v3298_v25 = vpop.f32.mrf.mxu3  ;;  %v8065_v31 = vpop.f32.mrf.mxu1 }
 0x56a   :  { %v3647_v13 = vrot.slane %v3598_v41, 1  ;;  %v3519_v61 = vadd.f32 %v3463_v22, %v3346_v45  ;;  %5616 = vmatmul.msk.bf16.gmra.mxu2 %vm1981_vm6, %v7696_v58  ;;  %v2802_v22 = vadd.f32 %v7773_v9, %v7884_v52  ;;  %v8073_v18 = vpop.f32.mrf.mxu0 }
 0x56c   :  { %v3547_v15 = vmul.f32 %v8016_v28, %v3519_v61  ;;  %v3648_v57 = vsel %vm820_vm3, %v3645_v63, %v3647_v13  ;;  %v2972_v63 = vadd.f32 %v8009_v4, %v2802_v22 }
 0x56d   :  { %v3088_v24 = vpop.f32.mrf.mxu2  ;;  %v3716_v59 = vmax.f32 %v3597_v51, %v3648_v57  ;;  %v8804_v57 = vrot.slane %v7678_v42, 2 }
 0x56e   :  { %v3575_v46 = vadd.f32 %v8026_v37, %v3547_v15  ;;  %v3142_v49 = vadd.f32 %v3088_v24, %v2971_v23  ;;  %v2803_v23 = vadd.f32 %v7781_v12, %v7894_v55 }
 0x56f   :  { %v3763_v52 = vrot.slane %v3716_v59, 2 }
 0x570   :  { %v3347_v40 = vadd.f32 %v3293_v29, %v3142_v49  ;;  %v3300_v54 = vpop.f32.mrf.mxu3  ;;  %v3599_v1 = vmax.f32 %v3575_v46, 0.0  ;;  %v2973_v49 = vadd.f32 %v8030_v19, %v2803_v23 }
 0x572   :  { %v3520_v58 = vadd.f32 %v8007_v26, %v3347_v40  ;;  %v3649_v39 = vrot.slane %v3599_v1, 1  ;;  %v8087_v40 = vpop.f32.mrf.mxu1 }
 0x574   :  { %v3548_v21 = vmul.f32 %v8016_v28, %v3520_v58  ;;  %v3650_v51 = vsel %vm820_vm3, %v3647_v13, %v3649_v39 }
 0x575   :  { %v3090_v7 = vpop.f32.mrf.mxu2  ;;  %v8070_v2 = vmax.f32 %v3598_v41, %v3650_v51  ;;  %v2932_v51 = vpop.f32.mrf.mxu0 }
 0x576   :  { %v3576_v29 = vadd.f32 %v8026_v37, %v3548_v21  ;;  %v3143_v45 = vadd.f32 %v3090_v7, %v2972_v63  ;;  %v2804_v63 = vadd.f32 %v7789_v34, %v7899_v16 }
 0x577   :  { %v3764_v9 = vrot.slane %v8070_v2, 2 }
 0x578   :  { %v3600_v26 = vmax.f32 %v3576_v29, 0.0  ;;  %v3348_v61 = vadd.f32 %v3295_v14, %v3143_v45  ;;  %v3303_v15 = vpop.f32.mrf.mxu3 }
 0x579   :  { %v3765_v4 = vsel %vm2826_vm8, %v3763_v52, %v3764_v9 }
 0x57a   :  { %v3651_v13 = vrot.slane %v3600_v26, 1  ;;  %v3521_v41 = vadd.f32 %v8018_v38, %v3348_v61  ;;  %5617 = vmatmul.msk.bf16.gmra.mxu2 %vm1981_vm6, %v8804_v57  ;;  %v3831_v24 = vmax.f32 %v8047_v5, %v3765_v4  ;;  %v3481_v4 = vpop.f32.mrf.mxu1  ;;  %v2805_v57 = vadd.f32 %v7795_v33, %v7908_v10 }
 0x57c   :  { %v3549_v46 = vmul.f32 %v8016_v28, %v3521_v41  ;;  %v3652_v14 = vsel %vm820_vm3, %v3649_v39, %v3651_v13 }
 0x57d   :  { %v3093_v12 = vpop.f32.mrf.mxu2  ;;  %v3718_v55 = vmax.f32 %v3599_v1, %v3652_v14  ;;  %v2974_v1 = vadd.f32 %v8041_v32, %v2804_v63  ;;  %v2975_v14 = vadd.f32 %v8059_v60, %v2805_v57  ;;  %v8805_v63 = vld [vmem:[#allocation7_spill] sm:$0xff] }
 0x57e   :  { %v3577_v22 = vadd.f32 %v8026_v37, %v3549_v46  ;;  %v3144_v58 = vadd.f32 %v3093_v12, %v2973_v49  ;;  %v2934_v46 = vpop.f32.mrf.mxu0 }
 0x57f   :  { %v3766_v38 = vrot.slane %v3718_v55, 2 }
 0x580   :  { %v3349_v21 = vadd.f32 %v3298_v25, %v3144_v58  ;;  %v3305_v42 = vpop.f32.mrf.mxu3  ;;  %v3601_v5 = vmax.f32 %v3577_v22, 0.0 }
 0x581   :  { %v3767_v7 = vsel %vm2826_vm8, %v3764_v9, %v3766_v38 }
 0x582   :  { %v3522_v19 = vadd.f32 %v8037_v48, %v3349_v21  ;;  %v3653_v39 = vrot.slane %v3601_v5, 1  ;;  %v3832_v29 = vmax.f32 %v3716_v59, %v3767_v7 }
 0x584   :  { %v3550_v45 = vmul.f32 %v8016_v28, %v3522_v19  ;;  %v3654_v52 = vsel %vm820_vm3, %v3651_v13, %v3653_v39  ;;  %v8097_v61 = vpack.c.bf16 %v3832_v29, %v3831_v24 }
 0x585   :  { %v3095_v25 = vpop.f32.mrf.mxu2  ;;  %v8099_v23 = vmax.f32 %v3600_v26, %v3654_v52 }
 0x586   :  { %v3578_v34 = vadd.f32 %v8026_v37, %v3550_v45  ;;  %v3145_v16 = vadd.f32 %v3095_v25, %v2974_v1 }
 0x587   :  { %v3768_v9 = vrot.slane %v8099_v23, 2 }
 0x588   :  { %v3602_v48 = vmax.f32 %v3578_v34, 0.0  ;;  %v3350_v41 = vadd.f32 %v3300_v54, %v3145_v16  ;;  %v3308_v59 = vpop.f32.mrf.mxu3 }
 0x589   :  { %v3769_v32 = vsel %vm2826_vm8, %v3766_v38, %v3768_v9 }
 0x58a   :  { %v3655_v13 = vrot.slane %v3602_v48, 1  ;;  %v3523_v24 = vadd.f32 %v8052_v62, %v3350_v41  ;;  %v3833_v26 = vmax.f32 %v8070_v2, %v3769_v32  ;;  %v2806_v62 = vadd.f32 %v8805_v63, %v7915_v47  ;;  %v3483_v2 = vpop.f32.mrf.mxu1 }
 0x58c   :  { %v3551_v49 = vmul.f32 %v8016_v28, %v3523_v24  ;;  %v3656_v12 = vsel %vm820_vm3, %v3653_v39, %v3655_v13 }
 0x58d   :  { %v3098_v22 = vpop.f32.mrf.mxu2  ;;  %v3720_v54 = vmax.f32 %v3601_v5, %v3656_v12  ;;  %v2976_v5 = vadd.f32 %v8073_v18, %v2806_v62 }
 0x58e   :  { %v3579_v58 = vadd.f32 %v8026_v37, %v3551_v49  ;;  %v3146_v21 = vadd.f32 %v3098_v22, %v2975_v14 }
 0x58f   :  { %v3770_v33 = vrot.slane %v3720_v54, 2 }
 0x590   :  { %v3351_v10 = vadd.f32 %v3303_v15, %v3146_v21  ;;  %v3310_v38 = vpop.f32.mrf.mxu3  ;;  %v3603_v7 = vmax.f32 %v3579_v58, 0.0  ;;  %v2937_v15 = vpop.f32.mrf.mxu0 }
 0x591   :  { %v3771_v19 = vsel %vm2826_vm8, %v3768_v9, %v3770_v33 }
 0x592   :  { %v3524_v29 = vadd.f32 %v8065_v31, %v3351_v10  ;;  %v3657_v60 = vrot.slane %v3603_v7, 1  ;;  %v3834_v45 = vmax.f32 %v3718_v55, %v3771_v19  ;;  %v2807_v55 = vadd.f32 %v7813_v8, %v7924_v36 }
 0x594   :  { %v3552_v39 = vmul.f32 %v8016_v28, %v3524_v29  ;;  %v3658_v1 = vsel %vm820_vm3, %v3655_v13, %v3657_v60  ;;  %v8119_v52 = vpack.c.bf16 %v3834_v45, %v3833_v26  ;;  %v2977_v49 = vadd.f32 %v2932_v51, %v2807_v55 }
 0x595   :  { %v3100_v25 = vpop.f32.mrf.mxu2  ;;  %v8121_v34 = vmax.f32 %v3602_v48, %v3658_v1  ;;  %v3486_v48 = vpop.f32.mrf.mxu1 }
 0x596   :  { %v3580_v47 = vadd.f32 %v8026_v37, %v3552_v39  ;;  %v3147_v16 = vadd.f32 %v3100_v25, %v2976_v5 }
 0x597   :  { %v3772_v9 = vrot.slane %v8121_v34, 2 }
 0x598   :  { %v3604_v31 = vmax.f32 %v3580_v47, 0.0  ;;  %v3352_v41 = vadd.f32 %v3305_v42, %v3147_v16  ;;  %v3313_v57 = vpop.f32.mrf.mxu3  ;;  %v2939_v8 = vpop.f32.mrf.mxu0 }
 0x599   :  { %v3773_v18 = vsel %vm2826_vm8, %v3770_v33, %v3772_v9  ;;  %v2808_v33 = vadd.f32 %v7821_v0, %v7931_v43 }
 0x59a   :  { %v3659_v32 = vrot.slane %v3604_v31, 1  ;;  %v3525_v13 = vadd.f32 %v8087_v40, %v3352_v41  ;;  %v3835_v24 = vmax.f32 %v8099_v23, %v3773_v18 }
 0x59b   :  { %v2978_v29 = vadd.f32 %v2934_v46, %v2808_v33 }
 0x59c   :  { %v3553_v26 = vmul.f32 %v8016_v28, %v3525_v13  ;;  %v3660_v14 = vsel %vm820_vm3, %v3657_v60, %v3659_v32 }
 0x59d   :  { %v3103_v12 = vpop.f32.mrf.mxu2  ;;  %v3722_v22 = vmax.f32 %v3603_v7, %v3660_v14  ;;  %v3488_v45 = vpop.f32.mrf.mxu1 }
 0x59e   :  { %v3581_v42 = vadd.f32 %v8026_v37, %v3553_v26  ;;  %v3148_v58 = vadd.f32 %v3103_v12, %v2977_v49  ;;  %v2810_v12 = vadd.f32 %v7845_v20, %v7945_v53 }
 0x59f   :  { %v3774_v36 = vrot.slane %v3722_v22, 2 }
 0x5a0   :  { %v3353_v21 = vadd.f32 %v3308_v59, %v3148_v58  ;;  %v3605_v40 = vmax.f32 %v3581_v42, 0.0  ;;  %v3315_v51 = vpop.f32.mrf.mxu3  ;;  %v2942_v47 = vpop.f32.mrf.mxu0  ;;  %v2980_v33 = vadd.f32 %v2939_v8, %v2810_v12 }
 0x5a1   :  { %v3775_v23 = vsel %vm2826_vm8, %v3772_v9, %v3774_v36 }
 0x5a2   :  { %v3526_v10 = vadd.f32 %v3481_v4, %v3353_v21  ;;  %v3661_v63 = vrot.slane %v3605_v40, 1  ;;  %v3836_v62 = vmax.f32 %v3720_v54, %v3775_v23  ;;  %v8806_v54 = vld [vmem:[#allocation6_spill] sm:$0xff] }
 0x5a3   :  { %v2809_v25 = vadd.f32 %v8806_v54, %v7938_v6 }
 0x5a4   :  { %v3554_v19 = vmul.f32 %v8016_v28, %v3526_v10  ;;  %v3662_v7 = vsel %vm820_vm3, %v3659_v32, %v3661_v63  ;;  %v8138_v60 = vpack.c.bf16 %v3836_v62, %v3835_v24 }
 0x5a5   :  { %v3105_v39 = vpop.f32.mrf.mxu2  ;;  %v8140_v59 = vmax.f32 %v3604_v31, %v3662_v7  ;;  %v2979_v55 = vadd.f32 %v2937_v15, %v2809_v25  ;;  %v3491_v49 = vpop.f32.mrf.mxu1 }
 0x5a6   :  { %v3582_v0 = vadd.f32 %v8026_v37, %v3554_v19  ;;  %v3149_v43 = vadd.f32 %v3105_v39, %v2978_v29 }
 0x5a7   :  { %v3776_v5 = vrot.slane %v8140_v59, 2 }
 0x5a8   :  { %v3606_v4 = vmax.f32 %v3582_v0, 0.0  ;;  %v3354_v1 = vadd.f32 %v3310_v38, %v3149_v43  ;;  %v3318_v32 = vpop.f32.mrf.mxu3 }
 0x5a9   :  { %v3777_v46 = vsel %vm2826_vm8, %v3774_v36, %v3776_v5  ;;  %v2944_v36 = vpop.f32.mrf.mxu0 }
 0x5aa   :  { %v3663_v16 = vrot.slane %v3606_v4, 1  ;;  %v3527_v9 = vadd.f32 %v3483_v2, %v3354_v1  ;;  %v3837_v41 = vmax.f32 %v8121_v34, %v3777_v46 }
 0x5ac   :  { %v3555_v31 = vmul.f32 %v8016_v28, %v3527_v9  ;;  %v3664_v18 = vsel %vm820_vm3, %v3661_v63, %v3663_v16 }
 0x5ad   :  { %v3108_v13 = vpop.f32.mrf.mxu2  ;;  %v3724_v24 = vmax.f32 %v3605_v40, %v3664_v18  ;;  %v3493_v29 = vpop.f32.mrf.mxu1 }
 0x5ae   :  { %v3583_v38 = vadd.f32 %v8026_v37, %v3555_v31  ;;  %v3150_v26 = vadd.f32 %v3108_v13, %v2979_v55 }
 0x5af   :  { %v3778_v6 = vrot.slane %v3724_v24, 2 }
 0x5b0   :  { %v3355_v14 = vadd.f32 %v3313_v57, %v3150_v26  ;;  %v3607_v2 = vmax.f32 %v3583_v38, 0.0  ;;  %v3320_v53 = vpop.f32.mrf.mxu3 }
 0x5b1   :  { %v3779_v34 = vsel %vm2826_vm8, %v3776_v5, %v3778_v6  ;;  %v2947_v1 = vpop.f32.mrf.mxu0 }
 0x5b2   :  { %v3528_v42 = vadd.f32 %v3486_v48, %v3355_v14  ;;  %v3665_v58 = vrot.slane %v3607_v2, 1  ;;  %v3838_v15 = vmax.f32 %v3722_v22, %v3779_v34  ;;  %v2811_v22 = vadd.f32 %v7859_v50, %v7954_v27 }
 0x5b3   :  { %v2812_v27 = vadd.f32 %v7872_v35, %v7959_v56 }
 0x5b4   :  { %v3556_v21 = vmul.f32 %v8016_v28, %v3528_v42  ;;  %v3666_v40 = vsel %vm820_vm3, %v3663_v16, %v3665_v58  ;;  %v8156_v23 = vpack.c.bf16 %v3838_v15, %v3837_v41  ;;  %v2981_v5 = vadd.f32 %v2942_v47, %v2811_v22 }
 0x5b5   :  { %v3110_v10 = vpop.f32.mrf.mxu2  ;;  %v8158_v63 = vmax.f32 %v3606_v4, %v3666_v40  ;;  %v3496_v55 = vpop.f32.mrf.mxu1  ;;  %v2982_v13 = vadd.f32 %v2944_v36, %v2812_v27  ;;  %v8808_v27 = vld [vmem:[#allocation8_spill] sm:$0xff] }
 0x5b6   :  { %v3584_v57 = vadd.f32 %v8026_v37, %v3556_v21  ;;  %v3151_v20 = vadd.f32 %v3110_v10, %v2980_v33 }
 0x5b7   :  { %v3780_v62 = vrot.slane %v8158_v63, 2 }
 0x5b8   :  { %v3608_v48 = vmax.f32 %v3584_v57, 0.0  ;;  %v3356_v19 = vadd.f32 %v3315_v51, %v3151_v20 }
 0x5b9   :  { %v3781_v8 = vsel %vm2826_vm8, %v3778_v6, %v3780_v62  ;;  %v2949_v14 = vpop.f32.mrf.mxu0 }
 0x5ba   :  { %v3667_v7 = vrot.slane %v3608_v48, 1  ;;  %v3529_v39 = vadd.f32 %v3488_v45, %v3356_v19  ;;  %v3839_v0 = vmax.f32 %v8140_v59, %v3781_v8  ;;  %v3323_v45 = vpop.f32.mrf.mxu3  ;;  %v2814_v19 = vadd.f32 %v7892_v30, %v7969_v11 }
 0x5bc   :  { %v3557_v43 = vmul.f32 %v8016_v28, %v3529_v39  ;;  %v3668_v4 = vsel %vm820_vm3, %v3665_v58, %v3667_v7 }
 0x5bd   :  { %v3113_v54 = vpop.f32.mrf.mxu2  ;;  %v3726_v25 = vmax.f32 %v3607_v2, %v3668_v4  ;;  %v3498_v10 = vpop.f32.mrf.mxu1 }
 0x5be   :  { %v3585_v51 = vadd.f32 %v8026_v37, %v3557_v43  ;;  %v3152_v46 = vadd.f32 %v3113_v54, %v2981_v5 }
 0x5bf   :  { %v3782_v16 = vrot.slane %v3726_v25, 2 }
 0x5c0   :  { %v3357_v50 = vadd.f32 %v3318_v32, %v3152_v46  ;;  %v3609_v9 = vmax.f32 %v3585_v51, 0.0 }
 0x5c1   :  { %v3783_v59 = vsel %vm2826_vm8, %v3780_v62, %v3782_v16  ;;  %v2952_v22 = vpop.f32.mrf.mxu0 }
 0x5c2   :  { %v3530_v41 = vadd.f32 %v3491_v49, %v3357_v50  ;;  %v3669_v31 = vrot.slane %v3609_v9, 1  ;;  %v3840_v47 = vmax.f32 %v3724_v24, %v3783_v59  ;;  %v2813_v24 = vadd.f32 %v7879_v44, %v7964_v3  ;;  %v3325_v36 = vpop.f32.mrf.mxu3 }
 0x5c4   :  { %v3558_v18 = vmul.f32 %v8016_v28, %v3530_v41  ;;  %v3670_v38 = vsel %vm820_vm3, %v3667_v7, %v3669_v31  ;;  %v8174_v26 = vpack.c.bf16 %v3840_v47, %v3839_v0  ;;  %v2983_v33 = vadd.f32 %v2947_v1, %v2813_v24  ;;  %v8809_v24 = vld [vmem:[#allocation17_spill] sm:$0xff] }
 0x5c5   :  { %v3115_v6 = vpop.f32.mrf.mxu2  ;;  %v8176_v32 = vmax.f32 %v3608_v48, %v3670_v38  ;;  %v2984_v0 = vadd.f32 %v2949_v14, %v2814_v19  ;;  %v3501_v11 = vpop.f32.mrf.mxu1 }
 0x5c6   :  { %v3586_v35 = vadd.f32 %v8026_v37, %v3558_v18  ;;  %v3153_v56 = vadd.f32 %v3115_v6, %v2982_v13 }
 0x5c7   :  { %v3784_v12 = vrot.slane %v8176_v32, 2 }
 0x5c8   :  { %v3610_v49 = vmax.f32 %v3586_v35, 0.0  ;;  %v3358_v2 = vadd.f32 %v3320_v53, %v3153_v56 }
 0x5c9   :  { %v3785_v34 = vsel %vm2826_vm8, %v3782_v16, %v3784_v12  ;;  %v2954_v47 = vpop.f32.mrf.mxu0 }
 0x5ca   :  { %v3671_v42 = vrot.slane %v3610_v49, 1  ;;  %v3531_v58 = vadd.f32 %v3493_v29, %v3358_v2  ;;  %v3841_v15 = vmax.f32 %v8158_v63, %v3785_v34  ;;  %v3328_v4 = vpop.f32.mrf.mxu3  ;;  %v8810_v34 = vld [vmem:[#allocation12_spill] sm:$0xff] }
 0x5cc   :  { %v3559_v21 = vmul.f32 %v8016_v28, %v3531_v58  ;;  %v3672_v40 = vsel %vm820_vm3, %v3669_v31, %v3671_v42 }
 0x5cd   :  { %v3118_v57 = vpop.f32.mrf.mxu2  ;;  %v3728_v20 = vmax.f32 %v3609_v9, %v3672_v40  ;;  %v3503_v58 = vpop.f32.mrf.mxu1 }
 0x5ce   :  { %v3587_v53 = vadd.f32 %v8026_v37, %v3559_v21  ;;  %v3154_v62 = vadd.f32 %v3118_v57, %v2983_v33 }
 0x5cf   :  { %v3786_v48 = vrot.slane %v3728_v20, 2 }
 0x5d0   :  { %v3611_v44 = vmax.f32 %v3587_v53, 0.0  ;;  %v3359_v3 = vadd.f32 %v3323_v45, %v3154_v62 }
 0x5d1   :  { %v3787_v63 = vsel %vm2826_vm8, %v3784_v12, %v3786_v48  ;;  %v2957_v53 = vpop.f32.mrf.mxu0 }
 0x5d2   :  { %v3673_v29 = vrot.slane %v3611_v44, 1  ;;  %v3532_v8 = vadd.f32 %v3496_v55, %v3359_v3  ;;  %v3842_v7 = vmax.f32 %v3726_v25, %v3787_v63  ;;  %v8807_v25 = vld [vmem:[#allocation10_spill] sm:$0xff]  ;;  %v3330_v14 = vpop.f32.mrf.mxu3 }
 0x5d3   :  { %v2815_v9 = vadd.f32 %v8808_v27, %v8807_v25 }
 0x5d4   :  { %v3560_v39 = vmul.f32 %v8016_v28, %v3532_v8  ;;  %v3674_v43 = vsel %vm820_vm3, %v3671_v42, %v3673_v29  ;;  %v8192_v5 = vpack.c.bf16 %v3842_v7, %v3841_v15  ;;  %v2816_v42 = vadd.f32 %v8810_v34, %v8809_v24  ;;  %v8812_v8 = vld [vmem:[#allocation9_spill] sm:$0xff] }
 0x5d5   :  { %v3120_v1 = vpop.f32.mrf.mxu2  ;;  %v8194_v54 = vmax.f32 %v3610_v49, %v3674_v43  ;;  %v2985_v18 = vadd.f32 %v2952_v22, %v2815_v9 }
 0x5d6   :  { %v3588_v51 = vadd.f32 %v8026_v37, %v3560_v39  ;;  %v3155_v30 = vadd.f32 %v3120_v1, %v2984_v0  ;;  %v3506_v1 = vpop.f32.mrf.mxu1 }
 0x5d7   :  { %v3788_v46 = vrot.slane %v8194_v54, 2 }
 0x5d8   :  { %v3612_v16 = vmax.f32 %v3588_v51, 0.0  ;;  %v3360_v50 = vadd.f32 %v3325_v36, %v3155_v30 }
 0x5d9   :  { %v3789_v45 = vsel %vm2826_vm8, %v3786_v48, %v3788_v46  ;;  %v2959_v27 = vpop.f32.mrf.mxu0 }
 0x5da   :  { %v3675_v59 = vrot.slane %v3612_v16, 1  ;;  %v3533_v41 = vadd.f32 %v3498_v10, %v3360_v50  ;;  %v3843_v31 = vmax.f32 %v8176_v32, %v3789_v45  ;;  %v2986_v10 = vadd.f32 %v2954_v47, %v2816_v42  ;;  %v3333_v7 = vpop.f32.mrf.mxu3 }
 0x5dc   :  { %v3561_v55 = vmul.f32 %v8016_v28, %v3533_v41  ;;  %v3676_v13 = vsel %vm820_vm3, %v3673_v29, %v3675_v59  ;;  %v8811_v29 = vld [vmem:[#allocation14_spill] sm:$0xff]  ;;  %v8814_v41 = vld [vmem:[#allocation13_spill] sm:$0xff] }
 0x5dd   :  { %v3123_v38 = vpop.f32.mrf.mxu2  ;;  %v3730_v6 = vmax.f32 %v3611_v44, %v3676_v13 }
 0x5de   :  { %v3589_v35 = vadd.f32 %v8026_v37, %v3561_v55  ;;  %v3156_v56 = vadd.f32 %v3123_v38, %v2985_v18 }
 0x5df   :  { %v3790_v12 = vrot.slane %v3730_v6, 2 }
 0x5e0   :  { %v3613_v49 = vmax.f32 %v3589_v35, 0.0  ;;  %v3361_v2 = vadd.f32 %v3328_v4, %v3156_v56 }
 0x5e1   :  { %v3791_v32 = vsel %vm2826_vm8, %v3788_v46, %v3790_v12 }
 0x5e2   :  { %v3677_v15 = vrot.slane %v3613_v49, 1  ;;  %v3534_v36 = vadd.f32 %v3501_v11, %v3361_v2  ;;  %v3844_v21 = vmax.f32 %v3728_v20, %v3791_v32  ;;  %v2817_v20 = vadd.f32 %v8812_v8, %v8811_v29  ;;  %v3335_v38 = vpop.f32.mrf.mxu3 }
 0x5e4   :  { %v3678_v33 = vsel %vm820_vm3, %v3675_v59, %v3677_v15  ;;  %v3562_v40 = vmul.f32 %v8016_v28, %v3534_v36  ;;  %v3871_v57 = vpack.c.bf16 %v3844_v21, %v3843_v31  ;;  %v2987_v11 = vadd.f32 %v2957_v53, %v2817_v20  ;;  %v8813_v59 = vld [vmem:[#allocation19_spill] sm:$0xff] }
 0x5e5   :  { %v3125_v62 = vpop.f32.mrf.mxu2  ;;  %v8210_v48 = vmax.f32 %v3612_v16, %v3678_v33  ;;  %v2818_v31 = vadd.f32 %v8814_v41, %v8813_v59  ;;  %v8816_v36 = vld [vmem:[#allocation11_spill] sm:$0xff]  ;;  %v2962_v33 = vpop.f32.mrf.mxu0 }
 0x5e6   :  { %v3590_v44 = vadd.f32 %v8026_v37, %v3562_v40  ;;  %v3157_v3 = vadd.f32 %v3125_v62, %v2986_v10 }
 0x5e7   :  { %v3792_v19 = vrot.slane %v8210_v48, 2  ;;  %v2988_v56 = vadd.f32 %v2959_v27, %v2818_v31 }
 0x5e8   :  { %v3614_v22 = vmax.f32 %v3590_v44, 0.0  ;;  %v3362_v63 = vadd.f32 %v3330_v14, %v3157_v3 }
 0x5e9   :  { %v3793_v39 = vsel %vm2826_vm8, %v3790_v12, %v3792_v19 }
 0x5ea   :  { %v3679_v0 = vrot.slane %v3614_v22, 1  ;;  %v3535_v43 = vadd.f32 %v3503_v58, %v3362_v63  ;;  %v3845_v4 = vmax.f32 %v8194_v54, %v3793_v39 }
 0x5ec   :  { %v3680_v51 = vsel %vm820_vm3, %v3677_v15, %v3679_v0  ;;  %v3563_v30 = vmul.f32 %v8016_v28, %v3535_v43  ;;  %v8815_v15 = vld [vmem:[#allocation16_spill] sm:$0xff] }
 0x5ed   :  { %v3732_v46 = vmax.f32 %v3613_v49, %v3680_v51  ;;  %v3128_v16 = vpop.f32.mrf.mxu2  ;;  %v3508_v49 = vpop.f32.mrf.mxu1  ;;  %v2819_v21 = vadd.f32 %v8816_v36, %v8815_v15  ;;  %v6189_v15 = vmov 0  }
 0x5ee   :  { %v3591_v50 = vadd.f32 %v8026_v37, %v3563_v30  ;;  %v3158_v25 = vadd.f32 %v3128_v16, %v2987_v11  ;;  %v2964_v11 = vpop.f32.mrf.mxu0  ;;  %v3949_v36 = vsel %vm3947_vm11, 65535, %v6189_v15 }
 0x5ef   :  { %v3794_v9 = vrot.slane %v3732_v46, 2  ;;  %v2989_v3 = vadd.f32 %v2962_v33, %v2819_v21 }
 0x5f0   :  { %v3363_v45 = vadd.f32 %v3333_v7, %v3158_v25  ;;  %v3615_v47 = vmax.f32 %v3591_v50, 0.0 }
 0x5f1   :  { %v3795_v54 = vsel %vm2826_vm8, %v3792_v19, %v3794_v9 }
 0x5f2   :  { %v3536_v55 = vadd.f32 %v3506_v1, %v3363_v45  ;;  %v3846_v18 = vmax.f32 %v3730_v6, %v3795_v54  ;;  %v3681_v13 = vrot.slane %v3615_v47, 1 }
 0x5f4   :  { %v3564_v35 = vmul.f32 %v8016_v28, %v3536_v55  ;;  %v3872_v14 = vpack.c.bf16 %v3846_v18, %v3845_v4  ;;  %v3682_v12 = vsel %vm820_vm3, %v3679_v0, %v3681_v13 }
 0x5f5   :  { %v3130_v2 = vpop.f32.mrf.mxu2  ;;  %v8226_v24 = vmax.f32 %v3614_v22, %v3682_v12  ;;  %v3338_v22 = vpop.f32.mrf.mxu3 }
 0x5f6   :  { %v3592_v34 = vadd.f32 %v8026_v37, %v3564_v35  ;;  %v3159_v42 = vadd.f32 %v3130_v2, %v2988_v56  ;;  %3953 = vmatpush.bf16.msra.mxu0 %v3872_v14  ;;  %v3511_v7 = vpop.f32.mrf.mxu1  ;;  %v5668_v56 = vld [vmem:[%s8727_s11] sm:$0xf]  ;;  %v6097_v14 = vld [vmem:[%s8727_s11 + $0x4] sm:$0xf0] }
 0x5f7   :  { %v3796_v58 = vrot.slane %v8226_v24, 2 }
 0x5f8   :  { %v3616_v32 = vmax.f32 %v3592_v34, 0.0  ;;  %v3364_v6 = vadd.f32 %v3335_v38, %v3159_v42 }
 0x5f9   :  { %v3797_v40 = vsel %vm2826_vm8, %v3794_v9, %v3796_v58 }
 0x5fa   :  { %v3683_v10 = vrot.slane %v3616_v32, 1  ;;  %v3537_v53 = vadd.f32 %v3508_v49, %v3364_v6  ;;  %3954 = vmatpush.bf16.msra.mxu0 %v3871_v57  ;;  %v3847_v62 = vmax.f32 %v8210_v48, %v3797_v40  ;;  %v8817_v57 = vld [vmem:[#allocation15_spill] sm:$0xff]  ;;  %v5669_v49 = vor.u32 %v6097_v14, %v5668_v56 }
 0x5fb   :  { %v2820_v43 = vadd.f32 %v8817_v57, %v8001_v17  ;;  %v6109_v56 = vld [vmem:[%s8723_s7 + $0x18] sm:$0xff] }
 0x5fc   :  { %v3565_v44 = vmul.f32 %v8016_v28, %v3537_v53  ;;  %v3684_v19 = vsel %vm820_vm3, %v3681_v13, %v3683_v10  ;;  %4187 = vmatpush.bf16.msra.mxu3 %v6109_v56 }
 0x5fd   :  { %v3133_v63 = vpop.f32.mrf.mxu2  ;;  %v3734_v29 = vmax.f32 %v3615_v47, %v3684_v19  ;;  %v2990_v50 = vadd.f32 %v2964_v11, %v2820_v43  ;;  %v3340_v59 = vpop.f32.mrf.mxu3  ;;  %v3864_v43 = vld [vmem:[%s8727_s11 + $0x50] sm:$0x33] }
 0x5fe   :  { %v3593_v8 = vadd.f32 %v8026_v37, %v3565_v44  ;;  %v3160_v20 = vadd.f32 %v3133_v63, %v2989_v3  ;;  %3955 = vmatpush.bf16.msra.mxu0 %v8192_v5  ;;  %v3513_v47 = vpop.f32.mrf.mxu1  ;;  %v5676_v44 = vld [vmem:[%s8727_s11 + $0x10] sm:$0xf]  ;;  %v6099_v3 = vld [vmem:[%s8727_s11 + $0x14] sm:$0xf0]  ;;  %v6101_v63 = vld [vmem:[%s8727_s11 + $0x24] sm:$0xf0] }
 0x5ff   :  { %v3798_v39 = vrot.slane %v3734_v29, 2  ;;  %v5677_v19 = vor.u32 %v6099_v3, %v5676_v44  ;;  %v6098_v11 = vld [vmem:[%s8727_s11 + $0x14] sm:$0xf] }
 0x600   :  { %v3365_v0 = vadd.f32 %v3338_v22, %v3160_v20  ;;  %v3617_v48 = vmax.f32 %v3593_v8, 0.0  ;;  %v5684_v22 = vld [vmem:[%s8727_s11 + $0x20] sm:$0xf]  ;;  %v5692_v8 = vld [vmem:[%s8727_s11 + $0x30] sm:$0xf] }
 0x601   :  { %v3799_v4 = vsel %vm2826_vm8, %v3796_v58, %v3798_v39  ;;  %v6103_v20 = vld [vmem:[%s8727_s11 + $0x34] sm:$0xf0] }
 0x602   :  { %v3538_v1 = vadd.f32 %v3511_v7, %v3365_v0  ;;  %3956 = vmatpush.bf16.msra.mxu0 %v8174_v26  ;;  %v3685_v51 = vrot.slane %v3617_v48, 1  ;;  %v3848_v30 = vmax.f32 %v3732_v46, %v3799_v4  ;;  %v5693_v7 = vor.u32 %v6103_v20, %v5692_v8  ;;  %v6105_v0 = vld [vmem:[%s8727_s11 + $0x44] sm:$0xf0] }
 0x604   :  { %v3566_v16 = vmul.f32 %v8016_v28, %v3538_v1  ;;  %v3686_v5 = vsel %vm820_vm3, %v3683_v10, %v3685_v51  ;;  %v3873_v25 = vpack.c.bf16 %v3848_v30, %v3847_v62  ;;  %v6096_v1 = vld [vmem:[%s8727_s11 + $0x4] sm:$0xf] }
 0x605   :  { %v3135_v27 = vpop.f32.mrf.mxu2  ;;  %v3735_v9 = vmax.f32 %v3616_v32, %v3686_v5  ;;  %v6100_v5 = vld [vmem:[%s8727_s11 + $0x24] sm:$0xf] }
 0x606   :  { %v3594_v45 = vadd.f32 %v8026_v37, %v3566_v16  ;;  %v3161_v17 = vadd.f32 %v3135_v27, %v2990_v50  ;;  %3957 = vmatpush.bf16.msra.mxu0 %v8156_v23  ;;  %v5678_v16 = vld [vmem:[%s8727_s11 + $0x18] sm:$0xf0] }
 0x607   :  { %v3800_v41 = vrot.slane %v3735_v9, 2  ;;  %v5681_v50 = vor.u32 %v6098_v11, %v5678_v16 }
 0x608   :  { %v3618_v31 = vmax.f32 %v3594_v45, 0.0  ;;  %v3366_v26 = vadd.f32 %v3340_v59, %v3161_v17  ;;  %v6102_v17 = vld [vmem:[%s8727_s11 + $0x34] sm:$0xf]  ;;  %v5694_v59 = vld [vmem:[%s8727_s11 + $0x38] sm:$0xf0] }
 0x609   :  { %v3801_v46 = vsel %vm2826_vm8, %v3798_v39, %v3800_v41  ;;  %v5700_v39 = vld [vmem:[%s8727_s11 + $0x40] sm:$0xf] }
 0x60a   :  { %v3687_v54 = vrot.slane %v3618_v31, 1  ;;  %v3539_v55 = vadd.f32 %v3513_v47, %v3366_v26  ;;  %3958 = vmatpush.bf16.msra.mxu0 %v8138_v60  ;;  %v3849_v18 = vmax.f32 %v8226_v24, %v3801_v46  ;;  %v5701_v57 = vor.u32 %v6105_v0, %v5700_v39  ;;  %v6104_v47 = vld [vmem:[%s8727_s11 + $0x44] sm:$0xf]  ;;  %v5702_v46 = vld [vmem:[%s8727_s11 + $0x48] sm:$0xf0] }
 0x60c   :  { %v3567_v13 = vmul.f32 %v8016_v28, %v3539_v55  ;;  %v3688_v38 = vsel %vm820_vm3, %v3685_v51, %v3687_v54  ;;  %v5670_v51 = vld [vmem:[%s8727_s11 + $0x8] sm:$0xf0] }
 0x60d   :  { %v3736_v35 = vmax.f32 %v3617_v48, %v3688_v38  ;;  %v3908_v48 = vunpack.c.l.b16 %v3864_v43  ;;  %v5673_v30 = vor.u32 %v6096_v1, %v5670_v51 }
 0x60e   :  { %v3595_v23 = vadd.f32 %v8026_v37, %v3567_v13  ;;  %3959 = vmatpush.bf16.msra.mxu0 %v8119_v52  ;;  %v3909_v13 = vunpack.c.h.b16 %v3864_v43 }
 0x60f   :  { %v3802_v60 = vrot.slane %v3736_v35, 2  ;;  %v3920_v4 = vpack.c.b16 %v3908_v48, %v3908_v48  ;;  %v6125_v48 = vld [vmem:[%s8723_s7 + $0x98] sm:$0xff] }
 0x610   :  { %v3619_v12 = vmax.f32 %v3595_v23, 0.0  ;;  %v3921_v38 = vpack.c.b16 %v3909_v13, %v3909_v13 }
 0x611   :  { %v3803_v28 = vsel %vm2826_vm8, %v3800_v41, %v3802_v60  ;;  %v5697_v41 = vor.u32 %v6102_v17, %v5694_v59  ;;  %v6123_v59 = vld [vmem:[%s8723_s7 + $0x88] sm:$0xff] }
 0x612   :  { %v3689_v2 = vrot.slane %v3619_v12, 1  ;;  %3960 = vmatpush.bf16.msra.mxu0 %v8097_v61  ;;  %v3850_v24 = vmax.f32 %v3734_v29, %v3803_v28  ;;  %v5685_v29 = vor.u32 %v6101_v63, %v5684_v22 }
 0x614   :  { %v3738_v37 = vmax.f32 %v3619_v12, %v3689_v2  ;;  %v3690_v52 = vsel %vm820_vm3, %v3687_v54, %v3689_v2  ;;  %v3874_v34 = vpack.c.bf16 %v3850_v24, %v3849_v18  ;;  %v5705_v54 = vor.u32 %v6104_v47, %v5702_v46  ;;  %v6107_v12 = vld [vmem:[%s8723_s7 + $0x8] sm:$0xff]  ;;  %v6106_v2 = vld [vmem:[%s8723_s7] sm:$0xff]  ;;  %v6128_v24 = vld [vmem:[%s8723_s7 + $0xb0] sm:$0xff] }
 0x615   :  { %3961 = vmatmul.bf16.vlgmr.msra.gmra.mxu0 %v5669_v49  ;;  %v3737_v42 = vmax.f32 %v3618_v31, %v3690_v52  ;;  %v6129_v49 = vld [vmem:[%s8723_s7 + $0xb8] sm:$0xff] }
 0x616   :  { %v3806_v58 = vrot.slane %v3738_v37, 2  ;;  %v6127_v37 = vld [vmem:[%s8723_s7 + $0xa8] sm:$0xff] }
 0x617   :  { %v3804_v32 = vrot.slane %v3737_v42, 2 }
 0x618   :  { %v3853_v6 = vmax.f32 %v3737_v42, %v3806_v58  ;;  %v6126_v42 = vld [vmem:[%s8723_s7 + $0xa0] sm:$0xff] }
 0x619   :  { %v3805_v21 = vsel %vm2826_vm8, %v3802_v60, %v3804_v32  ;;  %v3807_v33 = vsel %vm2826_vm8, %v3804_v32, %v3806_v58  ;;  %v6108_v60 = vld [vmem:[%s8723_s7 + $0x10] sm:$0xff]  ;;  %v6113_v58 = vld [vmem:[%s8723_s7 + $0x38] sm:$0xff] }
 0x61a   :  { %v3876_v40 = vpack.c.bf16 %v3853_v6, %v3853_v6  ;;  %v3851_v10 = vmax.f32 %v3735_v9, %v3805_v21  ;;  %v3852_v61 = vmax.f32 %v3736_v35, %v3807_v33  ;;  %4188 = vmatpush.bf16.msra.mxu3 %v6108_v60  ;;  %4126 = vmatpush.bf16.msra.mxu2 %v6113_v58  ;;  %v6116_v32 = vld [vmem:[%s8723_s7 + $0x50] sm:$0xff]  ;;  %v6111_v21 = vld [vmem:[%s8723_s7 + $0x28] sm:$0xff]  ;;  %v6114_v33 = vld [vmem:[%s8723_s7 + $0x40] sm:$0xff] }
 0x61b   :  { %v6112_v6 = vld [vmem:[%s8723_s7 + $0x30] sm:$0xff] }
 0x61c   :  { %v3951_v53 = vand.u32 %v3949_v36, %v3876_v40  ;;  %v3875_v62 = vpack.c.bf16 %v3852_v61, %v3851_v10  ;;  %v6115_v36 = vld [vmem:[%s8723_s7 + $0x48] sm:$0xff]  ;;  %v6110_v40 = vld [vmem:[%s8723_s7 + $0x20] sm:$0xff] }
 0x61e   :  { %3994 = vmatpush.bf16.msrb.mxu0 %v3951_v53  ;;  %4189 = vmatpush.bf16.msra.mxu3 %v6107_v12 }
 0x61f   :  { %4127 = vmatpush.bf16.msra.mxu2 %v6112_v6 }
 0x622   :  { %3995 = vmatpush.bf16.msrb.mxu0 %v3875_v62  ;;  %4190 = vmatpush.bf16.msra.mxu3 %v6106_v2 }
 0x623   :  { %4128 = vmatpush.bf16.msra.mxu2 %v6111_v21 }
 0x625   :  { %3966 = vmatmul.bf16.gmra.mxu0 %v5677_v19 }
 0x626   :  { %3996 = vmatpush.bf16.msrb.mxu0 %v3874_v34  ;;  %v6117_v34 = vld [vmem:[%s8723_s7 + $0x58] sm:$0xff]  ;;  %4470 = vmatpush.bf16.msrb.mxu3 %v6125_v48  ;;  %v6119_v48 = vld [vmem:[%s8723_s7 + $0x68] sm:$0xff] }
 0x627   :  { %4275 = vmatpush.bf16.msra.mxu1 %v6117_v34  ;;  %4129 = vmatpush.bf16.msra.mxu2 %v6110_v40 }
 0x62a   :  { %3997 = vmatpush.bf16.msrb.mxu0 %v3873_v25  ;;  %v5686_v25 = vld [vmem:[%s8727_s11 + $0x28] sm:$0xf0] }
 0x62b   :  { %v5689_v27 = vor.u32 %v6100_v5, %v5686_v25  ;;  %4276 = vmatpush.bf16.msra.mxu1 %v6116_v32 }
 0x62e   :  { %4556 = vmatpush.bf16.msra.mxu0 %v6129_v49 }
 0x62f   :  { %4277 = vmatpush.bf16.msra.mxu1 %v6115_v36  ;;  %v6133_v36 = vld [vmem:[%s8723_s7 + $0xd8] sm:$0xff] }
 0x632   :  { %4557 = vmatpush.bf16.msra.mxu0 %v6128_v24 }
 0x633   :  { %4278 = vmatpush.bf16.msra.mxu1 %v6114_v33 }
 0x635   :  { %3971 = vmatmul.bf16.gmra.mxu0 %v5685_v29 }
 0x636   :  { %4558 = vmatpush.bf16.msra.mxu0 %v6127_v37 }
 0x637   :  { %4653 = vmatpush.bf16.msrb.mxu1 %v6133_v36 }
 0x63a   :  { %4559 = vmatpush.bf16.msra.mxu0 %v6126_v42 }
 0x645   :  { %3976 = vmatmul.bf16.gmra.mxu0 %v5693_v7 }
 0x655   :  { %3981 = vmatmul.bf16.gmra.mxu0 %v5701_v57 }
 0x665   :  { %3986 = vmatmul.bf16.gmra.mxu0 %v3920_v4 }
 0x675   :  { %5706 = vmatmul.msk.bf16.vlgmr.msrb.gmra.mxu0 %vm3928_vm12, %v5673_v30 }
 0x685   :  { %5707 = vmatmul.msk.bf16.gmra.mxu0 %vm3928_vm12, %v5681_v50 }
 0x692   :  { %v3962_v9 = vpop.f32.mrf.mxu0 }
 0x695   :  { %5708 = vmatmul.msk.bf16.gmra.mxu0 %vm3928_vm12, %v5689_v27 }
 0x69a   :  { %v3964_v45 = vpop.f32.mrf.mxu0 }
 0x6a2   :  { %v3967_v31 = vpop.f32.mrf.mxu0 }
 0x6a5   :  { %5709 = vmatmul.msk.bf16.gmra.mxu0 %vm3928_vm12, %v5697_v41 }
 0x6aa   :  { %v3969_v26 = vpop.f32.mrf.mxu0 }
 0x6b2   :  { %v8325_v55 = vpop.f32.mrf.mxu0 }
 0x6b5   :  { %5710 = vmatmul.msk.bf16.gmra.mxu0 %vm3928_vm12, %v5705_v54 }
 0x6ba   :  { %v8328_v18 = vpop.f32.mrf.mxu0 }
 0x6c2   :  { %v8330_v35 = vpop.f32.mrf.mxu0 }
 0x6c5   :  { %5711 = vmatmul.msk.bf16.gmra.mxu0 %vm3928_vm12, %v3921_v38 }
 0x6ca   :  { %v8333_v23 = vpop.f32.mrf.mxu0 }
 0x6d2   :  { %v8338_v14 = vpop.f32.mrf.mxu0 }
 0x6da   :  { %v8349_v28 = vpop.f32.mrf.mxu0 }
 0x6e2   :  { %v3987_v52 = vpop.f32.mrf.mxu0 }
 0x6ea   :  { %v3988_v15 = vpop.f32.mrf.mxu0 }
 0x6f2   :  { %v3999_v10 = vpop.f32.mrf.mxu0 }
 0x6f3   :  { %v4000_v53 = vadd.f32 %v3999_v10, %v3962_v9  ;;  %v6121_v10 = vld [vmem:[%s8723_s7 + $0x78] sm:$0xff] }
 0x6f4   :  { %4366 = vmatpush.bf16.msrb.mxu2 %v6121_v10 }
 0x6fa   :  { %v4001_v61 = vpop.f32.mrf.mxu0 }
 0x6fb   :  { %v4002_v62 = vadd.f32 %v4001_v61, %v3964_v45  ;;  %v6124_v45 = vld [vmem:[%s8723_s7 + $0x90] sm:$0xff] }
 0x6fc   :  { %4471 = vmatpush.bf16.msrb.mxu3 %v6124_v45  ;;  %v6132_v61 = vld [vmem:[%s8723_s7 + $0xd0] sm:$0xff] }
 0x6fd   :  { %v8387_v44 = vpack.c.bf16 %v4002_v62, %v4000_v53  ;;  %4654 = vmatpush.bf16.msrb.mxu1 %v6132_v61 }
 0x6ff   :  { %5756 = vmatmul.msk.bf16.vlgmr.msra.gmra.mxu3 %vm4109_vm13, %v8387_v44  ;;  %v4052_v63 = vshll.u32 %v8387_v44, 16  ;;  %v4226_v39 = vrot.slane %v8387_v44, 1  ;;  %v4050_v57 = vshrl.u32 %v8387_v44, 16  ;;  %v4317_v1 = vrot.slane %v8387_v44, 3 }
 0x700   :  { %4472 = vmatpush.bf16.msrb.mxu3 %v6123_v59 }
 0x701   :  { %v4054_v7 = vrot.slane %v4052_v63, 1 }
 0x702   :  { %v4004_v3 = vpop.f32.mrf.mxu0 }
 0x703   :  { %v4005_v19 = vadd.f32 %v4004_v3, %v3967_v31  ;;  %v4055_v30 = vor.u32 %v4054_v7, %v4050_v57 }
 0x705   :  { %v8391_v22 = vpack.c.bf16 %v4005_v19, %v4002_v62 }
 0x707   :  { %5868 = vmatmul.msk.bf16.vlgmr.msra.gmra.mxu0 %vm4109_vm13, %v8391_v22  ;;  %v4695_v16 = vshrl.u32 %v8391_v22, 16  ;;  %v4698_v25 = vshll.u32 %v8391_v22, 16  ;;  %v4817_v41 = vrot.slane %v8391_v22, 3 }
 0x709   :  { %v4697_v31 = vrot.slane %v4695_v16, 2  ;;  %v4700_v54 = vrot.slane %v4698_v25, 3  ;;  %v6118_v25 = vld [vmem:[%s8723_s7 + $0x60] sm:$0xff] }
 0x70a   :  { %v4006_v29 = vpop.f32.mrf.mxu0 }
 0x70b   :  { %v4007_v8 = vadd.f32 %v4006_v29, %v3969_v26  ;;  %v4701_v49 = vor.u32 %v4700_v54, %v4697_v31  ;;  %v6131_v29 = vld [vmem:[%s8723_s7 + $0xc8] sm:$0xff] }
 0x70c   :  { %4655 = vmatpush.bf16.msrb.mxu1 %v6131_v29 }
 0x70d   :  { %v8396_v20 = vpack.c.bf16 %v4007_v8, %v4005_v19 }
 0x70f   :  { %5757 = vmatmul.msk.bf16.gmra.mxu3 %vm4109_vm13, %v8396_v20  ;;  %v4227_v0 = vrot.slane %v8396_v20, 1  ;;  %v4057_v43 = vshll.u32 %v8396_v20, 16  ;;  %v4318_v4 = vrot.slane %v8396_v20, 3  ;;  %v4061_v34 = vshrl.u32 %v8396_v20, 16 }
 0x711   :  { %v4228_v51 = vsel %vm820_vm3, %v4226_v39, %v4227_v0  ;;  %v4059_v11 = vrot.slane %v4057_v43, 1  ;;  %v8419_v5 = vsel %vm381_vm1, %v4317_v1, %v4318_v4 }
 0x712   :  { %v4009_v50 = vpop.f32.mrf.mxu0  ;;  %5784 = vmatmul.msk.bf16.vlgmr.msra.gmra.mxu1 %vm4109_vm13, %v4228_v51 }
 0x713   :  { %v4010_v27 = vadd.f32 %v4009_v50, %v8325_v55  ;;  %v4060_v9 = vsel %vm1873_vm7, %v4055_v30, %v4059_v11  ;;  %v6122_v55 = vld [vmem:[%s8723_s7 + $0x80] sm:$0xff]  ;;  %v4063_v32 = vor.u32 %v4061_v34, %v4059_v11 }
 0x714   :  { %5736 = vmatmul.msk.bf16.vlgmr.msra.gmra.mxu2 %vm4109_vm13, %v4060_v9  ;;  %4473 = vmatpush.bf16.msrb.mxu3 %v6122_v55  ;;  %v6130_v11 = vld [vmem:[%s8723_s7 + $0xc0] sm:$0xff]  ;;  %v4412_v55 = vrot.slane %v4061_v34, 3 }
 0x715   :  { %v8428_v17 = vpack.c.bf16 %v4010_v27, %v4007_v8  ;;  %4656 = vmatpush.bf16.msrb.mxu1 %v6130_v11 }
 0x717   :  { %v4702_v26 = vshrl.u32 %v8428_v17, 16  ;;  %v4705_v47 = vshll.u32 %v8428_v17, 16  ;;  %5869 = vmatmul.msk.bf16.gmra.mxu0 %vm4109_vm13, %v8428_v17  ;;  %v4818_v46 = vrot.slane %v8428_v17, 3 }
 0x719   :  { %v8443_v13 = vsel %vm381_vm1, %v4817_v41, %v4818_v46  ;;  %v4704_v38 = vrot.slane %v4702_v26, 2  ;;  %v4707_v56 = vrot.slane %v4705_v47, 3 }
 0x71a   :  { %v4011_v60 = vpop.f32.mrf.mxu0 }
 0x71b   :  { %v4012_v12 = vadd.f32 %v4011_v60, %v8328_v18  ;;  %v4708_v2 = vor.u32 %v4707_v56, %v4704_v38  ;;  %v4413_v38 = vrot.slane %v4057_v43, 4  ;;  %v4409_v56 = vrot.slane %v4050_v57, 3 }
 0x71c   :  { %v4410_v60 = vrot.slane %v4052_v63, 4 }
 0x71d   :  { %v8446_v24 = vpack.c.bf16 %v4012_v12, %v4010_v27  ;;  %v8449_v37 = vsel %vm3168_vm10, %v4701_v49, %v4708_v2 }
 0x71f   :  { %5758 = vmatmul.msk.bf16.gmra.mxu3 %vm4109_vm13, %v8446_v24  ;;  %v4229_v52 = vrot.slane %v8446_v24, 1  ;;  %v4065_v42 = vshll.u32 %v8446_v24, 16  ;;  %v4320_v58 = vrot.slane %v8446_v24, 3  ;;  %v4069_v50 = vshrl.u32 %v8446_v24, 16  ;;  %v6140_v24 = vld [vmem:[%s8723_s7 + $0x110] sm:$0xff] }
 0x721   :  { %v4230_v18 = vsel %vm820_vm3, %v4227_v0, %v4229_v52  ;;  %v4067_v6 = vrot.slane %v4065_v42, 1  ;;  %v8465_v21 = vsel %vm381_vm1, %v4318_v4, %v4320_v58  ;;  %v4417_v11 = vrot.slane %v4065_v42, 4 }
 0x722   :  { %v4014_v15 = vpop.f32.mrf.mxu0  ;;  %5785 = vmatmul.msk.bf16.gmra.mxu1 %vm4109_vm13, %v4230_v18  ;;  %v4411_v18 = vor.u32 %v4410_v60, %v4409_v56  ;;  %v6136_v56 = vld [vmem:[%s8723_s7 + $0xf0] sm:$0xff] }
 0x723   :  { %v4015_v33 = vadd.f32 %v4014_v15, %v8330_v35  ;;  %v4068_v40 = vsel %vm1873_vm7, %v4063_v32, %v4067_v6  ;;  %v6120_v35 = vld [vmem:[%s8723_s7 + $0x70] sm:$0xff]  ;;  %v4071_v45 = vor.u32 %v4069_v50, %v4067_v6 }
 0x724   :  { %5737 = vmatmul.msk.bf16.gmra.mxu2 %vm4109_vm13, %v4068_v40 }
 0x725   :  { %v8476_v53 = vpack.c.bf16 %v4015_v33, %v4012_v12  ;;  %4367 = vmatpush.bf16.msrb.mxu2 %v6120_v35 }
 0x727   :  { %5870 = vmatmul.msk.bf16.gmra.mxu0 %vm4109_vm13, %v8476_v53  ;;  %v4820_v62 = vrot.slane %v8476_v53, 3  ;;  %v4710_v3 = vshrl.u32 %v8476_v53, 16  ;;  %v4713_v19 = vshll.u32 %v8476_v53, 16 }
 0x729   :  { %v8490_v8 = vsel %vm381_vm1, %v4818_v46, %v4820_v62  ;;  %v4712_v7 = vrot.slane %v4710_v3, 2  ;;  %v4715_v39 = vrot.slane %v4713_v19, 3  ;;  %4368 = vmatpush.bf16.msrb.mxu2 %v6119_v48 }
 0x72a   :  { %v4016_v0 = vpop.f32.mrf.mxu0 }
 0x72b   :  { %v4017_v4 = vadd.f32 %v4016_v0, %v8333_v23  ;;  %v4716_v1 = vor.u32 %v4715_v39, %v4712_v7 }
 0x72d   :  { %v8496_v51 = vpack.c.bf16 %v4017_v4, %v4015_v33  ;;  %v8499_v30 = vsel %vm3168_vm10, %v4708_v2, %v4716_v1  ;;  %4369 = vmatpush.bf16.msrb.mxu2 %v6118_v25 }
 0x72f   :  { %5759 = vmatmul.msk.bf16.gmra.mxu3 %vm4109_vm13, %v8496_v51  ;;  %v4231_v16 = vrot.slane %v8496_v51, 1  ;;  %v4073_v23 = vshll.u32 %v8496_v51, 16  ;;  %v4322_v27 = vrot.slane %v8496_v51, 3  ;;  %v4077_v33 = vshrl.u32 %v8496_v51, 16 }
 0x731   :  { %v4232_v9 = vsel %vm820_vm3, %v4229_v52, %v4231_v16  ;;  %v4075_v59 = vrot.slane %v4073_v23, 1  ;;  %v8518_v31 = vsel %vm381_vm1, %v4320_v58, %v4322_v27  ;;  %v4414_v52 = vor.u32 %v4413_v38, %v4412_v55 }
 0x732   :  { %5786 = vmatmul.msk.bf16.gmra.mxu1 %vm4109_vm13, %v4232_v9  ;;  %v4019_v41 = vpop.f32.mrf.mxu0  ;;  %v4421_v42 = vrot.slane %v4073_v23, 4  ;;  %v6137_v23 = vld [vmem:[%s8723_s7 + $0xf8] sm:$0xff] }
 0x733   :  { %v4076_v26 = vsel %vm1873_vm7, %v4071_v45, %v4075_v59  ;;  %v4020_v47 = vadd.f32 %v4019_v41, %v8338_v14  ;;  %v4415_v36 = vsel %vm4408_vm14, %v4411_v18, %v4414_v52  ;;  %v4079_v35 = vor.u32 %v4077_v33, %v4075_v59  ;;  %v6141_v59 = vld [vmem:[%s8723_s7 + $0x118] sm:$0xff]  ;;  %4775 = vmatpush.bf16.msra.mxu2 %v6137_v23 }
 0x734   :  { %5738 = vmatmul.msk.bf16.gmra.mxu2 %vm4109_vm13, %v4076_v26  ;;  %v4604_v45 = vrot.slane %v8391_v22, 2  ;;  %4866 = vmatpush.bf16.msra.mxu3 %v6141_v59  ;;  %v6139_v22 = vld [vmem:[%s8723_s7 + $0x108] sm:$0xff] }
 0x735   :  { %v8523_v46 = vpack.c.bf16 %v4020_v47, %v4020_v47  ;;  %v8525_v54 = vpack.c.bf16 %v4020_v47, %v4017_v4  ;;  %v4607_v47 = vrot.slane %v8476_v53, 2 }
 0x737   :  { %5871 = vmatmul.msk.bf16.gmra.mxu0 %vm4109_vm13, %v8525_v54  ;;  %v4324_v14 = vrot.slane %v8523_v46, 3  ;;  %v4822_v12 = vrot.slane %v8525_v54, 3  ;;  %v4718_v49 = vshrl.u32 %v8525_v54, 16  ;;  %v4721_v2 = vshll.u32 %v8525_v54, 16  ;;  %4776 = vmatpush.bf16.msra.mxu2 %v6136_v56 }
 0x738   :  { %v4081_v63 = vshll.u32 %v8523_v46, 16  ;;  %v4233_v32 = vrot.slane %v8523_v46, 1  ;;  %4867 = vmatpush.bf16.msra.mxu3 %v6140_v24  ;;  %v4424_v51 = vshrl.u32 %v8523_v46, 16  ;;  %v6135_v46 = vld [vmem:[%s8723_s7 + $0xe8] sm:$0xff] }
 0x739   :  { %v8540_v43 = vsel %vm381_vm1, %v4322_v27, %v4324_v14  ;;  %v8543_v57 = vsel %vm381_vm1, %v4820_v62, %v4822_v12  ;;  %v4720_v44 = vrot.slane %v4718_v49, 2  ;;  %v4723_v58 = vrot.slane %v4721_v2, 3 }
 0x73a   :  { %v4021_v20 = vpop.f32.mrf.mxu0  ;;  %v4083_v40 = vrot.slane %v4081_v63, 1  ;;  %v4234_v3 = vsel %vm820_vm3, %v4231_v16, %v4233_v32  ;;  %v4605_v27 = vrot.slane %v8428_v17, 2  ;;  %v4420_v17 = vrot.slane %v4077_v33, 3 }
 0x73b   :  { %v4022_v34 = vadd.f32 %v4021_v20, %v8349_v28  ;;  %v4724_v15 = vor.u32 %v4723_v58, %v4720_v44  ;;  %v4426_v38 = vrot.slane %v4424_v51, 3  ;;  %v4427_v53 = vrot.slane %v4081_v63, 4  ;;  %4777 = vmatpush.bf16.msra.mxu2 %v6135_v46 }
 0x73c   :  { %v4084_v0 = vsel %vm1873_vm7, %v4079_v35, %v4083_v40  ;;  %v4606_v41 = vsel %vm2826_vm8, %v4604_v45, %v4605_v27  ;;  %4868 = vmatpush.bf16.msra.mxu3 %v6139_v22  ;;  %v4422_v26 = vor.u32 %v4421_v42, %v4420_v17  ;;  %v4608_v55 = vsel %vm2826_vm8, %v4605_v27, %v4607_v47 }
 0x73d   :  { %v8548_v6 = vpack.c.bf16 %v4022_v34, %v4022_v34  ;;  %v8557_v62 = vsel %vm3168_vm10, %v4716_v1, %v4724_v15  ;;  %v4416_v1 = vrot.slane %v4069_v50, 3  ;;  %v6138_v50 = vld [vmem:[%s8723_s7 + $0x100] sm:$0xff]  ;;  %v4428_v60 = vor.u32 %v4427_v53, %v4426_v38 }
 0x73e   :  { %v4609_v14 = vrot.slane %v8525_v54, 2 }
 0x73f   :  { %5840 = vmatmul.msk.bf16.vlgmr.msrb.gmra.mxu3 %vm4109_vm13, %v4415_v36  ;;  %v4727_v10 = vshrl.u32 %v8548_v6, 16  ;;  %v4730_v61 = vshll.u32 %v8548_v6, 16  ;;  %v4824_v28 = vrot.slane %v8548_v6, 3  ;;  %v4418_v16 = vor.u32 %v4417_v11, %v4416_v1 }
 0x740   :  { %4869 = vmatpush.bf16.msra.mxu3 %v6138_v50  ;;  %v4610_v49 = vsel %vm2826_vm8, %v4607_v47, %v4609_v14  ;;  %v4611_v2 = vrot.slane %v8548_v6, 2 }
 0x741   :  { %v4729_v19 = vrot.slane %v4727_v10, 2  ;;  %v4732_v29 = vrot.slane %v4730_v61, 3  ;;  %v8561_v7 = vsel %vm381_vm1, %v4822_v12, %v4824_v28  ;;  %v4419_v9 = vsel %vm4408_vm14, %v4414_v52, %v4418_v16  ;;  %v6134_v12 = vld [vmem:[%s8723_s7 + $0xe0] sm:$0xff] }
 0x742   :  { %5787 = vmatmul.msk.bf16.gmra.mxu1 %vm4109_vm13, %v4234_v3  ;;  %v4024_v39 = vpop.f32.mrf.mxu0  ;;  %4778 = vmatpush.bf16.msra.mxu2 %v6134_v12  ;;  %v4612_v54 = vsel %vm2826_vm8, %v4609_v14, %v4611_v2 }
 0x743   :  { %v4733_v48 = vor.u32 %v4732_v29, %v4729_v19 }
 0x744   :  { %5739 = vmatmul.msk.bf16.gmra.mxu2 %vm4109_vm13, %v4084_v0 }
 0x745   :  { %v8567_v4 = vsel %vm3168_vm10, %v4724_v15, %v4733_v48 }
 0x74a   :  { %v4025_v25 = vpop.f32.mrf.mxu0 }
 0x74f   :  { %5841 = vmatmul.msk.bf16.gmra.mxu3 %vm4109_vm13, %v4419_v9 }
 0x752   :  { %5896 = vmatmul.msk.bf16.vlgmr.msrb.gmra.mxu1 %vm4109_vm13, %v4606_v41 }
 0x754   :  { %5812 = vmatmul.msk.bf16.vlgmr.msrb.gmra.mxu2 %vm4109_vm13, %v8419_v5  ;;  %v4423_v5 = vsel %vm4408_vm14, %v4418_v16, %v4422_v26 }
 0x75f   :  { %5842 = vmatmul.msk.bf16.gmra.mxu3 %vm4109_vm13, %v4423_v5 }
 0x762   :  { %5897 = vmatmul.msk.bf16.gmra.mxu1 %vm4109_vm13, %v4608_v55 }
 0x764   :  { %5813 = vmatmul.msk.bf16.gmra.mxu2 %vm4109_vm13, %v8465_v21  ;;  %v4429_v21 = vsel %vm4408_vm14, %v4422_v26, %v4428_v60 }
 0x76f   :  { %5843 = vmatmul.msk.bf16.gmra.mxu3 %vm4109_vm13, %v4429_v21 }
 0x772   :  { %5898 = vmatmul.msk.bf16.gmra.mxu1 %vm4109_vm13, %v4610_v49 }
 0x774   :  { %5814 = vmatmul.msk.bf16.gmra.mxu2 %vm4109_vm13, %v8518_v31 }
 0x77f   :  { %5952 = vmatmul.msk.bf16.vlgmr.msra.gmra.mxu3 %vm4109_vm13, %v8443_v13 }
 0x782   :  { %v4192_v52 = vpop.f32.mrf.mxu3  ;;  %5899 = vmatmul.msk.bf16.gmra.mxu1 %vm4109_vm13, %v4612_v54 }
 0x784   :  { %5815 = vmatmul.msk.bf16.gmra.mxu2 %vm4109_vm13, %v8540_v43  ;;  %v4561_v26 = vpop.f32.mrf.mxu0 }
 0x78a   :  { %v4194_v20 = vpop.f32.mrf.mxu3 }
 0x78f   :  { %v4280_v44 = vpop.f32.mrf.mxu1  ;;  %5953 = vmatmul.msk.bf16.gmra.mxu3 %vm4109_vm13, %v8490_v8 }
 0x792   :  { %v4197_v63 = vpop.f32.mrf.mxu3 }
 0x794   :  { %5924 = vmatmul.msk.bf16.vlgmr.msra.gmra.mxu2 %vm4109_vm13, %v8449_v37 }
 0x797   :  { %v4131_v31 = vpop.f32.mrf.mxu2  ;;  %v4282_v34 = vpop.f32.mrf.mxu1 }
 0x798   :  { %v4193_v13 = vadd.f32 %v4192_v52, %v4131_v31 }
 0x79a   :  { %v4199_v58 = vpop.f32.mrf.mxu3  ;;  %v4300_v18 = vadd.f32 %v4280_v44, %v4193_v13 }
 0x79f   :  { %v4133_v32 = vpop.f32.mrf.mxu2  ;;  %5954 = vmatmul.msk.bf16.gmra.mxu3 %vm4109_vm13, %v8543_v57  ;;  %v4285_v43 = vpop.f32.mrf.mxu1 }
 0x7a0   :  { %v4195_v6 = vadd.f32 %v4194_v20, %v4133_v32  ;;  %v4563_v32 = vpop.f32.mrf.mxu0 }
 0x7a2   :  { %v4202_v15 = vpop.f32.mrf.mxu3  ;;  %v4301_v36 = vadd.f32 %v4282_v34, %v4195_v6 }
 0x7a4   :  { %5925 = vmatmul.msk.bf16.gmra.mxu2 %vm4109_vm13, %v8499_v30 }
 0x7a7   :  { %v4136_v8 = vpop.f32.mrf.mxu2  ;;  %v4287_v10 = vpop.f32.mrf.mxu1 }
 0x7a8   :  { %v4198_v33 = vadd.f32 %v4197_v63, %v4136_v8 }
 0x7aa   :  { %v4204_v40 = vpop.f32.mrf.mxu3  ;;  %v4302_v37 = vadd.f32 %v4285_v43, %v4198_v33 }
 0x7af   :  { %v4138_v61 = vpop.f32.mrf.mxu2  ;;  %5955 = vmatmul.msk.bf16.gmra.mxu3 %vm4109_vm13, %v8561_v7  ;;  %v4290_v57 = vpop.f32.mrf.mxu1 }
 0x7b0   :  { %v4200_v28 = vadd.f32 %v4199_v58, %v4138_v61  ;;  %v8652_v61 = vld [vmem:[%s8724_s8] ss:$0 sm:$0xff] }
 0x7b2   :  { %v4207_v35 = vpop.f32.mrf.mxu3  ;;  %v4303_v3 = vadd.f32 %v4287_v10, %v4200_v28 }
 0x7b4   :  { %5926 = vmatmul.msk.bf16.gmra.mxu2 %vm4109_vm13, %v8557_v62 }
 0x7b7   :  { %v4141_v19 = vpop.f32.mrf.mxu2  ;;  %v4292_v0 = vpop.f32.mrf.mxu1 }
 0x7b8   :  { %v4203_v29 = vadd.f32 %v4202_v15, %v4141_v19 }
 0x7ba   :  { %v4209_v39 = vpop.f32.mrf.mxu3  ;;  %v4304_v30 = vadd.f32 %v4290_v57, %v4203_v29  ;;  %v8658_v29 = vld [vmem:[%s8725_s9] ss:$0 sm:$0xff] }
 0x7bf   :  { %v4143_v48 = vpop.f32.mrf.mxu2  ;;  %v4295_v27 = vpop.f32.mrf.mxu1 }
 0x7c0   :  { %v4205_v1 = vadd.f32 %v4204_v40, %v4143_v48 }
 0x7c2   :  { %v4475_v11 = vpop.f32.mrf.mxu3  ;;  %v4305_v16 = vadd.f32 %v4292_v0, %v4205_v1 }
 0x7c4   :  { %5927 = vmatmul.msk.bf16.gmra.mxu2 %vm4109_vm13, %v8567_v4 }
 0x7c7   :  { %v4146_v7 = vpop.f32.mrf.mxu2  ;;  %v8643_v24 = vpop.f32.mrf.mxu1 }
 0x7c8   :  { %v4208_v25 = vadd.f32 %v4207_v35, %v4146_v7 }
 0x7ca   :  { %v4477_v9 = vpop.f32.mrf.mxu3  ;;  %v4306_v45 = vadd.f32 %v4295_v27, %v4208_v25 }
 0x7cf   :  { %v4148_v59 = vpop.f32.mrf.mxu2  ;;  %v4658_v5 = vpop.f32.mrf.mxu1 }
 0x7d0   :  { %v8641_v62 = vadd.f32 %v4209_v39, %v4148_v59 }
 0x7d2   :  { %v4480_v41 = vpop.f32.mrf.mxu3 }
 0x7d7   :  { %v4371_v22 = vpop.f32.mrf.mxu2  ;;  %v4660_v43 = vpop.f32.mrf.mxu1 }
 0x7d8   :  { %v4391_v17 = vadd.f32 %v4371_v22, %v4300_v18 }
 0x7da   :  { %v4495_v42 = vadd.f32 %v4475_v11, %v4391_v17  ;;  %v4482_v50 = vpop.f32.mrf.mxu3 }
 0x7dc   :  { %v4581_v47 = vadd.f32 %v4561_v26, %v4495_v42 }
 0x7de   :  { %v4678_v55 = vadd.f32 %v4658_v5, %v4581_v47 }
 0x7df   :  { %v4373_v4 = vpop.f32.mrf.mxu2  ;;  %v4663_v10 = vpop.f32.mrf.mxu1 }
 0x7e0   :  { %v4392_v51 = vadd.f32 %v4373_v4, %v4301_v36  ;;  %v4566_v36 = vpop.f32.mrf.mxu0 }
 0x7e2   :  { %v4496_v23 = vadd.f32 %v4477_v9, %v4392_v51  ;;  %v4485_v38 = vpop.f32.mrf.mxu3 }
 0x7e7   :  { %v4376_v53 = vpop.f32.mrf.mxu2  ;;  %v4665_v11 = vpop.f32.mrf.mxu1 }
 0x7e8   :  { %v4393_v56 = vadd.f32 %v4376_v53, %v4302_v37  ;;  %v4582_v37 = vadd.f32 %v4563_v32, %v4496_v23  ;;  %v4568_v39 = vpop.f32.mrf.mxu0  ;;  %v4307_v32 = vadd.f32 %v8643_v24, %v8641_v62 }
 0x7ea   :  { %v4497_v60 = vadd.f32 %v4480_v41, %v4393_v56  ;;  %v4487_v46 = vpop.f32.mrf.mxu3  ;;  %v4679_v28 = vadd.f32 %v4660_v43, %v4582_v37 }
 0x7ec   :  { %v4583_v0 = vadd.f32 %v4566_v36, %v4497_v60 }
 0x7ef   :  { %v4378_v14 = vpop.f32.mrf.mxu2  ;;  %v4668_v26 = vpop.f32.mrf.mxu1 }
 0x7f0   :  { %v4394_v21 = vadd.f32 %v4378_v14, %v4303_v3  ;;  %v4571_v17 = vpop.f32.mrf.mxu0 }
 0x7f2   :  { %v4498_v12 = vadd.f32 %v4482_v50, %v4394_v21  ;;  %v4490_v49 = vpop.f32.mrf.mxu3 }
 0x7f4   :  { %v4584_v41 = vadd.f32 %v4568_v39, %v4498_v12 }
 0x7f6   :  { %v4681_v50 = vadd.f32 %v4665_v11, %v4584_v41  ;;  %v6146_v41 = vld [vmem:[%s8729_s13 + $0x20] sm:$0xff] }
 0x7f7   :  { %v4381_v2 = vpop.f32.mrf.mxu2 }
 0x7f8   :  { %v4395_v54 = vadd.f32 %v4381_v2, %v4304_v30  ;;  %v4573_v56 = vpop.f32.mrf.mxu0  ;;  %v4670_v2 = vpop.f32.mrf.mxu1 }
 0x7fa   :  { %v4499_v52 = vadd.f32 %v4485_v38, %v4395_v54  ;;  %v8645_v63 = vpop.f32.mrf.mxu3 }
 0x7fc   :  { %v4585_v51 = vadd.f32 %v4571_v17, %v4499_v52 }
 0x7fe   :  { %v4682_v60 = vadd.f32 %v4668_v26, %v4585_v51  ;;  %v6145_v26 = vld [vmem:[%s8729_s13 + $0x18] sm:$0xff] }
 0x7ff   :  { %v4383_v20 = vpop.f32.mrf.mxu2 }
 0x800   :  { %v4396_v44 = vadd.f32 %v4383_v20, %v4305_v16  ;;  %v4680_v16 = vadd.f32 %v4663_v10, %v4583_v0  ;;  %v4576_v52 = vpop.f32.mrf.mxu0 }
 0x802   :  { %v4500_v31 = vadd.f32 %v4487_v46, %v4396_v44  ;;  %v4871_v18 = vpop.f32.mrf.mxu3 }
 0x804   :  { %v4586_v54 = vadd.f32 %v4573_v56, %v4500_v31 }
 0x807   :  { %v4386_v34 = vpop.f32.mrf.mxu2 }
 0x808   :  { %v4397_v13 = vadd.f32 %v4386_v34, %v4306_v45  ;;  %v4578_v39 = vpop.f32.mrf.mxu0 }
 0x80a   :  { %v8647_v58 = vadd.f32 %v4490_v49, %v4397_v13  ;;  %v4873_v15 = vpop.f32.mrf.mxu3  ;;  %v4683_v13 = vadd.f32 %v4670_v2, %v4586_v54 }
 0x80f   :  { %v4388_v6 = vpop.f32.mrf.mxu2 }
 0x810   :  { %v4398_v36 = vadd.f32 %v4388_v6, %v4307_v32 }
 0x812   :  { %v4876_v35 = vpop.f32.mrf.mxu3  ;;  %v4502_v10 = vadd.f32 %v8645_v63, %v4398_v36  ;;  %v6148_v63 = vld [vmem:[%s8729_s13 + $0x30] sm:$0xff] }
 0x814   :  { %v4588_v6 = vadd.f32 %v4578_v39, %v4502_v10 }
 0x817   :  { %v4780_v8 = vpop.f32.mrf.mxu2 }
 0x818   :  { %v4800_v33 = vadd.f32 %v4780_v8, %v4678_v55 }
 0x81a   :  { %v4891_v40 = vadd.f32 %v4871_v18, %v4800_v33  ;;  %v4878_v59 = vpop.f32.mrf.mxu3  ;;  %v4587_v33 = vadd.f32 %v4576_v52, %v8647_v58  ;;  %v6149_v58 = vld [vmem:[%s8729_s13 + $0x38] sm:$0xff] }
 0x81b   :  { %5021 = vmatpush.bf16.msra.mxu1 %v6149_v58 }
 0x81c   :  { %v4903_v57 = vmul.f32 %v8652_v61, %v4891_v40  ;;  %v4673_v40 = vpop.f32.mrf.mxu1 }
 0x81e   :  { %v4915_v1 = vadd.f32 %v8658_v29, %v4903_v57 }
 0x81f   :  { %v4782_v3 = vpop.f32.mrf.mxu2  ;;  %5022 = vmatpush.bf16.msra.mxu1 %v6148_v63 }
 0x820   :  { %v4801_v19 = vadd.f32 %v4782_v3, %v4679_v28  ;;  %v4923_v9 = vmax.f32 %v4915_v1, 0.0  ;;  %v4684_v28 = vadd.f32 %v4673_v40, %v4587_v33 }
 0x822   :  { %v4892_v30 = vadd.f32 %v4873_v15, %v4801_v19  ;;  %v4881_v23 = vpop.f32.mrf.mxu3 }
 0x824   :  { %v4904_v48 = vmul.f32 %v8652_v61, %v4892_v30 }
 0x826   :  { %v4916_v7 = vadd.f32 %v8658_v29, %v4904_v48  ;;  %v4675_v48 = vpop.f32.mrf.mxu1 }
 0x827   :  { %v4785_v25 = vpop.f32.mrf.mxu2  ;;  %v4685_v1 = vadd.f32 %v4675_v48, %v4588_v6 }
 0x828   :  { %v4802_v27 = vadd.f32 %v4785_v25, %v4680_v16  ;;  %v4924_v45 = vmax.f32 %v4916_v7, 0.0 }
 0x82a   :  { %v8663_v22 = vpack.c.bf16 %v4924_v45, %v4923_v9  ;;  %v4893_v42 = vadd.f32 %v4876_v35, %v4802_v27  ;;  %v4883_v34 = vpop.f32.mrf.mxu3  ;;  %v6147_v27 = vld [vmem:[%s8729_s13 + $0x28] sm:$0xff] }
 0x82b   :  { %5023 = vmatpush.bf16.msra.mxu1 %v6147_v27 }
 0x82c   :  { %v4905_v5 = vmul.f32 %v8652_v61, %v4893_v42 }
 0x82e   :  { %v4917_v53 = vadd.f32 %v8658_v29, %v4905_v5  ;;  %v4931_v5 = vld [vmem:[%s8728_s12] sm:$0x1]  ;;  %s5043_s12 = sshll.u32 %s8731_s15, 4  ;;  %s5044_s12 = int_to_ptr.hbm [resolvable:$true] %s5043_s12 }
 0x82f   :  { %v4787_v47 = vpop.f32.mrf.mxu2  ;;  %5024 = vmatpush.bf16.msra.mxu1 %v6146_v41 }
 0x830   :  { %v4803_v55 = vadd.f32 %v4787_v47, %v4681_v50  ;;  %v4925_v12 = vmax.f32 %v4917_v53, 0.0 }
 0x832   :  { %v4894_v4 = vadd.f32 %v4878_v59, %v4803_v55  ;;  %v4886_v3 = vpop.f32.mrf.mxu3  ;;  %v6142_v55 = vld [vmem:[%s8729_s13] sm:$0xff] }
 0x833   :  { %5025 = vmatpush.bf16.msra.mxu1 %v6145_v26 }
 0x834   :  { %v4906_v38 = vmul.f32 %v8652_v61, %v4894_v4 }
 0x836   :  { %v4918_v46 = vadd.f32 %v8658_v29, %v4906_v38  ;;  %v6159_v38 = vld [vmem:[%s8730_s14] ss:$0 sm:$0xff] }
 0x837   :  { %v4790_v14 = vpop.f32.mrf.mxu2 }
 0x838   :  { %v4804_v21 = vadd.f32 %v4790_v14, %v4682_v60  ;;  %v4926_v49 = vmax.f32 %v4918_v46, 0.0 }
 0x83a   :  { %v4933_v20 = vpack.c.bf16 %v4926_v49, %v4925_v12  ;;  %v4895_v44 = vadd.f32 %v4881_v23, %v4804_v21  ;;  %v4888_v25 = vpop.f32.mrf.mxu3 }
 0x83c   :  { %v4907_v43 = vmul.f32 %v8652_v61, %v4895_v44 }
 0x83e   :  { %v4919_v31 = vadd.f32 %v8658_v29, %v4907_v43 }
 0x83f   :  { %v4792_v18 = vpop.f32.mrf.mxu2 }
 0x840   :  { %v4805_v15 = vadd.f32 %v4792_v18, %v4683_v13  ;;  %v4927_v24 = vmax.f32 %v4919_v31, 0.0 }
 0x842   :  { %v4896_v8 = vadd.f32 %v4883_v34, %v4805_v15 }
 0x844   :  { %v4908_v37 = vmul.f32 %v8652_v61, %v4896_v8 }
 0x846   :  { %v4920_v35 = vadd.f32 %v8658_v29, %v4908_v37 }
 0x847   :  { %v4795_v57 = vpop.f32.mrf.mxu2 }
 0x848   :  { %v4806_v62 = vadd.f32 %v4795_v57, %v4684_v28  ;;  %v4928_v19 = vmax.f32 %v4920_v35, 0.0 }
 0x84a   :  { %v4934_v30 = vpack.c.bf16 %v4928_v19, %v4927_v24  ;;  %v4897_v0 = vadd.f32 %v4886_v3, %v4806_v62 }
 0x84c   :  { %v4909_v16 = vmul.f32 %v8652_v61, %v4897_v0 }
 0x84e   :  { %v4921_v45 = vadd.f32 %v8658_v29, %v4909_v16 }
 0x84f   :  { %v4797_v11 = vpop.f32.mrf.mxu2 }
 0x850   :  { %v4807_v7 = vadd.f32 %v4797_v11, %v4685_v1  ;;  %v4929_v42 = vmax.f32 %v4921_v45, 0.0 }
 0x852   :  { %v4898_v9 = vadd.f32 %v4888_v25, %v4807_v7 }
 0x854   :  { %v4910_v59 = vmul.f32 %v8652_v61, %v4898_v9  ;;  %v6144_v61 = vld [vmem:[%s8729_s13 + $0x10] sm:$0xff] }
 0x855   :  { %5026 = vmatpush.bf16.msra.mxu1 %v6144_v61 }
 0x856   :  { %v4922_v17 = vadd.f32 %v8658_v29, %v4910_v59  ;;  %v6143_v29 = vld [vmem:[%s8729_s13 + $0x8] sm:$0xff] }
 0x858   :  { %v4930_v50 = vmax.f32 %v4922_v17, 0.0 }
 0x859   :  { %5027 = vmatpush.bf16.msra.mxu1 %v6143_v29 }
 0x85a   :  { %v4935_v47 = vpack.c.bf16 %v4930_v50, %v4929_v42 }
 0x85c   :  { %4943 = vmatpush.bf16.msrb.mxu0 %v4935_v47 }
 0x85d   :  { %5028 = vmatpush.bf16.msra.mxu1 %v6142_v55 }
 0x860   :  { %4944 = vmatpush.bf16.msrb.mxu0 %v4934_v30 }
 0x864   :  { %4945 = vmatpush.bf16.msrb.mxu0 %v4933_v20 }
 0x868   :  { %4946 = vmatpush.bf16.msrb.mxu0 %v8663_v22 }
 0x86b   :  { %5956 = vmatmul.msk.bf16.vlgmr.msrb.gmra.mxu0 %vm4109_vm13, %v4931_v5 }
 0x8e8   :  { %v4948_v4 = vpop.f32.mrf.mxu0 }
 0x8e9   :  { %v4952_v51 = vpack.c.bf16 %v4948_v4, %v4948_v4 }
 0x8eb   :  { %5029 = vmatmul.bf16.vlgmr.msra.gmra.mxu1 %v4952_v51 }
 0x8f0   :  { %v4950_v23 = vpop.f32.mrf.mxu0 }
 0x968   :  { %v5030_v22 = vpop.f32.mrf.mxu1 }
 0x969   :  { %v5031_v53 = vadd.f32 %v6159_v38, %v5030_v22 }
 0x96b   :  { %5035 = vst.msk [vmem:[#allocation2] sm:$0x3] %vm5034_vm15, %v5031_v53 }
 0x96c   :  { %5046 = dma.vmem_to_hbm [thread:$0]  %s5042_s28, 32, %s5044_s12, [#allocation3]  }
 0x970   :  { %v5032_v56 = vpop.f32.mrf.mxu1 }
 0x971   :  { %6186 = dma.done.wait [#allocation3], 32  }
 0x972   :  { %6187 = vsyncadd [#allocation3], 4294967264 }
 0x973   :  { %5051 = vsyncpa [#allocation3], 1 }

</bundles_post_ra>
